<compile_context>
chip_gen: v7x
topology: tpu7x:2x2x1
jax: 0.10.0
libtpu: 0.0.40
codegen_flags: <defaults>
</compile_context>

<pallas_src>
import functools
import math

import jax
import jax.numpy as jnp
from jax.experimental import pallas as pl
from jax.experimental.pallas import tpu as pltpu


# ----------------------------------------------------------------------------
# tile-size helpers
# ----------------------------------------------------------------------------

def _row_tile(n):
    """Sublane-dim tile: multiple of 8, prefers >= 2 tiles so a 'parallel'
    grid axis has extent >= 2 (keeps both TensorCores busy on v7x)."""
    for t in (512, 256, 128, 64, 32, 16, 8):
        if n % t == 0 and n // t >= 2:
            return t
    return n


def _lane_tile(n):
    """Lane-dim / K tile: multiple of 128 if possible, else the full dim."""
    for t in (1024, 512, 256, 128):
        if n % t == 0:
            return t
    return n


# ----------------------------------------------------------------------------
# tiled linear (matmul + bias [+ relu])
# ----------------------------------------------------------------------------

def _linear_kernel(x_ref, w_ref, b_ref, o_ref, acc_ref, *, activation):
    k = pl.program_id(2)

    @pl.when(k == 0)
    def _init():
        acc_ref[...] = jnp.zeros_like(acc_ref)

    acc_ref[...] += jnp.dot(x_ref[...], w_ref[...],
                            preferred_element_type=jnp.float32)

    @pl.when(k == pl.num_programs(2) - 1)
    def _fin():
        y = acc_ref[...] + b_ref[...]
        if activation == "relu":
            y = jnp.maximum(y, 0.0)
        o_ref[...] = y.astype(o_ref.dtype)


def linear(x, w, b, activation=None):
    """x:(N,Din) @ w:(Din,Dout) + b -> (N,Dout), tiled over (rows, cols, K)."""
    N, Din = x.shape
    Dout = w.shape[1]
    tm, tn, tk = _row_tile(N), _lane_tile(Dout), _lane_tile(Din)
    kernel = functools.partial(_linear_kernel, activation=activation)
    return pl.pallas_call(
        kernel,
        out_shape=jax.ShapeDtypeStruct((N, Dout), x.dtype),
        grid=(N // tm, Dout // tn, Din // tk),
        in_specs=[
            pl.BlockSpec((tm, tk), lambda i, j, k: (i, k)),
            pl.BlockSpec((tk, tn), lambda i, j, k: (k, j)),
            pl.BlockSpec((1, tn), lambda i, j, k: (0, j)),
        ],
        out_specs=pl.BlockSpec((tm, tn), lambda i, j, k: (i, j)),
        scratch_shapes=[pltpu.VMEM((tm, tn), jnp.float32)],
        compiler_params=pltpu.CompilerParams(
            dimension_semantics=("parallel", "parallel", "arbitrary")),
    )(x, w, b.reshape(1, Dout))


# ----------------------------------------------------------------------------
# attention: one grid step per batch element, all heads inside the kernel
# ----------------------------------------------------------------------------

def _mha_heads(q, k, v, mask, num_heads, scale):
    """All heads for one batch element; q:(Lq,H), k/v:(Lk,H) -> (Lq,H)."""
    H = q.shape[-1]
    dh = H // num_heads
    outs = []
    for h in range(num_heads):                    # static unroll, nh is small
        qh = q[:, h * dh:(h + 1) * dh]
        kh = k[:, h * dh:(h + 1) * dh]
        vh = v[:, h * dh:(h + 1) * dh]
        s = jnp.dot(qh, kh.T, preferred_element_type=jnp.float32) * scale
        if mask is not None:
            s = s + mask
        s = s - jnp.max(s, axis=-1, keepdims=True)
        p = jnp.exp(s)
        # EUP reciprocal: takes the divide off the VPU slot.
        p = p * pl.reciprocal(jnp.sum(p, axis=-1, keepdims=True), approx=True)
        outs.append(jnp.dot(p, vh, preferred_element_type=jnp.float32))
    return jnp.concatenate(outs, axis=-1)


def _self_attn_kernel(qkv_ref, m_ref, o_ref, *, num_heads, scale):
    H = o_ref.shape[-1]
    qkv = qkv_ref[0]                              # (L, 3H) packed q|k|v
    # clamp -inf -> -1e30 so a fully-masked row can never produce NaN
    mask = jnp.maximum(m_ref[...], jnp.float32(-1e30))
    out = _mha_heads(qkv[:, :H], qkv[:, H:2 * H], qkv[:, 2 * H:],
                     mask, num_heads, scale)
    o_ref[0] = out.astype(o_ref.dtype)


def _cross_attn_kernel(q_ref, kv_ref, o_ref, *, num_heads, scale):
    H = o_ref.shape[-1]
    kv = kv_ref[0]                                # (S, 2H) packed k|v
    out = _mha_heads(q_ref[0], kv[:, :H], kv[:, H:], None, num_heads, scale)
    o_ref[0] = out.astype(o_ref.dtype)


def self_attention(qkv, mask, num_heads):
    """qkv: (B, L, 3H) packed; mask: (L, L) additive -> (B, L, H) context."""
    B, L, H3 = qkv.shape
    H = H3 // 3
    dh = H // num_heads
    kernel = functools.partial(_self_attn_kernel, num_heads=num_heads,
                               scale=1.0 / math.sqrt(dh))
    return pl.pallas_call(
        kernel,
        out_shape=jax.ShapeDtypeStruct((B, L, H), qkv.dtype),
        grid=(B,),
        in_specs=[
            pl.BlockSpec((1, L, H3), lambda b: (b, 0, 0)),
            pl.BlockSpec((L, L), lambda b: (0, 0)),
        ],
        out_specs=pl.BlockSpec((1, L, H), lambda b: (b, 0, 0)),
        compiler_params=pltpu.CompilerParams(
            dimension_semantics=("parallel",)),
    )(qkv, mask)


def cross_attention(q, kv, num_heads):
    """q: (B, L, H); kv: (B, S, 2H) packed -> (B, L, H) context (no mask)."""
    B, L, H = q.shape
    S = kv.shape[1]
    dh = H // num_heads
    kernel = functools.partial(_cross_attn_kernel, num_heads=num_heads,
                               scale=1.0 / math.sqrt(dh))
    return pl.pallas_call(
        kernel,
        out_shape=jax.ShapeDtypeStruct((B, L, H), q.dtype),
        grid=(B,),
        in_specs=[
            pl.BlockSpec((1, L, H), lambda b: (b, 0, 0)),
            pl.BlockSpec((1, S, 2 * H), lambda b: (b, 0, 0)),
        ],
        out_specs=pl.BlockSpec((1, L, H), lambda b: (b, 0, 0)),
        compiler_params=pltpu.CompilerParams(
            dimension_semantics=("parallel",)),
    )(q, kv)


# ----------------------------------------------------------------------------
# fused: output projection + residual add + LayerNorm
# ----------------------------------------------------------------------------

def _proj_res_ln_kernel(x_ref, w_ref, b_ref, r_ref, g_ref, be_ref, o_ref,
                        acc_ref, *, eps):
    k = pl.program_id(1)

    @pl.when(k == 0)
    def _init():
        acc_ref[...] = jnp.zeros_like(acc_ref)

    acc_ref[...] += jnp.dot(x_ref[...], w_ref[...],
                            preferred_element_type=jnp.float32)

    @pl.when(k == pl.num_programs(1) - 1)
    def _fin():
        y = acc_ref[...] + b_ref[...] + r_ref[...]
        mu = jnp.mean(y, axis=-1, keepdims=True)
        var = jnp.mean((y - mu) ** 2, axis=-1, keepdims=True)
        o_ref[...] = ((y - mu) * jax.lax.rsqrt(var + eps) * g_ref[...]
                      + be_ref[...]).astype(o_ref.dtype)


def proj_residual_layernorm(x, w, b, res, gamma, beta, eps=1e-5):
    """LayerNorm(res + x @ w + b) -- matmul with fused residual/LN epilogue."""
    N, Din = x.shape
    H = w.shape[1]
    tm, tk = _row_tile(N), _lane_tile(Din)
    kernel = functools.partial(_proj_res_ln_kernel, eps=eps)
    return pl.pallas_call(
        kernel,
        out_shape=jax.ShapeDtypeStruct((N, H), x.dtype),
        grid=(N // tm, Din // tk),
        in_specs=[
            pl.BlockSpec((tm, tk), lambda i, k: (i, k)),
            pl.BlockSpec((tk, H), lambda i, k: (k, 0)),
            pl.BlockSpec((1, H), lambda i, k: (0, 0)),
            pl.BlockSpec((tm, H), lambda i, k: (i, 0)),
            pl.BlockSpec((1, H), lambda i, k: (0, 0)),
            pl.BlockSpec((1, H), lambda i, k: (0, 0)),
        ],
        out_specs=pl.BlockSpec((tm, H), lambda i, k: (i, 0)),
        scratch_shapes=[pltpu.VMEM((tm, H), jnp.float32)],
        compiler_params=pltpu.CompilerParams(
            dimension_semantics=("parallel", "arbitrary")),
    )(x, w, b.reshape(1, H), res, gamma.reshape(1, H), beta.reshape(1, H))


# ----------------------------------------------------------------------------
# fused: FFN (w1 + ReLU + w2) + residual add + LayerNorm
# ----------------------------------------------------------------------------

def _ffn_res_ln_kernel(x_ref, w1_ref, b1_ref, w2_ref, b2_ref, g_ref, be_ref,
                       o_ref, acc_ref, *, eps):
    f = pl.program_id(1)

    @pl.when(f == 0)
    def _init():
        acc_ref[...] = jnp.zeros_like(acc_ref)

    h = jnp.dot(x_ref[...], w1_ref[...], preferred_element_type=jnp.float32)
    h = jnp.maximum(h + b1_ref[...], 0.0)
    acc_ref[...] += jnp.dot(h.astype(w2_ref.dtype), w2_ref[...],
                            preferred_element_type=jnp.float32)

    @pl.when(f == pl.num_programs(1) - 1)
    def _fin():
        y = acc_ref[...] + b2_ref[...] + x_ref[...]      # residual = FFN input
        mu = jnp.mean(y, axis=-1, keepdims=True)
        var = jnp.mean((y - mu) ** 2, axis=-1, keepdims=True)
        o_ref[...] = ((y - mu) * jax.lax.rsqrt(var + eps) * g_ref[...]
                      + be_ref[...]).astype(o_ref.dtype)


def ffn_residual_layernorm(x, w1, b1, w2, b2, gamma, beta, eps=1e-5):
    """LayerNorm(x + relu(x@w1 + b1) @ w2 + b2); the (rows, dim_ff)
    intermediate only ever exists as one (tm, tf) chunk in VMEM."""
    N, H = x.shape
    F = w1.shape[1]
    tm, tf = _row_tile(N), _lane_tile(F)
    kernel = functools.partial(_ffn_res_ln_kernel, eps=eps)
    return pl.pallas_call(
        kernel,
        out_shape=jax.ShapeDtypeStruct((N, H), x.dtype),
        grid=(N // tm, F // tf),
        in_specs=[
            pl.BlockSpec((tm, H), lambda i, f: (i, 0)),
            pl.BlockSpec((H, tf), lambda i, f: (0, f)),
            pl.BlockSpec((1, tf), lambda i, f: (0, f)),
            pl.BlockSpec((tf, H), lambda i, f: (f, 0)),
            pl.BlockSpec((1, H), lambda i, f: (0, 0)),
            pl.BlockSpec((1, H), lambda i, f: (0, 0)),
            pl.BlockSpec((1, H), lambda i, f: (0, 0)),
        ],
        out_specs=pl.BlockSpec((tm, H), lambda i, f: (i, 0)),
        scratch_shapes=[pltpu.VMEM((tm, H), jnp.float32)],
        compiler_params=pltpu.CompilerParams(
            dimension_semantics=("parallel", "arbitrary")),
    )(x, w1, b1.reshape(1, F), w2, b2.reshape(1, H),
      gamma.reshape(1, H), beta.reshape(1, H))


# ----------------------------------------------------------------------------
# model glue (batch-major layout end-to-end, no physical transposes)
# ----------------------------------------------------------------------------

def decoder_layer(x, memory, tgt_mask, p, num_heads):
    """Post-norm nn.TransformerDecoderLayer (eval: dropout = identity).
    x: (B, L, H); memory: (B, S, H)."""
    B, L, H = x.shape
    S = memory.shape[1]
    x2 = x.reshape(B * L, H)

    # --- self-attention: fused QKV projection, per-batch all-head attention ---
    qkv = linear(x2, p["self"]["w_qkv"], p["self"]["b_qkv"])            # (B*L, 3H)
    ctx = self_attention(qkv.reshape(B, L, 3 * H), tgt_mask, num_heads)  # (B, L, H)
    x2 = proj_residual_layernorm(ctx.reshape(B * L, H), p["self"]["wo"],
                                 p["self"]["bo"], x2, p["ln1_g"], p["ln1_b"])

    # --- cross-attention: fused KV projection of memory, no memory mask ---
    q = linear(x2, p["cross"]["wq"], p["cross"]["bq"])                  # (B*L, H)
    kv = linear(memory.reshape(B * S, H), p["cross"]["w_kv"], p["cross"]["b_kv"])
    ctx = cross_attention(q.reshape(B, L, H), kv.reshape(B, S, 2 * H), num_heads)
    x2 = proj_residual_layernorm(ctx.reshape(B * L, H), p["cross"]["wo"],
                                 p["cross"]["bo"], x2, p["ln2_g"], p["ln2_b"])

    # --- feed-forward fused with residual + LayerNorm ---
    x2 = ffn_residual_layernorm(x2, p["w1"], p["b1"], p["w2"], p["b2"],
                                p["ln3_g"], p["ln3_b"])
    return x2.reshape(B, L, H)


def positional_encoding_table(max_len, d_model):
    position = jnp.arange(max_len, dtype=jnp.float32)[:, None]
    div_term = jnp.exp(jnp.arange(0, d_model, 2, dtype=jnp.float32)
                       * (-math.log(10000.0) / d_model))
    pe = jnp.zeros((max_len, d_model), jnp.float32)
    pe = pe.at[:, 0::2].set(jnp.sin(position * div_term))
    pe = pe.at[:, 1::2].set(jnp.cos(position * div_term))
    return pe


def init_params(key, vocab_size, hidden_dim, num_layers, num_heads, dim_ff):
    scale = 0.05

    def nrm(k, shape):
        return (scale * jax.random.normal(k, shape)).astype(jnp.float32)

    def self_attn_params(k):
        ks = jax.random.split(k, 2)
        return {
            "w_qkv": nrm(ks[0], (hidden_dim, 3 * hidden_dim)),
            "b_qkv": jnp.zeros((3 * hidden_dim,), jnp.float32),
            "wo": nrm(ks[1], (hidden_dim, hidden_dim)),
            "bo": jnp.zeros((hidden_dim,), jnp.float32),
        }

    def cross_attn_params(k):
        ks = jax.random.split(k, 3)
        return {
            "wq": nrm(ks[0], (hidden_dim, hidden_dim)),
            "bq": jnp.zeros((hidden_dim,), jnp.float32),
            "w_kv": nrm(ks[1], (hidden_dim, 2 * hidden_dim)),
            "b_kv": jnp.zeros((2 * hidden_dim,), jnp.float32),
            "wo": nrm(ks[2], (hidden_dim, hidden_dim)),
            "bo": jnp.zeros((hidden_dim,), jnp.float32),
        }

    keys = jax.random.split(key, 2 + num_layers)
    params = {
        "embedding": jax.random.normal(keys[0], (vocab_size, hidden_dim), jnp.float32),
        "pe": positional_encoding_table(500, hidden_dim),
        "layers": [],
    }
    for li in range(num_layers):
        lk = jax.random.split(keys[2 + li], 4)
        params["layers"].append({
            "self": self_attn_params(lk[0]),
            "cross": cross_attn_params(lk[1]),
            "w1": nrm(lk[2], (hidden_dim, dim_ff)),
            "b1": jnp.zeros((dim_ff,), jnp.float32),
            "w2": nrm(lk[3], (dim_ff, hidden_dim)),
            "b2": jnp.zeros((hidden_dim,), jnp.float32),
            "ln1_g": jnp.ones((hidden_dim,), jnp.float32), "ln1_b": jnp.zeros((hidden_dim,), jnp.float32),
            "ln2_g": jnp.ones((hidden_dim,), jnp.float32), "ln2_b": jnp.zeros((hidden_dim,), jnp.float32),
            "ln3_g": jnp.ones((hidden_dim,), jnp.float32), "ln3_b": jnp.zeros((hidden_dim,), jnp.float32),
        })
    params["w_out"] = nrm(keys[1], (hidden_dim, vocab_size))
    params["b_out"] = jnp.zeros((vocab_size,), jnp.float32)
    return params


def transformer_decoder_forward(params, encoder_outputs, tgt, tgt_mask, num_heads):
    """encoder_outputs: (B, S, H); tgt: (B, L) int32; tgt_mask: (L, L) additive."""
    B, L = tgt.shape
    H = params["embedding"].shape[1]
    vocab = params["w_out"].shape[1]
    # TODO(synk): embedding gather stays in plain JAX glue (jnp.take); a Pallas
    # Element-blockspec gather would also work but is not a hot path here.
    x = jnp.take(params["embedding"], tgt, axis=0)          # (B, L, H)
    x = x + params["pe"][:L][None, :, :]                    # positional encoding
    for lp in params["layers"]:
        x = decoder_layer(x, encoder_outputs, tgt_mask, lp, num_heads)
    logits = linear(x.reshape(B * L, H), params["w_out"], params["b_out"])
    return logits.reshape(B, L, vocab)


# ----------------------------------------------------------------------------
# main
# ----------------------------------------------------------------------------

if __name__ == "__main__":
    vocab_size = 50
    hidden_dim = 32
    num_layers = 2
    num_heads = 4
    dim_ff = 2048          # nn.TransformerDecoderLayer default dim_feedforward
    B, L, S = 2, 8, 8

    key = jax.random.PRNGKey(0)
    k_param, k_enc, k_tgt = jax.random.split(key, 3)

    params = init_params(k_param, vocab_size, hidden_dim, num_layers, num_heads, dim_ff)

    encoder_outputs = jax.random.normal(k_enc, (B, S, hidden_dim), jnp.float32)
    tgt = jax.random.randint(k_tgt, (B, L), 0, vocab_size, dtype=jnp.int32)
    # causal additive mask, like nn.Transformer.generate_square_subsequent_mask
    tgt_mask = jnp.where(jnp.triu(jnp.ones((L, L), dtype=bool), k=1),
                         -jnp.inf, 0.0).astype(jnp.float32)

    fwd = jax.jit(functools.partial(transformer_decoder_forward, num_heads=num_heads))
    logits = fwd(params, encoder_outputs, tgt, tgt_mask)
    jax.block_until_ready(logits)

    assert logits.shape == (B, L, vocab_size)
    assert bool(jnp.all(jnp.isfinite(logits)))
    print("KERNEL_OK")
</pallas_src>

<mosaic_0001>
module attributes {stable_mosaic.version = 11 : i64} {
  func.func @_linear_kernel(%arg0: i32, %arg1: i32, %arg2: i32, %arg3: memref<8x32xf32, #tpu.memory_space<vmem>>, %arg4: memref<32x96xf32, #tpu.memory_space<vmem>>, %arg5: memref<1x96xf32, #tpu.memory_space<vmem>>, %arg6: memref<8x96xf32, #tpu.memory_space<vmem>>, %arg7: memref<8x96xf32, #tpu.memory_space<vmem>>) attributes {dimension_semantics = [#tpu.dimension_semantics<parallel>, #tpu.dimension_semantics<parallel>, #tpu.dimension_semantics<arbitrary>], iteration_bounds = array<i64: 2, 1, 1>, scalar_prefetch = 0 : i64, scratch_operands = 1 : i64, tpu.core_type = #tpu.core_type<tc>, window_params = [{transform_indices = @transform_0, window_bounds = array<i64: 8, 32>}, {transform_indices = @transform_1, window_bounds = array<i64: 32, 96>}, {transform_indices = @transform_2, window_bounds = array<i64: 1, 96>}, {transform_indices = @transform_3, window_bounds = array<i64: 8, 96>}]} {
    %c0_i32 = arith.constant 0 : i32
    %0 = arith.cmpi eq, %arg2, %c0_i32 : i32
    %1 = arith.extui %0 : i1 to i32
    %c0_i32_0 = arith.constant 0 : i32
    %2 = arith.cmpi ne, %1, %c0_i32_0 : i32
    scf.if %2 {
      %cst_10 = arith.constant 0.000000e+00 : f32
      %12 = vector.broadcast %cst_10 : f32 to vector<8x96xf32>
      %c0_11 = arith.constant 0 : index
      %c0_12 = arith.constant 0 : index
      %13 = vector.load %arg7[%c0_11, %c0_12] : memref<8x96xf32, #tpu.memory_space<vmem>>, vector<8x96xf32>
      tpu.vector_store %arg7[%c0_11, %c0_12], %12 {strides = array<i32>} : memref<8x96xf32, #tpu.memory_space<vmem>>, vector<8x96xf32>,
    } else {
    }
    %c0 = arith.constant 0 : index
    %c0_1 = arith.constant 0 : index
    %3 = vector.load %arg7[%c0, %c0_1] : memref<8x96xf32, #tpu.memory_space<vmem>>, vector<8x96xf32>
    %c0_2 = arith.constant 0 : index
    %c0_3 = arith.constant 0 : index
    %4 = vector.load %arg3[%c0_2, %c0_3] : memref<8x32xf32, #tpu.memory_space<vmem>>, vector<8x32xf32>
    %c0_4 = arith.constant 0 : index
    %c0_5 = arith.constant 0 : index
    %5 = vector.load %arg4[%c0_4, %c0_5] : memref<32x96xf32, #tpu.memory_space<vmem>>, vector<32x96xf32>
    %cst = arith.constant dense<0.000000e+00> : vector<8x96xf32>
    %6 = tpu.matmul %4, %5, %cst {dimension_numbers = #tpu.dot_dimension_numbers<[1], [0], [0], [1], [0, 0, 1, 1], [], []>} : vector<8x32xf32>, vector<32x96xf32>, vector<8x96xf32> -> vector<8x96xf32>
    %7 = arith.addf %3, %6 : vector<8x96xf32>
    %c0_6 = arith.constant 0 : index
    %c0_7 = arith.constant 0 : index
    %8 = vector.load %arg7[%c0_6, %c0_7] : memref<8x96xf32, #tpu.memory_space<vmem>>, vector<8x96xf32>
    tpu.vector_store %arg7[%c0_6, %c0_7], %7 {strides = array<i32>} : memref<8x96xf32, #tpu.memory_space<vmem>>, vector<8x96xf32>,
    %c0_i32_8 = arith.constant 0 : i32
    %9 = arith.cmpi eq, %arg2, %c0_i32_8 : i32
    %10 = arith.extui %9 : i1 to i32
    %c0_i32_9 = arith.constant 0 : i32
    %11 = arith.cmpi ne, %10, %c0_i32_9 : i32
    scf.if %11 {
      %c0_10 = arith.constant 0 : index
      %c0_11 = arith.constant 0 : index
      %12 = vector.load %arg7[%c0_10, %c0_11] : memref<8x96xf32, #tpu.memory_space<vmem>>, vector<8x96xf32>
      %c0_12 = arith.constant 0 : index
      %c0_13 = arith.constant 0 : index
      %13 = vector.load %arg5[%c0_12, %c0_13] : memref<1x96xf32, #tpu.memory_space<vmem>>, vector<1x96xf32>
      %14 = vector.broadcast %13 : vector<1x96xf32> to vector<8x96xf32>
      %15 = arith.addf %12, %14 : vector<8x96xf32>
      %c0_14 = arith.constant 0 : index
      %c0_15 = arith.constant 0 : index
      %16 = vector.load %arg6[%c0_14, %c0_15] : memref<8x96xf32, #tpu.memory_space<vmem>>, vector<8x96xf32>
      tpu.vector_store %arg6[%c0_14, %c0_15], %15 {strides = array<i32>} : memref<8x96xf32, #tpu.memory_space<vmem>>, vector<8x96xf32>,
    } else {
    }
    return
  }
  func.func @transform_0(%arg0: i32, %arg1: i32, %arg2: i32) -> (i32, i32) {
    %c0_i32 = arith.constant 0 : i32
    return %arg0, %arg2 : i32, i32
  }
  func.func @transform_1(%arg0: i32, %arg1: i32, %arg2: i32) -> (i32, i32) {
    %c0_i32 = arith.constant 0 : i32
    return %arg2, %arg1 : i32, i32
  }
  func.func @transform_2(%arg0: i32, %arg1: i32, %arg2: i32) -> (i32, i32) {
    %c0_i32 = arith.constant 0 : i32
    %c0_i32_0 = arith.constant 0 : i32
    return %c0_i32, %arg1 : i32, i32
  }
  func.func @transform_3(%arg0: i32, %arg1: i32, %arg2: i32) -> (i32, i32) {
    %c0_i32 = arith.constant 0 : i32
    return %arg0, %arg1 : i32, i32
  }
}

module attributes {stable_mosaic.version = 11 : i64} {
  func.func @_proj_res_ln_kernel(%arg0: i32, %arg1: i32, %arg2: memref<8x32xf32, #tpu.memory_space<vmem>>, %arg3: memref<32x32xf32, #tpu.memory_space<vmem>>, %arg4: memref<1x32xf32, #tpu.memory_space<vmem>>, %arg5: memref<8x32xf32, #tpu.memory_space<vmem>>, %arg6: memref<1x32xf32, #tpu.memory_space<vmem>>, %arg7: memref<1x32xf32, #tpu.memory_space<vmem>>, %arg8: memref<8x32xf32, #tpu.memory_space<vmem>>, %arg9: memref<8x32xf32, #tpu.memory_space<vmem>>) attributes {dimension_semantics = [#tpu.dimension_semantics<parallel>, #tpu.dimension_semantics<arbitrary>], iteration_bounds = array<i64: 2, 1>, scalar_prefetch = 0 : i64, scratch_operands = 1 : i64, tpu.core_type = #tpu.core_type<tc>, window_params = [{transform_indices = @transform_0, window_bounds = array<i64: 8, 32>}, {transform_indices = @transform_1, window_bounds = array<i64: 32, 32>}, {pipeline_mode = #tpu.pipeline_mode<synchronous>, transform_indices = @transform_2, window_bounds = array<i64: 1, 32>}, {transform_indices = @transform_3, window_bounds = array<i64: 8, 32>}, {pipeline_mode = #tpu.pipeline_mode<synchronous>, transform_indices = @transform_4, window_bounds = array<i64: 1, 32>}, {pipeline_mode = #tpu.pipeline_mode<synchronous>, transform_indices = @transform_5, window_bounds = array<i64: 1, 32>}, {transform_indices = @transform_6, window_bounds = array<i64: 8, 32>}]} {
    %c0_i32 = arith.constant 0 : i32
    %0 = arith.cmpi eq, %arg1, %c0_i32 : i32
    %1 = arith.extui %0 : i1 to i32
    %c0_i32_0 = arith.constant 0 : i32
    %2 = arith.cmpi ne, %1, %c0_i32_0 : i32
    scf.if %2 {
      %cst_10 = arith.constant 0.000000e+00 : f32
      %12 = vector.broadcast %cst_10 : f32 to vector<8x32xf32>
      %c0_11 = arith.constant 0 : index
      %c0_12 = arith.constant 0 : index
      %13 = vector.load %arg9[%c0_11, %c0_12] : memref<8x32xf32, #tpu.memory_space<vmem>>, vector<8x32xf32>
      tpu.vector_store %arg9[%c0_11, %c0_12], %12 {strides = array<i32>} : memref<8x32xf32, #tpu.memory_space<vmem>>, vector<8x32xf32>,
    } else {
    }
    %c0 = arith.constant 0 : index
    %c0_1 = arith.constant 0 : index
    %3 = vector.load %arg9[%c0, %c0_1] : memref<8x32xf32, #tpu.memory_space<vmem>>, vector<8x32xf32>
    %c0_2 = arith.constant 0 : index
    %c0_3 = arith.constant 0 : index
    %4 = vector.load %arg2[%c0_2, %c0_3] : memref<8x32xf32, #tpu.memory_space<vmem>>, vector<8x32xf32>
    %c0_4 = arith.constant 0 : index
    %c0_5 = arith.constant 0 : index
    %5 = vector.load %arg3[%c0_4, %c0_5] : memref<32x32xf32, #tpu.memory_space<vmem>>, vector<32x32xf32>
    %cst = arith.constant dense<0.000000e+00> : vector<8x32xf32>
    %6 = tpu.matmul %4, %5, %cst {dimension_numbers = #tpu.dot_dimension_numbers<[1], [0], [0], [1], [0, 0, 1, 1], [], []>} : vector<8x32xf32>, vector<32x32xf32>, vector<8x32xf32> -> vector<8x32xf32>
    %7 = arith.addf %3, %6 : vector<8x32xf32>
    %c0_6 = arith.constant 0 : index
    %c0_7 = arith.constant 0 : index
    %8 = vector.load %arg9[%c0_6, %c0_7] : memref<8x32xf32, #tpu.memory_space<vmem>>, vector<8x32xf32>
    tpu.vector_store %arg9[%c0_6, %c0_7], %7 {strides = array<i32>} : memref<8x32xf32, #tpu.memory_space<vmem>>, vector<8x32xf32>,
    %c0_i32_8 = arith.constant 0 : i32
    %9 = arith.cmpi eq, %arg1, %c0_i32_8 : i32
    %10 = arith.extui %9 : i1 to i32
    %c0_i32_9 = arith.constant 0 : i32
    %11 = arith.cmpi ne, %10, %c0_i32_9 : i32
    scf.if %11 {
      %c0_10 = arith.constant 0 : index
      %c0_11 = arith.constant 0 : index
      %12 = vector.load %arg9[%c0_10, %c0_11] : memref<8x32xf32, #tpu.memory_space<vmem>>, vector<8x32xf32>
      %c0_12 = arith.constant 0 : index
      %c0_13 = arith.constant 0 : index
      %13 = vector.load %arg4[%c0_12, %c0_13] : memref<1x32xf32, #tpu.memory_space<vmem>>, vector<1x32xf32>
      %14 = vector.broadcast %13 : vector<1x32xf32> to vector<8x32xf32>
      %15 = arith.addf %12, %14 : vector<8x32xf32>
      %c0_14 = arith.constant 0 : index
      %c0_15 = arith.constant 0 : index
      %16 = vector.load %arg5[%c0_14, %c0_15] : memref<8x32xf32, #tpu.memory_space<vmem>>, vector<8x32xf32>
      %17 = arith.addf %15, %16 : vector<8x32xf32>
      %cst_16 = arith.constant dense<0.000000e+00> : vector<8xf32>
      %18 = vector.multi_reduction <add>, %17, %cst_16 [1] : vector<8x32xf32> to vector<8xf32>
      %19 = vector.shape_cast %18 : vector<8xf32> to vector<8x1xf32>
      %cst_17 = arith.constant 3.200000e+01 : f32
      %20 = vector.broadcast %cst_17 : f32 to vector<8x1xf32>
      %21 = arith.divf %19, %20 : vector<8x1xf32>
      %22 = vector.broadcast %21 : vector<8x1xf32> to vector<8x32xf32>
      %23 = arith.subf %17, %22 : vector<8x32xf32>
      %24 = arith.mulf %23, %23 : vector<8x32xf32>
      %cst_18 = arith.constant dense<0.000000e+00> : vector<8xf32>
      %25 = vector.multi_reduction <add>, %24, %cst_18 [1] : vector<8x32xf32> to vector<8xf32>
      %26 = vector.shape_cast %25 : vector<8xf32> to vector<8x1xf32>
      %cst_19 = arith.constant 3.200000e+01 : f32
      %27 = vector.broadcast %cst_19 : f32 to vector<8x1xf32>
      %28 = arith.divf %26, %27 : vector<8x1xf32>
      %29 = vector.broadcast %21 : vector<8x1xf32> to vector<8x32xf32>
      %30 = arith.subf %17, %29 : vector<8x32xf32>
      %cst_20 = arith.constant 9.99999974E-6 : f32
      %31 = vector.broadcast %cst_20 : f32 to vector<8x1xf32>
      %32 = arith.addf %28, %31 : vector<8x1xf32>
      %33 = math.rsqrt %32 : vector<8x1xf32>
      %34 = vector.broadcast %33 : vector<8x1xf32> to vector<8x32xf32>
      %35 = arith.mulf %30, %34 : vector<8x32xf32>
      %c0_21 = arith.constant 0 : index
      %c0_22 = arith.constant 0 : index
      %36 = vector.load %arg6[%c0_21, %c0_22] : memref<1x32xf32, #tpu.memory_space<vmem>>, vector<1x32xf32>
      %37 = vector.broadcast %36 : vector<1x32xf32> to vector<8x32xf32>
      %38 = arith.mulf %35, %37 : vector<8x32xf32>
      %c0_23 = arith.constant 0 : index
      %c0_24 = arith.constant 0 : index
      %39 = vector.load %arg7[%c0_23, %c0_24] : memref<1x32xf32, #tpu.memory_space<vmem>>, vector<1x32xf32>
      %40 = vector.broadcast %39 : vector<1x32xf32> to vector<8x32xf32>
      %41 = arith.addf %38, %40 : vector<8x32xf32>
      %c0_25 = arith.constant 0 : index
      %c0_26 = arith.constant 0 : index
      %42 = vector.load %arg8[%c0_25, %c0_26] : memref<8x32xf32, #tpu.memory_space<vmem>>, vector<8x32xf32>
      tpu.vector_store %arg8[%c0_25, %c0_26], %41 {strides = array<i32>} : memref<8x32xf32, #tpu.memory_space<vmem>>, vector<8x32xf32>,
    } else {
    }
    return
  }
  func.func @transform_0(%arg0: i32, %arg1: i32) -> (i32, i32) {
    %c0_i32 = arith.constant 0 : i32
    return %arg0, %arg1 : i32, i32
  }
  func.func @transform_1(%arg0: i32, %arg1: i32) -> (i32, i32) {
    %c0_i32 = arith.constant 0 : i32
    %c0_i32_0 = arith.constant 0 : i32
    return %arg1, %c0_i32 : i32, i32
  }
  func.func @transform_2(%arg0: i32, %arg1: i32) -> (i32, i32) {
    %c0_i32 = arith.constant 0 : i32
    %c0_i32_0 = arith.constant 0 : i32
    %c0_i32_1 = arith.constant 0 : i32
    return %c0_i32, %c0_i32_0 : i32, i32
  }
  func.func @transform_3(%arg0: i32, %arg1: i32) -> (i32, i32) {
    %c0_i32 = arith.constant 0 : i32
    %c0_i32_0 = arith.constant 0 : i32
    return %arg0, %c0_i32 : i32, i32
  }
  func.func @transform_4(%arg0: i32, %arg1: i32) -> (i32, i32) {
    %c0_i32 = arith.constant 0 : i32
    %c0_i32_0 = arith.constant 0 : i32
    %c0_i32_1 = arith.constant 0 : i32
    return %c0_i32, %c0_i32_0 : i32, i32
  }
  func.func @transform_5(%arg0: i32, %arg1: i32) -> (i32, i32) {
    %c0_i32 = arith.constant 0 : i32
    %c0_i32_0 = arith.constant 0 : i32
    %c0_i32_1 = arith.constant 0 : i32
    return %c0_i32, %c0_i32_0 : i32, i32
  }
  func.func @transform_6(%arg0: i32, %arg1: i32) -> (i32, i32) {
    %c0_i32 = arith.constant 0 : i32
    %c0_i32_0 = arith.constant 0 : i32
    return %arg0, %c0_i32 : i32, i32
  }
}

module attributes {stable_mosaic.version = 11 : i64} {
  func.func @_linear_kernel(%arg0: i32, %arg1: i32, %arg2: i32, %arg3: memref<8x32xf32, #tpu.memory_space<vmem>>, %arg4: memref<32x32xf32, #tpu.memory_space<vmem>>, %arg5: memref<1x32xf32, #tpu.memory_space<vmem>>, %arg6: memref<8x32xf32, #tpu.memory_space<vmem>>, %arg7: memref<8x32xf32, #tpu.memory_space<vmem>>) attributes {dimension_semantics = [#tpu.dimension_semantics<parallel>, #tpu.dimension_semantics<parallel>, #tpu.dimension_semantics<arbitrary>], iteration_bounds = array<i64: 2, 1, 1>, scalar_prefetch = 0 : i64, scratch_operands = 1 : i64, tpu.core_type = #tpu.core_type<tc>, window_params = [{transform_indices = @transform_0, window_bounds = array<i64: 8, 32>}, {transform_indices = @transform_1, window_bounds = array<i64: 32, 32>}, {transform_indices = @transform_2, window_bounds = array<i64: 1, 32>}, {transform_indices = @transform_3, window_bounds = array<i64: 8, 32>}]} {
    %c0_i32 = arith.constant 0 : i32
    %0 = arith.cmpi eq, %arg2, %c0_i32 : i32
    %1 = arith.extui %0 : i1 to i32
    %c0_i32_0 = arith.constant 0 : i32
    %2 = arith.cmpi ne, %1, %c0_i32_0 : i32
    scf.if %2 {
      %cst_10 = arith.constant 0.000000e+00 : f32
      %12 = vector.broadcast %cst_10 : f32 to vector<8x32xf32>
      %c0_11 = arith.constant 0 : index
      %c0_12 = arith.constant 0 : index
      %13 = vector.load %arg7[%c0_11, %c0_12] : memref<8x32xf32, #tpu.memory_space<vmem>>, vector<8x32xf32>
      tpu.vector_store %arg7[%c0_11, %c0_12], %12 {strides = array<i32>} : memref<8x32xf32, #tpu.memory_space<vmem>>, vector<8x32xf32>,
    } else {
    }
    %c0 = arith.constant 0 : index
    %c0_1 = arith.constant 0 : index
    %3 = vector.load %arg7[%c0, %c0_1] : memref<8x32xf32, #tpu.memory_space<vmem>>, vector<8x32xf32>
    %c0_2 = arith.constant 0 : index
    %c0_3 = arith.constant 0 : index
    %4 = vector.load %arg3[%c0_2, %c0_3] : memref<8x32xf32, #tpu.memory_space<vmem>>, vector<8x32xf32>
    %c0_4 = arith.constant 0 : index
    %c0_5 = arith.constant 0 : index
    %5 = vector.load %arg4[%c0_4, %c0_5] : memref<32x32xf32, #tpu.memory_space<vmem>>, vector<32x32xf32>
    %cst = arith.constant dense<0.000000e+00> : vector<8x32xf32>
    %6 = tpu.matmul %4, %5, %cst {dimension_numbers = #tpu.dot_dimension_numbers<[1], [0], [0], [1], [0, 0, 1, 1], [], []>} : vector<8x32xf32>, vector<32x32xf32>, vector<8x32xf32> -> vector<8x32xf32>
    %7 = arith.addf %3, %6 : vector<8x32xf32>
    %c0_6 = arith.constant 0 : index
    %c0_7 = arith.constant 0 : index
    %8 = vector.load %arg7[%c0_6, %c0_7] : memref<8x32xf32, #tpu.memory_space<vmem>>, vector<8x32xf32>
    tpu.vector_store %arg7[%c0_6, %c0_7], %7 {strides = array<i32>} : memref<8x32xf32, #tpu.memory_space<vmem>>, vector<8x32xf32>,
    %c0_i32_8 = arith.constant 0 : i32
    %9 = arith.cmpi eq, %arg2, %c0_i32_8 : i32
    %10 = arith.extui %9 : i1 to i32
    %c0_i32_9 = arith.constant 0 : i32
    %11 = arith.cmpi ne, %10, %c0_i32_9 : i32
    scf.if %11 {
      %c0_10 = arith.constant 0 : index
      %c0_11 = arith.constant 0 : index
      %12 = vector.load %arg7[%c0_10, %c0_11] : memref<8x32xf32, #tpu.memory_space<vmem>>, vector<8x32xf32>
      %c0_12 = arith.constant 0 : index
      %c0_13 = arith.constant 0 : index
      %13 = vector.load %arg5[%c0_12, %c0_13] : memref<1x32xf32, #tpu.memory_space<vmem>>, vector<1x32xf32>
      %14 = vector.broadcast %13 : vector<1x32xf32> to vector<8x32xf32>
      %15 = arith.addf %12, %14 : vector<8x32xf32>
      %c0_14 = arith.constant 0 : index
      %c0_15 = arith.constant 0 : index
      %16 = vector.load %arg6[%c0_14, %c0_15] : memref<8x32xf32, #tpu.memory_space<vmem>>, vector<8x32xf32>
      tpu.vector_store %arg6[%c0_14, %c0_15], %15 {strides = array<i32>} : memref<8x32xf32, #tpu.memory_space<vmem>>, vector<8x32xf32>,
    } else {
    }
    return
  }
  func.func @transform_0(%arg0: i32, %arg1: i32, %arg2: i32) -> (i32, i32) {
    %c0_i32 = arith.constant 0 : i32
    return %arg0, %arg2 : i32, i32
  }
  func.func @transform_1(%arg0: i32, %arg1: i32, %arg2: i32) -> (i32, i32) {
    %c0_i32 = arith.constant 0 : i32
    return %arg2, %arg1 : i32, i32
  }
  func.func @transform_2(%arg0: i32, %arg1: i32, %arg2: i32) -> (i32, i32) {
    %c0_i32 = arith.constant 0 : i32
    %c0_i32_0 = arith.constant 0 : i32
    return %c0_i32, %arg1 : i32, i32
  }
  func.func @transform_3(%arg0: i32, %arg1: i32, %arg2: i32) -> (i32, i32) {
    %c0_i32 = arith.constant 0 : i32
    return %arg0, %arg1 : i32, i32
  }
}

module attributes {stable_mosaic.version = 11 : i64} {
  func.func @_self_attn_kernel(%arg0: i32, %arg1: memref<1x8x96xf32, #tpu.memory_space<vmem>>, %arg2: memref<8x8xf32, #tpu.memory_space<vmem>>, %arg3: memref<1x8x32xf32, #tpu.memory_space<vmem>>) attributes {dimension_semantics = [#tpu.dimension_semantics<parallel>], iteration_bounds = array<i64: 2>, scalar_prefetch = 0 : i64, scratch_operands = 0 : i64, tpu.core_type = #tpu.core_type<tc>, window_params = [{transform_indices = @transform_0, window_bounds = array<i64: 1, 8, 96>}, {pipeline_mode = #tpu.pipeline_mode<synchronous>, transform_indices = @transform_1, window_bounds = array<i64: 8, 8>}, {transform_indices = @transform_2, window_bounds = array<i64: 1, 8, 32>}]} {
    %c0 = arith.constant 0 : index
    %c0_0 = arith.constant 0 : index
    %c0_1 = arith.constant 0 : index
    %0 = vector.load %arg1[%c0, %c0_0, %c0_1] : memref<1x8x96xf32, #tpu.memory_space<vmem>>, vector<1x8x96xf32>
    %1 = vector.shape_cast %0 : vector<1x8x96xf32> to vector<8x96xf32>
    %c0_2 = arith.constant 0 : index
    %c0_3 = arith.constant 0 : index
    %2 = vector.load %arg2[%c0_2, %c0_3] : memref<8x8xf32, #tpu.memory_space<vmem>>, vector<8x8xf32>
    %cst = arith.constant -1.000000e+30 : f32
    %3 = vector.broadcast %cst : f32 to vector<8x8xf32>
    %4 = arith.maximumf %2, %3 : vector<8x8xf32>
    %5 = vector.extract_strided_slice %1 {offsets = [0, 0], sizes = [8, 32], strides = [1, 1]} : vector<8x96xf32> to vector<8x32xf32>
    %6 = vector.extract_strided_slice %1 {offsets = [0, 32], sizes = [8, 32], strides = [1, 1]} : vector<8x96xf32> to vector<8x32xf32>
    %7 = vector.extract_strided_slice %1 {offsets = [0, 64], sizes = [8, 32], strides = [1, 1]} : vector<8x96xf32> to vector<8x32xf32>
    %8 = vector.extract_strided_slice %5 {offsets = [0, 0], sizes = [8, 8], strides = [1, 1]} : vector<8x32xf32> to vector<8x8xf32>
    %9 = vector.extract_strided_slice %6 {offsets = [0, 0], sizes = [8, 8], strides = [1, 1]} : vector<8x32xf32> to vector<8x8xf32>
    %10 = vector.extract_strided_slice %7 {offsets = [0, 0], sizes = [8, 8], strides = [1, 1]} : vector<8x32xf32> to vector<8x8xf32>
    %11 = tpu.transpose %9, [1, 0] : vector<8x8xf32> -> vector<8x8xf32>
    %cst_4 = arith.constant dense<0.000000e+00> : vector<8x8xf32>
    %12 = tpu.matmul %8, %11, %cst_4 {dimension_numbers = #tpu.dot_dimension_numbers<[1], [0], [0], [1], [0, 0, 1, 1], [], []>} : vector<8x8xf32>, vector<8x8xf32>, vector<8x8xf32> -> vector<8x8xf32>
    %cst_5 = arith.constant 0.353553385 : f32
    %13 = vector.broadcast %cst_5 : f32 to vector<8x8xf32>
    %14 = arith.mulf %12, %13 : vector<8x8xf32>
    %15 = arith.addf %14, %4 : vector<8x8xf32>
    %cst_6 = arith.constant dense<0xFF800000> : vector<8xf32>
    %16 = vector.multi_reduction <maximumf>, %15, %cst_6 [1] : vector<8x8xf32> to vector<8xf32>
    %17 = vector.shape_cast %16 : vector<8xf32> to vector<8x1xf32>
    %18 = vector.broadcast %17 : vector<8x1xf32> to vector<8x8xf32>
    %19 = arith.subf %15, %18 : vector<8x8xf32>
    %20 = math.exp %19 : vector<8x8xf32>
    %cst_7 = arith.constant dense<0.000000e+00> : vector<8xf32>
    %21 = vector.multi_reduction <add>, %20, %cst_7 [1] : vector<8x8xf32> to vector<8xf32>
    %22 = vector.shape_cast %21 : vector<8xf32> to vector<8x1xf32>
    %23 = tpu.reciprocal %22 {approx = true} : vector<8x1xf32> -> vector<8x1xf32>
    %24 = vector.broadcast %23 : vector<8x1xf32> to vector<8x8xf32>
    %25 = arith.mulf %20, %24 : vector<8x8xf32>
    %cst_8 = arith.constant dense<0.000000e+00> : vector<8x8xf32>
    %26 = tpu.matmul %25, %10, %cst_8 {dimension_numbers = #tpu.dot_dimension_numbers<[1], [0], [0], [1], [0, 0, 1, 1], [], []>} : vector<8x8xf32>, vector<8x8xf32>, vector<8x8xf32> -> vector<8x8xf32>
    %27 = vector.extract_strided_slice %5 {offsets = [0, 8], sizes = [8, 8], strides = [1, 1]} : vector<8x32xf32> to vector<8x8xf32>
    %28 = vector.extract_strided_slice %6 {offsets = [0, 8], sizes = [8, 8], strides = [1, 1]} : vector<8x32xf32> to vector<8x8xf32>
    %29 = vector.extract_strided_slice %7 {offsets = [0, 8], sizes = [8, 8], strides = [1, 1]} : vector<8x32xf32> to vector<8x8xf32>
    %30 = tpu.transpose %28, [1, 0] : vector<8x8xf32> -> vector<8x8xf32>
    %cst_9 = arith.constant dense<0.000000e+00> : vector<8x8xf32>
    %31 = tpu.matmul %27, %30, %cst_9 {dimension_numbers = #tpu.dot_dimension_numbers<[1], [0], [0], [1], [0, 0, 1, 1], [], []>} : vector<8x8xf32>, vector<8x8xf32>, vector<8x8xf32> -> vector<8x8xf32>
    %cst_10 = arith.constant 0.353553385 : f32
    %32 = vector.broadcast %cst_10 : f32 to vector<8x8xf32>
    %33 = arith.mulf %31, %32 : vector<8x8xf32>
    %34 = arith.addf %33, %4 : vector<8x8xf32>
    %cst_11 = arith.constant dense<0xFF800000> : vector<8xf32>
    %35 = vector.multi_reduction <maximumf>, %34, %cst_11 [1] : vector<8x8xf32> to vector<8xf32>
    %36 = vector.shape_cast %35 : vector<8xf32> to vector<8x1xf32>
    %37 = vector.broadcast %36 : vector<8x1xf32> to vector<8x8xf32>
    %38 = arith.subf %34, %37 : vector<8x8xf32>
    %39 = math.exp %38 : vector<8x8xf32>
    %cst_12 = arith.constant dense<0.000000e+00> : vector<8xf32>
    %40 = vector.multi_reduction <add>, %39, %cst_12 [1] : vector<8x8xf32> to vector<8xf32>
    %41 = vector.shape_cast %40 : vector<8xf32> to vector<8x1xf32>
    %42 = tpu.reciprocal %41 {approx = true} : vector<8x1xf32> -> vector<8x1xf32>
    %43 = vector.broadcast %42 : vector<8x1xf32> to vector<8x8xf32>
    %44 = arith.mulf %39, %43 : vector<8x8xf32>
    %cst_13 = arith.constant dense<0.000000e+00> : vector<8x8xf32>
    %45 = tpu.matmul %44, %29, %cst_13 {dimension_numbers = #tpu.dot_dimension_numbers<[1], [0], [0], [1], [0, 0, 1, 1], [], []>} : vector<8x8xf32>, vector<8x8xf32>, vector<8x8xf32> -> vector<8x8xf32>
    %46 = vector.extract_strided_slice %5 {offsets = [0, 16], sizes = [8, 8], strides = [1, 1]} : vector<8x32xf32> to vector<8x8xf32>
    %47 = vector.extract_strided_slice %6 {offsets = [0, 16], sizes = [8, 8], strides = [1, 1]} : vector<8x32xf32> to vector<8x8xf32>
    %48 = vector.extract_strided_slice %7 {offsets = [0, 16], sizes = [8, 8], strides = [1, 1]} : vector<8x32xf32> to vector<8x8xf32>
    %49 = tpu.transpose %47, [1, 0] : vector<8x8xf32> -> vector<8x8xf32>
    %cst_14 = arith.constant dense<0.000000e+00> : vector<8x8xf32>
    %50 = tpu.matmul %46, %49, %cst_14 {dimension_numbers = #tpu.dot_dimension_numbers<[1], [0], [0], [1], [0, 0, 1, 1], [], []>} : vector<8x8xf32>, vector<8x8xf32>, vector<8x8xf32> -> vector<8x8xf32>
    %cst_15 = arith.constant 0.353553385 : f32
    %51 = vector.broadcast %cst_15 : f32 to vector<8x8xf32>
    %52 = arith.mulf %50, %51 : vector<8x8xf32>
    %53 = arith.addf %52, %4 : vector<8x8xf32>
    %cst_16 = arith.constant dense<0xFF800000> : vector<8xf32>
    %54 = vector.multi_reduction <maximumf>, %53, %cst_16 [1] : vector<8x8xf32> to vector<8xf32>
    %55 = vector.shape_cast %54 : vector<8xf32> to vector<8x1xf32>
    %56 = vector.broadcast %55 : vector<8x1xf32> to vector<8x8xf32>
    %57 = arith.subf %53, %56 : vector<8x8xf32>
    %58 = math.exp %57 : vector<8x8xf32>
    %cst_17 = arith.constant dense<0.000000e+00> : vector<8xf32>
    %59 = vector.multi_reduction <add>, %58, %cst_17 [1] : vector<8x8xf32> to vector<8xf32>
    %60 = vector.shape_cast %59 : vector<8xf32> to vector<8x1xf32>
    %61 = tpu.reciprocal %60 {approx = true} : vector<8x1xf32> -> vector<8x1xf32>
    %62 = vector.broadcast %61 : vector<8x1xf32> to vector<8x8xf32>
    %63 = arith.mulf %58, %62 : vector<8x8xf32>
    %cst_18 = arith.constant dense<0.000000e+00> : vector<8x8xf32>
    %64 = tpu.matmul %63, %48, %cst_18 {dimension_numbers = #tpu.dot_dimension_numbers<[1], [0], [0], [1], [0, 0, 1, 1], [], []>} : vector<8x8xf32>, vector<8x8xf32>, vector<8x8xf32> -> vector<8x8xf32>
    %65 = vector.extract_strided_slice %5 {offsets = [0, 24], sizes = [8, 8], strides = [1, 1]} : vector<8x32xf32> to vector<8x8xf32>
    %66 = vector.extract_strided_slice %6 {offsets = [0, 24], sizes = [8, 8], strides = [1, 1]} : vector<8x32xf32> to vector<8x8xf32>
    %67 = vector.extract_strided_slice %7 {offsets = [0, 24], sizes = [8, 8], strides = [1, 1]} : vector<8x32xf32> to vector<8x8xf32>
    %68 = tpu.transpose %66, [1, 0] : vector<8x8xf32> -> vector<8x8xf32>
    %cst_19 = arith.constant dense<0.000000e+00> : vector<8x8xf32>
    %69 = tpu.matmul %65, %68, %cst_19 {dimension_numbers = #tpu.dot_dimension_numbers<[1], [0], [0], [1], [0, 0, 1, 1], [], []>} : vector<8x8xf32>, vector<8x8xf32>, vector<8x8xf32> -> vector<8x8xf32>
    %cst_20 = arith.constant 0.353553385 : f32
    %70 = vector.broadcast %cst_20 : f32 to vector<8x8xf32>
    %71 = arith.mulf %69, %70 : vector<8x8xf32>
    %72 = arith.addf %71, %4 : vector<8x8xf32>
    %cst_21 = arith.constant dense<0xFF800000> : vector<8xf32>
    %73 = vector.multi_reduction <maximumf>, %72, %cst_21 [1] : vector<8x8xf32> to vector<8xf32>
    %74 = vector.shape_cast %73 : vector<8xf32> to vector<8x1xf32>
    %75 = vector.broadcast %74 : vector<8x1xf32> to vector<8x8xf32>
    %76 = arith.subf %72, %75 : vector<8x8xf32>
    %77 = math.exp %76 : vector<8x8xf32>
    %cst_22 = arith.constant dense<0.000000e+00> : vector<8xf32>
    %78 = vector.multi_reduction <add>, %77, %cst_22 [1] : vector<8x8xf32> to vector<8xf32>
    %79 = vector.shape_cast %78 : vector<8xf32> to vector<8x1xf32>
    %80 = tpu.reciprocal %79 {approx = true} : vector<8x1xf32> -> vector<8x1xf32>
    %81 = vector.broadcast %80 : vector<8x1xf32> to vector<8x8xf32>
    %82 = arith.mulf %77, %81 : vector<8x8xf32>
    %cst_23 = arith.constant dense<0.000000e+00> : vector<8x8xf32>
    %83 = tpu.matmul %82, %67, %cst_23 {dimension_numbers = #tpu.dot_dimension_numbers<[1], [0], [0], [1], [0, 0, 1, 1], [], []>} : vector<8x8xf32>, vector<8x8xf32>, vector<8x8xf32> -> vector<8x8xf32>
    %84 = tpu.concatenate %26, %45, %64, %83 in 1 : vector<8x8xf32>, vector<8x8xf32>, vector<8x8xf32>, vector<8x8xf32> -> vector<8x32xf32>
    %c0_24 = arith.constant 0 : index
    %c0_25 = arith.constant 0 : index
    %c0_26 = arith.constant 0 : index
    %85 = vector.load %arg3[%c0_24, %c0_25, %c0_26] : memref<1x8x32xf32, #tpu.memory_space<vmem>>, vector<1x8x32xf32>
    %86 = vector.shape_cast %85 : vector<1x8x32xf32> to vector<8x32xf32>
    %87 = vector.shape_cast %84 : vector<8x32xf32> to vector<1x8x32xf32>
    tpu.vector_store %arg3[%c0_24, %c0_25, %c0_26], %87 {strides = array<i32>} : memref<1x8x32xf32, #tpu.memory_space<vmem>>, vector<1x8x32xf32>,
    return
  }
  func.func @transform_0(%arg0: i32) -> (i32, i32, i32) {
    %c0_i32 = arith.constant 0 : i32
    %c0_i32_0 = arith.constant 0 : i32
    %c0_i32_1 = arith.constant 0 : i32
    return %arg0, %c0_i32, %c0_i32_0 : i32, i32, i32
  }
  func.func @transform_1(%arg0: i32) -> (i32, i32) {
    %c0_i32 = arith.constant 0 : i32
    %c0_i32_0 = arith.constant 0 : i32
    %c0_i32_1 = arith.constant 0 : i32
    return %c0_i32, %c0_i32_0 : i32, i32
  }
  func.func @transform_2(%arg0: i32) -> (i32, i32, i32) {
    %c0_i32 = arith.constant 0 : i32
    %c0_i32_0 = arith.constant 0 : i32
    %c0_i32_1 = arith.constant 0 : i32
    return %arg0, %c0_i32, %c0_i32_0 : i32, i32, i32
  }
}

module attributes {stable_mosaic.version = 11 : i64} {
  func.func @_cross_attn_kernel(%arg0: i32, %arg1: memref<1x8x32xf32, #tpu.memory_space<vmem>>, %arg2: memref<1x8x64xf32, #tpu.memory_space<vmem>>, %arg3: memref<1x8x32xf32, #tpu.memory_space<vmem>>) attributes {dimension_semantics = [#tpu.dimension_semantics<parallel>], iteration_bounds = array<i64: 2>, scalar_prefetch = 0 : i64, scratch_operands = 0 : i64, tpu.core_type = #tpu.core_type<tc>, window_params = [{transform_indices = @transform_0, window_bounds = array<i64: 1, 8, 32>}, {transform_indices = @transform_1, window_bounds = array<i64: 1, 8, 64>}, {transform_indices = @transform_2, window_bounds = array<i64: 1, 8, 32>}]} {
    %c0 = arith.constant 0 : index
    %c0_0 = arith.constant 0 : index
    %c0_1 = arith.constant 0 : index
    %0 = vector.load %arg2[%c0, %c0_0, %c0_1] : memref<1x8x64xf32, #tpu.memory_space<vmem>>, vector<1x8x64xf32>
    %1 = vector.shape_cast %0 : vector<1x8x64xf32> to vector<8x64xf32>
    %c0_2 = arith.constant 0 : index
    %c0_3 = arith.constant 0 : index
    %c0_4 = arith.constant 0 : index
    %2 = vector.load %arg1[%c0_2, %c0_3, %c0_4] : memref<1x8x32xf32, #tpu.memory_space<vmem>>, vector<1x8x32xf32>
    %3 = vector.shape_cast %2 : vector<1x8x32xf32> to vector<8x32xf32>
    %4 = vector.extract_strided_slice %1 {offsets = [0, 0], sizes = [8, 32], strides = [1, 1]} : vector<8x64xf32> to vector<8x32xf32>
    %5 = vector.extract_strided_slice %1 {offsets = [0, 32], sizes = [8, 32], strides = [1, 1]} : vector<8x64xf32> to vector<8x32xf32>
    %6 = vector.extract_strided_slice %3 {offsets = [0, 0], sizes = [8, 8], strides = [1, 1]} : vector<8x32xf32> to vector<8x8xf32>
    %7 = vector.extract_strided_slice %4 {offsets = [0, 0], sizes = [8, 8], strides = [1, 1]} : vector<8x32xf32> to vector<8x8xf32>
    %8 = vector.extract_strided_slice %5 {offsets = [0, 0], sizes = [8, 8], strides = [1, 1]} : vector<8x32xf32> to vector<8x8xf32>
    %9 = tpu.transpose %7, [1, 0] : vector<8x8xf32> -> vector<8x8xf32>
    %cst = arith.constant dense<0.000000e+00> : vector<8x8xf32>
    %10 = tpu.matmul %6, %9, %cst {dimension_numbers = #tpu.dot_dimension_numbers<[1], [0], [0], [1], [0, 0, 1, 1], [], []>} : vector<8x8xf32>, vector<8x8xf32>, vector<8x8xf32> -> vector<8x8xf32>
    %cst_5 = arith.constant 0.353553385 : f32
    %11 = vector.broadcast %cst_5 : f32 to vector<8x8xf32>
    %12 = arith.mulf %10, %11 : vector<8x8xf32>
    %cst_6 = arith.constant dense<0xFF800000> : vector<8xf32>
    %13 = vector.multi_reduction <maximumf>, %12, %cst_6 [1] : vector<8x8xf32> to vector<8xf32>
    %14 = vector.shape_cast %13 : vector<8xf32> to vector<8x1xf32>
    %15 = vector.broadcast %14 : vector<8x1xf32> to vector<8x8xf32>
    %16 = arith.subf %12, %15 : vector<8x8xf32>
    %17 = math.exp %16 : vector<8x8xf32>
    %cst_7 = arith.constant dense<0.000000e+00> : vector<8xf32>
    %18 = vector.multi_reduction <add>, %17, %cst_7 [1] : vector<8x8xf32> to vector<8xf32>
    %19 = vector.shape_cast %18 : vector<8xf32> to vector<8x1xf32>
    %20 = tpu.reciprocal %19 {approx = true} : vector<8x1xf32> -> vector<8x1xf32>
    %21 = vector.broadcast %20 : vector<8x1xf32> to vector<8x8xf32>
    %22 = arith.mulf %17, %21 : vector<8x8xf32>
    %cst_8 = arith.constant dense<0.000000e+00> : vector<8x8xf32>
    %23 = tpu.matmul %22, %8, %cst_8 {dimension_numbers = #tpu.dot_dimension_numbers<[1], [0], [0], [1], [0, 0, 1, 1], [], []>} : vector<8x8xf32>, vector<8x8xf32>, vector<8x8xf32> -> vector<8x8xf32>
    %24 = vector.extract_strided_slice %3 {offsets = [0, 8], sizes = [8, 8], strides = [1, 1]} : vector<8x32xf32> to vector<8x8xf32>
    %25 = vector.extract_strided_slice %4 {offsets = [0, 8], sizes = [8, 8], strides = [1, 1]} : vector<8x32xf32> to vector<8x8xf32>
    %26 = vector.extract_strided_slice %5 {offsets = [0, 8], sizes = [8, 8], strides = [1, 1]} : vector<8x32xf32> to vector<8x8xf32>
    %27 = tpu.transpose %25, [1, 0] : vector<8x8xf32> -> vector<8x8xf32>
    %cst_9 = arith.constant dense<0.000000e+00> : vector<8x8xf32>
    %28 = tpu.matmul %24, %27, %cst_9 {dimension_numbers = #tpu.dot_dimension_numbers<[1], [0], [0], [1], [0, 0, 1, 1], [], []>} : vector<8x8xf32>, vector<8x8xf32>, vector<8x8xf32> -> vector<8x8xf32>
    %cst_10 = arith.constant 0.353553385 : f32
    %29 = vector.broadcast %cst_10 : f32 to vector<8x8xf32>
    %30 = arith.mulf %28, %29 : vector<8x8xf32>
    %cst_11 = arith.constant dense<0xFF800000> : vector<8xf32>
    %31 = vector.multi_reduction <maximumf>, %30, %cst_11 [1] : vector<8x8xf32> to vector<8xf32>
    %32 = vector.shape_cast %31 : vector<8xf32> to vector<8x1xf32>
    %33 = vector.broadcast %32 : vector<8x1xf32> to vector<8x8xf32>
    %34 = arith.subf %30, %33 : vector<8x8xf32>
    %35 = math.exp %34 : vector<8x8xf32>
    %cst_12 = arith.constant dense<0.000000e+00> : vector<8xf32>
    %36 = vector.multi_reduction <add>, %35, %cst_12 [1] : vector<8x8xf32> to vector<8xf32>
    %37 = vector.shape_cast %36 : vector<8xf32> to vector<8x1xf32>
    %38 = tpu.reciprocal %37 {approx = true} : vector<8x1xf32> -> vector<8x1xf32>
    %39 = vector.broadcast %38 : vector<8x1xf32> to vector<8x8xf32>
    %40 = arith.mulf %35, %39 : vector<8x8xf32>
    %cst_13 = arith.constant dense<0.000000e+00> : vector<8x8xf32>
    %41 = tpu.matmul %40, %26, %cst_13 {dimension_numbers = #tpu.dot_dimension_numbers<[1], [0], [0], [1], [0, 0, 1, 1], [], []>} : vector<8x8xf32>, vector<8x8xf32>, vector<8x8xf32> -> vector<8x8xf32>
    %42 = vector.extract_strided_slice %3 {offsets = [0, 16], sizes = [8, 8], strides = [1, 1]} : vector<8x32xf32> to vector<8x8xf32>
    %43 = vector.extract_strided_slice %4 {offsets = [0, 16], sizes = [8, 8], strides = [1, 1]} : vector<8x32xf32> to vector<8x8xf32>
    %44 = vector.extract_strided_slice %5 {offsets = [0, 16], sizes = [8, 8], strides = [1, 1]} : vector<8x32xf32> to vector<8x8xf32>
    %45 = tpu.transpose %43, [1, 0] : vector<8x8xf32> -> vector<8x8xf32>
    %cst_14 = arith.constant dense<0.000000e+00> : vector<8x8xf32>
    %46 = tpu.matmul %42, %45, %cst_14 {dimension_numbers = #tpu.dot_dimension_numbers<[1], [0], [0], [1], [0, 0, 1, 1], [], []>} : vector<8x8xf32>, vector<8x8xf32>, vector<8x8xf32> -> vector<8x8xf32>
    %cst_15 = arith.constant 0.353553385 : f32
    %47 = vector.broadcast %cst_15 : f32 to vector<8x8xf32>
    %48 = arith.mulf %46, %47 : vector<8x8xf32>
    %cst_16 = arith.constant dense<0xFF800000> : vector<8xf32>
    %49 = vector.multi_reduction <maximumf>, %48, %cst_16 [1] : vector<8x8xf32> to vector<8xf32>
    %50 = vector.shape_cast %49 : vector<8xf32> to vector<8x1xf32>
    %51 = vector.broadcast %50 : vector<8x1xf32> to vector<8x8xf32>
    %52 = arith.subf %48, %51 : vector<8x8xf32>
    %53 = math.exp %52 : vector<8x8xf32>
    %cst_17 = arith.constant dense<0.000000e+00> : vector<8xf32>
    %54 = vector.multi_reduction <add>, %53, %cst_17 [1] : vector<8x8xf32> to vector<8xf32>
    %55 = vector.shape_cast %54 : vector<8xf32> to vector<8x1xf32>
    %56 = tpu.reciprocal %55 {approx = true} : vector<8x1xf32> -> vector<8x1xf32>
    %57 = vector.broadcast %56 : vector<8x1xf32> to vector<8x8xf32>
    %58 = arith.mulf %53, %57 : vector<8x8xf32>
    %cst_18 = arith.constant dense<0.000000e+00> : vector<8x8xf32>
    %59 = tpu.matmul %58, %44, %cst_18 {dimension_numbers = #tpu.dot_dimension_numbers<[1], [0], [0], [1], [0, 0, 1, 1], [], []>} : vector<8x8xf32>, vector<8x8xf32>, vector<8x8xf32> -> vector<8x8xf32>
    %60 = vector.extract_strided_slice %3 {offsets = [0, 24], sizes = [8, 8], strides = [1, 1]} : vector<8x32xf32> to vector<8x8xf32>
    %61 = vector.extract_strided_slice %4 {offsets = [0, 24], sizes = [8, 8], strides = [1, 1]} : vector<8x32xf32> to vector<8x8xf32>
    %62 = vector.extract_strided_slice %5 {offsets = [0, 24], sizes = [8, 8], strides = [1, 1]} : vector<8x32xf32> to vector<8x8xf32>
    %63 = tpu.transpose %61, [1, 0] : vector<8x8xf32> -> vector<8x8xf32>
    %cst_19 = arith.constant dense<0.000000e+00> : vector<8x8xf32>
    %64 = tpu.matmul %60, %63, %cst_19 {dimension_numbers = #tpu.dot_dimension_numbers<[1], [0], [0], [1], [0, 0, 1, 1], [], []>} : vector<8x8xf32>, vector<8x8xf32>, vector<8x8xf32> -> vector<8x8xf32>
    %cst_20 = arith.constant 0.353553385 : f32
    %65 = vector.broadcast %cst_20 : f32 to vector<8x8xf32>
    %66 = arith.mulf %64, %65 : vector<8x8xf32>
    %cst_21 = arith.constant dense<0xFF800000> : vector<8xf32>
    %67 = vector.multi_reduction <maximumf>, %66, %cst_21 [1] : vector<8x8xf32> to vector<8xf32>
    %68 = vector.shape_cast %67 : vector<8xf32> to vector<8x1xf32>
    %69 = vector.broadcast %68 : vector<8x1xf32> to vector<8x8xf32>
    %70 = arith.subf %66, %69 : vector<8x8xf32>
    %71 = math.exp %70 : vector<8x8xf32>
    %cst_22 = arith.constant dense<0.000000e+00> : vector<8xf32>
    %72 = vector.multi_reduction <add>, %71, %cst_22 [1] : vector<8x8xf32> to vector<8xf32>
    %73 = vector.shape_cast %72 : vector<8xf32> to vector<8x1xf32>
    %74 = tpu.reciprocal %73 {approx = true} : vector<8x1xf32> -> vector<8x1xf32>
    %75 = vector.broadcast %74 : vector<8x1xf32> to vector<8x8xf32>
    %76 = arith.mulf %71, %75 : vector<8x8xf32>
    %cst_23 = arith.constant dense<0.000000e+00> : vector<8x8xf32>
    %77 = tpu.matmul %76, %62, %cst_23 {dimension_numbers = #tpu.dot_dimension_numbers<[1], [0], [0], [1], [0, 0, 1, 1], [], []>} : vector<8x8xf32>, vector<8x8xf32>, vector<8x8xf32> -> vector<8x8xf32>
    %78 = tpu.concatenate %23, %41, %59, %77 in 1 : vector<8x8xf32>, vector<8x8xf32>, vector<8x8xf32>, vector<8x8xf32> -> vector<8x32xf32>
    %c0_24 = arith.constant 0 : index
    %c0_25 = arith.constant 0 : index
    %c0_26 = arith.constant 0 : index
    %79 = vector.load %arg3[%c0_24, %c0_25, %c0_26] : memref<1x8x32xf32, #tpu.memory_space<vmem>>, vector<1x8x32xf32>
    %80 = vector.shape_cast %79 : vector<1x8x32xf32> to vector<8x32xf32>
    %81 = vector.shape_cast %78 : vector<8x32xf32> to vector<1x8x32xf32>
    tpu.vector_store %arg3[%c0_24, %c0_25, %c0_26], %81 {strides = array<i32>} : memref<1x8x32xf32, #tpu.memory_space<vmem>>, vector<1x8x32xf32>,
    return
  }
  func.func @transform_0(%arg0: i32) -> (i32, i32, i32) {
    %c0_i32 = arith.constant 0 : i32
    %c0_i32_0 = arith.constant 0 : i32
    %c0_i32_1 = arith.constant 0 : i32
    return %arg0, %c0_i32, %c0_i32_0 : i32, i32, i32
  }
  func.func @transform_1(%arg0: i32) -> (i32, i32, i32) {
    %c0_i32 = arith.constant 0 : i32
    %c0_i32_0 = arith.constant 0 : i32
    %c0_i32_1 = arith.constant 0 : i32
    return %arg0, %c0_i32, %c0_i32_0 : i32, i32, i32
  }
  func.func @transform_2(%arg0: i32) -> (i32, i32, i32) {
    %c0_i32 = arith.constant 0 : i32
    %c0_i32_0 = arith.constant 0 : i32
    %c0_i32_1 = arith.constant 0 : i32
    return %arg0, %c0_i32, %c0_i32_0 : i32, i32, i32
  }
}

module attributes {stable_mosaic.version = 11 : i64} {
  func.func @_linear_kernel(%arg0: i32, %arg1: i32, %arg2: i32, %arg3: memref<8x32xf32, #tpu.memory_space<vmem>>, %arg4: memref<32x64xf32, #tpu.memory_space<vmem>>, %arg5: memref<1x64xf32, #tpu.memory_space<vmem>>, %arg6: memref<8x64xf32, #tpu.memory_space<vmem>>, %arg7: memref<8x64xf32, #tpu.memory_space<vmem>>) attributes {dimension_semantics = [#tpu.dimension_semantics<parallel>, #tpu.dimension_semantics<parallel>, #tpu.dimension_semantics<arbitrary>], iteration_bounds = array<i64: 2, 1, 1>, scalar_prefetch = 0 : i64, scratch_operands = 1 : i64, tpu.core_type = #tpu.core_type<tc>, window_params = [{transform_indices = @transform_0, window_bounds = array<i64: 8, 32>}, {transform_indices = @transform_1, window_bounds = array<i64: 32, 64>}, {transform_indices = @transform_2, window_bounds = array<i64: 1, 64>}, {transform_indices = @transform_3, window_bounds = array<i64: 8, 64>}]} {
    %c0_i32 = arith.constant 0 : i32
    %0 = arith.cmpi eq, %arg2, %c0_i32 : i32
    %1 = arith.extui %0 : i1 to i32
    %c0_i32_0 = arith.constant 0 : i32
    %2 = arith.cmpi ne, %1, %c0_i32_0 : i32
    scf.if %2 {
      %cst_10 = arith.constant 0.000000e+00 : f32
      %12 = vector.broadcast %cst_10 : f32 to vector<8x64xf32>
      %c0_11 = arith.constant 0 : index
      %c0_12 = arith.constant 0 : index
      %13 = vector.load %arg7[%c0_11, %c0_12] : memref<8x64xf32, #tpu.memory_space<vmem>>, vector<8x64xf32>
      tpu.vector_store %arg7[%c0_11, %c0_12], %12 {strides = array<i32>} : memref<8x64xf32, #tpu.memory_space<vmem>>, vector<8x64xf32>,
    } else {
    }
    %c0 = arith.constant 0 : index
    %c0_1 = arith.constant 0 : index
    %3 = vector.load %arg7[%c0, %c0_1] : memref<8x64xf32, #tpu.memory_space<vmem>>, vector<8x64xf32>
    %c0_2 = arith.constant 0 : index
    %c0_3 = arith.constant 0 : index
    %4 = vector.load %arg3[%c0_2, %c0_3] : memref<8x32xf32, #tpu.memory_space<vmem>>, vector<8x32xf32>
    %c0_4 = arith.constant 0 : index
    %c0_5 = arith.constant 0 : index
    %5 = vector.load %arg4[%c0_4, %c0_5] : memref<32x64xf32, #tpu.memory_space<vmem>>, vector<32x64xf32>
    %cst = arith.constant dense<0.000000e+00> : vector<8x64xf32>
    %6 = tpu.matmul %4, %5, %cst {dimension_numbers = #tpu.dot_dimension_numbers<[1], [0], [0], [1], [0, 0, 1, 1], [], []>} : vector<8x32xf32>, vector<32x64xf32>, vector<8x64xf32> -> vector<8x64xf32>
    %7 = arith.addf %3, %6 : vector<8x64xf32>
    %c0_6 = arith.constant 0 : index
    %c0_7 = arith.constant 0 : index
    %8 = vector.load %arg7[%c0_6, %c0_7] : memref<8x64xf32, #tpu.memory_space<vmem>>, vector<8x64xf32>
    tpu.vector_store %arg7[%c0_6, %c0_7], %7 {strides = array<i32>} : memref<8x64xf32, #tpu.memory_space<vmem>>, vector<8x64xf32>,
    %c0_i32_8 = arith.constant 0 : i32
    %9 = arith.cmpi eq, %arg2, %c0_i32_8 : i32
    %10 = arith.extui %9 : i1 to i32
    %c0_i32_9 = arith.constant 0 : i32
    %11 = arith.cmpi ne, %10, %c0_i32_9 : i32
    scf.if %11 {
      %c0_10 = arith.constant 0 : index
      %c0_11 = arith.constant 0 : index
      %12 = vector.load %arg7[%c0_10, %c0_11] : memref<8x64xf32, #tpu.memory_space<vmem>>, vector<8x64xf32>
      %c0_12 = arith.constant 0 : index
      %c0_13 = arith.constant 0 : index
      %13 = vector.load %arg5[%c0_12, %c0_13] : memref<1x64xf32, #tpu.memory_space<vmem>>, vector<1x64xf32>
      %14 = vector.broadcast %13 : vector<1x64xf32> to vector<8x64xf32>
      %15 = arith.addf %12, %14 : vector<8x64xf32>
      %c0_14 = arith.constant 0 : index
      %c0_15 = arith.constant 0 : index
      %16 = vector.load %arg6[%c0_14, %c0_15] : memref<8x64xf32, #tpu.memory_space<vmem>>, vector<8x64xf32>
      tpu.vector_store %arg6[%c0_14, %c0_15], %15 {strides = array<i32>} : memref<8x64xf32, #tpu.memory_space<vmem>>, vector<8x64xf32>,
    } else {
    }
    return
  }
  func.func @transform_0(%arg0: i32, %arg1: i32, %arg2: i32) -> (i32, i32) {
    %c0_i32 = arith.constant 0 : i32
    return %arg0, %arg2 : i32, i32
  }
  func.func @transform_1(%arg0: i32, %arg1: i32, %arg2: i32) -> (i32, i32) {
    %c0_i32 = arith.constant 0 : i32
    return %arg2, %arg1 : i32, i32
  }
  func.func @transform_2(%arg0: i32, %arg1: i32, %arg2: i32) -> (i32, i32) {
    %c0_i32 = arith.constant 0 : i32
    %c0_i32_0 = arith.constant 0 : i32
    return %c0_i32, %arg1 : i32, i32
  }
  func.func @transform_3(%arg0: i32, %arg1: i32, %arg2: i32) -> (i32, i32) {
    %c0_i32 = arith.constant 0 : i32
    return %arg0, %arg1 : i32, i32
  }
}

module attributes {stable_mosaic.version = 11 : i64} {
  func.func @_ffn_res_ln_kernel(%arg0: i32, %arg1: i32, %arg2: memref<8x32xf32, #tpu.memory_space<vmem>>, %arg3: memref<32x1024xf32, #tpu.memory_space<vmem>>, %arg4: memref<1x1024xf32, #tpu.memory_space<vmem>>, %arg5: memref<1024x32xf32, #tpu.memory_space<vmem>>, %arg6: memref<1x32xf32, #tpu.memory_space<vmem>>, %arg7: memref<1x32xf32, #tpu.memory_space<vmem>>, %arg8: memref<1x32xf32, #tpu.memory_space<vmem>>, %arg9: memref<8x32xf32, #tpu.memory_space<vmem>>, %arg10: memref<8x32xf32, #tpu.memory_space<vmem>>) attributes {dimension_semantics = [#tpu.dimension_semantics<parallel>, #tpu.dimension_semantics<arbitrary>], iteration_bounds = array<i64: 2, 2>, scalar_prefetch = 0 : i64, scratch_operands = 1 : i64, tpu.core_type = #tpu.core_type<tc>, window_params = [{transform_indices = @transform_0, window_bounds = array<i64: 8, 32>}, {transform_indices = @transform_1, window_bounds = array<i64: 32, 1024>}, {transform_indices = @transform_2, window_bounds = array<i64: 1, 1024>}, {transform_indices = @transform_3, window_bounds = array<i64: 1024, 32>}, {pipeline_mode = #tpu.pipeline_mode<synchronous>, transform_indices = @transform_4, window_bounds = array<i64: 1, 32>}, {pipeline_mode = #tpu.pipeline_mode<synchronous>, transform_indices = @transform_5, window_bounds = array<i64: 1, 32>}, {pipeline_mode = #tpu.pipeline_mode<synchronous>, transform_indices = @transform_6, window_bounds = array<i64: 1, 32>}, {transform_indices = @transform_7, window_bounds = array<i64: 8, 32>}]} {
    %c0_i32 = arith.constant 0 : i32
    %0 = arith.cmpi eq, %arg1, %c0_i32 : i32
    %1 = arith.extui %0 : i1 to i32
    %c0_i32_0 = arith.constant 0 : i32
    %2 = arith.cmpi ne, %1, %c0_i32_0 : i32
    scf.if %2 {
      %cst_15 = arith.constant 0.000000e+00 : f32
      %19 = vector.broadcast %cst_15 : f32 to vector<8x32xf32>
      %c0_16 = arith.constant 0 : index
      %c0_17 = arith.constant 0 : index
      %20 = vector.load %arg10[%c0_16, %c0_17] : memref<8x32xf32, #tpu.memory_space<vmem>>, vector<8x32xf32>
      tpu.vector_store %arg10[%c0_16, %c0_17], %19 {strides = array<i32>} : memref<8x32xf32, #tpu.memory_space<vmem>>, vector<8x32xf32>,
    } else {
    }
    %c0 = arith.constant 0 : index
    %c0_1 = arith.constant 0 : index
    %3 = vector.load %arg2[%c0, %c0_1] : memref<8x32xf32, #tpu.memory_space<vmem>>, vector<8x32xf32>
    %c0_2 = arith.constant 0 : index
    %c0_3 = arith.constant 0 : index
    %4 = vector.load %arg3[%c0_2, %c0_3] : memref<32x1024xf32, #tpu.memory_space<vmem>>, vector<32x1024xf32>
    %cst = arith.constant dense<0.000000e+00> : vector<8x1024xf32>
    %5 = tpu.matmul %3, %4, %cst {dimension_numbers = #tpu.dot_dimension_numbers<[1], [0], [0], [1], [0, 0, 1, 1], [], []>} : vector<8x32xf32>, vector<32x1024xf32>, vector<8x1024xf32> -> vector<8x1024xf32>
    %c0_4 = arith.constant 0 : index
    %c0_5 = arith.constant 0 : index
    %6 = vector.load %arg4[%c0_4, %c0_5] : memref<1x1024xf32, #tpu.memory_space<vmem>>, vector<1x1024xf32>
    %7 = vector.broadcast %6 : vector<1x1024xf32> to vector<8x1024xf32>
    %8 = arith.addf %5, %7 : vector<8x1024xf32>
    %cst_6 = arith.constant 0.000000e+00 : f32
    %9 = vector.broadcast %cst_6 : f32 to vector<8x1024xf32>
    %10 = arith.maximumf %8, %9 : vector<8x1024xf32>
    %c0_7 = arith.constant 0 : index
    %c0_8 = arith.constant 0 : index
    %11 = vector.load %arg10[%c0_7, %c0_8] : memref<8x32xf32, #tpu.memory_space<vmem>>, vector<8x32xf32>
    %c0_9 = arith.constant 0 : index
    %c0_10 = arith.constant 0 : index
    %12 = vector.load %arg5[%c0_9, %c0_10] : memref<1024x32xf32, #tpu.memory_space<vmem>>, vector<1024x32xf32>
    %cst_11 = arith.constant dense<0.000000e+00> : vector<8x32xf32>
    %13 = tpu.matmul %10, %12, %cst_11 {dimension_numbers = #tpu.dot_dimension_numbers<[1], [0], [0], [1], [0, 0, 1, 1], [], []>} : vector<8x1024xf32>, vector<1024x32xf32>, vector<8x32xf32> -> vector<8x32xf32>
    %14 = arith.addf %11, %13 : vector<8x32xf32>
    %c0_12 = arith.constant 0 : index
    %c0_13 = arith.constant 0 : index
    %15 = vector.load %arg10[%c0_12, %c0_13] : memref<8x32xf32, #tpu.memory_space<vmem>>, vector<8x32xf32>
    tpu.vector_store %arg10[%c0_12, %c0_13], %14 {strides = array<i32>} : memref<8x32xf32, #tpu.memory_space<vmem>>, vector<8x32xf32>,
    %c1_i32 = arith.constant 1 : i32
    %16 = arith.cmpi eq, %arg1, %c1_i32 : i32
    %17 = arith.extui %16 : i1 to i32
    %c0_i32_14 = arith.constant 0 : i32
    %18 = arith.cmpi ne, %17, %c0_i32_14 : i32
    scf.if %18 {
      %c0_15 = arith.constant 0 : index
      %c0_16 = arith.constant 0 : index
      %19 = vector.load %arg10[%c0_15, %c0_16] : memref<8x32xf32, #tpu.memory_space<vmem>>, vector<8x32xf32>
      %c0_17 = arith.constant 0 : index
      %c0_18 = arith.constant 0 : index
      %20 = vector.load %arg6[%c0_17, %c0_18] : memref<1x32xf32, #tpu.memory_space<vmem>>, vector<1x32xf32>
      %21 = vector.broadcast %20 : vector<1x32xf32> to vector<8x32xf32>
      %22 = arith.addf %19, %21 : vector<8x32xf32>
      %c0_19 = arith.constant 0 : index
      %c0_20 = arith.constant 0 : index
      %23 = vector.load %arg2[%c0_19, %c0_20] : memref<8x32xf32, #tpu.memory_space<vmem>>, vector<8x32xf32>
      %24 = arith.addf %22, %23 : vector<8x32xf32>
      %cst_21 = arith.constant dense<0.000000e+00> : vector<8xf32>
      %25 = vector.multi_reduction <add>, %24, %cst_21 [1] : vector<8x32xf32> to vector<8xf32>
      %26 = vector.shape_cast %25 : vector<8xf32> to vector<8x1xf32>
      %cst_22 = arith.constant 3.200000e+01 : f32
      %27 = vector.broadcast %cst_22 : f32 to vector<8x1xf32>
      %28 = arith.divf %26, %27 : vector<8x1xf32>
      %29 = vector.broadcast %28 : vector<8x1xf32> to vector<8x32xf32>
      %30 = arith.subf %24, %29 : vector<8x32xf32>
      %31 = arith.mulf %30, %30 : vector<8x32xf32>
      %cst_23 = arith.constant dense<0.000000e+00> : vector<8xf32>
      %32 = vector.multi_reduction <add>, %31, %cst_23 [1] : vector<8x32xf32> to vector<8xf32>
      %33 = vector.shape_cast %32 : vector<8xf32> to vector<8x1xf32>
      %cst_24 = arith.constant 3.200000e+01 : f32
      %34 = vector.broadcast %cst_24 : f32 to vector<8x1xf32>
      %35 = arith.divf %33, %34 : vector<8x1xf32>
      %36 = vector.broadcast %28 : vector<8x1xf32> to vector<8x32xf32>
      %37 = arith.subf %24, %36 : vector<8x32xf32>
      %cst_25 = arith.constant 9.99999974E-6 : f32
      %38 = vector.broadcast %cst_25 : f32 to vector<8x1xf32>
      %39 = arith.addf %35, %38 : vector<8x1xf32>
      %40 = math.rsqrt %39 : vector<8x1xf32>
      %41 = vector.broadcast %40 : vector<8x1xf32> to vector<8x32xf32>
      %42 = arith.mulf %37, %41 : vector<8x32xf32>
      %c0_26 = arith.constant 0 : index
      %c0_27 = arith.constant 0 : index
      %43 = vector.load %arg7[%c0_26, %c0_27] : memref<1x32xf32, #tpu.memory_space<vmem>>, vector<1x32xf32>
      %44 = vector.broadcast %43 : vector<1x32xf32> to vector<8x32xf32>
      %45 = arith.mulf %42, %44 : vector<8x32xf32>
      %c0_28 = arith.constant 0 : index
      %c0_29 = arith.constant 0 : index
      %46 = vector.load %arg8[%c0_28, %c0_29] : memref<1x32xf32, #tpu.memory_space<vmem>>, vector<1x32xf32>
      %47 = vector.broadcast %46 : vector<1x32xf32> to vector<8x32xf32>
      %48 = arith.addf %45, %47 : vector<8x32xf32>
      %c0_30 = arith.constant 0 : index
      %c0_31 = arith.constant 0 : index
      %49 = vector.load %arg9[%c0_30, %c0_31] : memref<8x32xf32, #tpu.memory_space<vmem>>, vector<8x32xf32>
      tpu.vector_store %arg9[%c0_30, %c0_31], %48 {strides = array<i32>} : memref<8x32xf32, #tpu.memory_space<vmem>>, vector<8x32xf32>,
    } else {
    }
    return
  }
  func.func @transform_0(%arg0: i32, %arg1: i32) -> (i32, i32) {
    %c0_i32 = arith.constant 0 : i32
    %c0_i32_0 = arith.constant 0 : i32
    return %arg0, %c0_i32 : i32, i32
  }
  func.func @transform_1(%arg0: i32, %arg1: i32) -> (i32, i32) {
    %c0_i32 = arith.constant 0 : i32
    %c0_i32_0 = arith.constant 0 : i32
    return %c0_i32, %arg1 : i32, i32
  }
  func.func @transform_2(%arg0: i32, %arg1: i32) -> (i32, i32) {
    %c0_i32 = arith.constant 0 : i32
    %c0_i32_0 = arith.constant 0 : i32
    return %c0_i32, %arg1 : i32, i32
  }
  func.func @transform_3(%arg0: i32, %arg1: i32) -> (i32, i32) {
    %c0_i32 = arith.constant 0 : i32
    %c0_i32_0 = arith.constant 0 : i32
    return %arg1, %c0_i32 : i32, i32
  }
  func.func @transform_4(%arg0: i32, %arg1: i32) -> (i32, i32) {
    %c0_i32 = arith.constant 0 : i32
    %c0_i32_0 = arith.constant 0 : i32
    %c0_i32_1 = arith.constant 0 : i32
    return %c0_i32, %c0_i32_0 : i32, i32
  }
  func.func @transform_5(%arg0: i32, %arg1: i32) -> (i32, i32) {
    %c0_i32 = arith.constant 0 : i32
    %c0_i32_0 = arith.constant 0 : i32
    %c0_i32_1 = arith.constant 0 : i32
    return %c0_i32, %c0_i32_0 : i32, i32
  }
  func.func @transform_6(%arg0: i32, %arg1: i32) -> (i32, i32) {
    %c0_i32 = arith.constant 0 : i32
    %c0_i32_0 = arith.constant 0 : i32
    %c0_i32_1 = arith.constant 0 : i32
    return %c0_i32, %c0_i32_0 : i32, i32
  }
  func.func @transform_7(%arg0: i32, %arg1: i32) -> (i32, i32) {
    %c0_i32 = arith.constant 0 : i32
    %c0_i32_0 = arith.constant 0 : i32
    return %arg0, %c0_i32 : i32, i32
  }
}

module attributes {stable_mosaic.version = 11 : i64} {
  func.func @_linear_kernel(%arg0: i32, %arg1: i32, %arg2: i32, %arg3: memref<8x32xf32, #tpu.memory_space<vmem>>, %arg4: memref<32x50xf32, #tpu.memory_space<vmem>>, %arg5: memref<1x50xf32, #tpu.memory_space<vmem>>, %arg6: memref<8x50xf32, #tpu.memory_space<vmem>>, %arg7: memref<8x50xf32, #tpu.memory_space<vmem>>) attributes {dimension_semantics = [#tpu.dimension_semantics<parallel>, #tpu.dimension_semantics<parallel>, #tpu.dimension_semantics<arbitrary>], iteration_bounds = array<i64: 2, 1, 1>, scalar_prefetch = 0 : i64, scratch_operands = 1 : i64, tpu.core_type = #tpu.core_type<tc>, window_params = [{transform_indices = @transform_0, window_bounds = array<i64: 8, 32>}, {transform_indices = @transform_1, window_bounds = array<i64: 32, 50>}, {transform_indices = @transform_2, window_bounds = array<i64: 1, 50>}, {transform_indices = @transform_3, window_bounds = array<i64: 8, 50>}]} {
    %c0_i32 = arith.constant 0 : i32
    %0 = arith.cmpi eq, %arg2, %c0_i32 : i32
    %1 = arith.extui %0 : i1 to i32
    %c0_i32_0 = arith.constant 0 : i32
    %2 = arith.cmpi ne, %1, %c0_i32_0 : i32
    scf.if %2 {
      %cst_10 = arith.constant 0.000000e+00 : f32
      %12 = vector.broadcast %cst_10 : f32 to vector<8x50xf32>
      %c0_11 = arith.constant 0 : index
      %c0_12 = arith.constant 0 : index
      %13 = vector.load %arg7[%c0_11, %c0_12] : memref<8x50xf32, #tpu.memory_space<vmem>>, vector<8x50xf32>
      tpu.vector_store %arg7[%c0_11, %c0_12], %12 {strides = array<i32>} : memref<8x50xf32, #tpu.memory_space<vmem>>, vector<8x50xf32>,
    } else {
    }
    %c0 = arith.constant 0 : index
    %c0_1 = arith.constant 0 : index
    %3 = vector.load %arg7[%c0, %c0_1] : memref<8x50xf32, #tpu.memory_space<vmem>>, vector<8x50xf32>
    %c0_2 = arith.constant 0 : index
    %c0_3 = arith.constant 0 : index
    %4 = vector.load %arg3[%c0_2, %c0_3] : memref<8x32xf32, #tpu.memory_space<vmem>>, vector<8x32xf32>
    %c0_4 = arith.constant 0 : index
    %c0_5 = arith.constant 0 : index
    %5 = vector.load %arg4[%c0_4, %c0_5] : memref<32x50xf32, #tpu.memory_space<vmem>>, vector<32x50xf32>
    %cst = arith.constant dense<0.000000e+00> : vector<8x50xf32>
    %6 = tpu.matmul %4, %5, %cst {dimension_numbers = #tpu.dot_dimension_numbers<[1], [0], [0], [1], [0, 0, 1, 1], [], []>} : vector<8x32xf32>, vector<32x50xf32>, vector<8x50xf32> -> vector<8x50xf32>
    %7 = arith.addf %3, %6 : vector<8x50xf32>
    %c0_6 = arith.constant 0 : index
    %c0_7 = arith.constant 0 : index
    %8 = vector.load %arg7[%c0_6, %c0_7] : memref<8x50xf32, #tpu.memory_space<vmem>>, vector<8x50xf32>
    tpu.vector_store %arg7[%c0_6, %c0_7], %7 {strides = array<i32>} : memref<8x50xf32, #tpu.memory_space<vmem>>, vector<8x50xf32>,
    %c0_i32_8 = arith.constant 0 : i32
    %9 = arith.cmpi eq, %arg2, %c0_i32_8 : i32
    %10 = arith.extui %9 : i1 to i32
    %c0_i32_9 = arith.constant 0 : i32
    %11 = arith.cmpi ne, %10, %c0_i32_9 : i32
    scf.if %11 {
      %c0_10 = arith.constant 0 : index
      %c0_11 = arith.constant 0 : index
      %12 = vector.load %arg7[%c0_10, %c0_11] : memref<8x50xf32, #tpu.memory_space<vmem>>, vector<8x50xf32>
      %c0_12 = arith.constant 0 : index
      %c0_13 = arith.constant 0 : index
      %13 = vector.load %arg5[%c0_12, %c0_13] : memref<1x50xf32, #tpu.memory_space<vmem>>, vector<1x50xf32>
      %14 = vector.broadcast %13 : vector<1x50xf32> to vector<8x50xf32>
      %15 = arith.addf %12, %14 : vector<8x50xf32>
      %c0_14 = arith.constant 0 : index
      %c0_15 = arith.constant 0 : index
      %16 = vector.load %arg6[%c0_14, %c0_15] : memref<8x50xf32, #tpu.memory_space<vmem>>, vector<8x50xf32>
      tpu.vector_store %arg6[%c0_14, %c0_15], %15 {strides = array<i32>} : memref<8x50xf32, #tpu.memory_space<vmem>>, vector<8x50xf32>,
    } else {
    }
    return
  }
  func.func @transform_0(%arg0: i32, %arg1: i32, %arg2: i32) -> (i32, i32) {
    %c0_i32 = arith.constant 0 : i32
    return %arg0, %arg2 : i32, i32
  }
  func.func @transform_1(%arg0: i32, %arg1: i32, %arg2: i32) -> (i32, i32) {
    %c0_i32 = arith.constant 0 : i32
    return %arg2, %arg1 : i32, i32
  }
  func.func @transform_2(%arg0: i32, %arg1: i32, %arg2: i32) -> (i32, i32) {
    %c0_i32 = arith.constant 0 : i32
    %c0_i32_0 = arith.constant 0 : i32
    return %c0_i32, %arg1 : i32, i32
  }
  func.func @transform_3(%arg0: i32, %arg1: i32, %arg2: i32) -> (i32, i32) {
    %c0_i32 = arith.constant 0 : i32
    return %arg0, %arg1 : i32, i32
  }
}

</mosaic_0001>

<bundles_post_ra>
// kernel: transformer_decoder_forward.19
= control target key start
LH: loop header
LB: loop body
LE: loop exit
PB: predicated region body
PF: predicated region fallthrough
CT: control target
= control target key end

     0   :  { %s662_s21 = smov 0   ;;  %s664_s22 = smov 0   ;;  %s730_s0 = inlined_call_operand.vmem [shape: f32[16,32], index: 0, kind: input, shape index: {}]   ;;  %s731_s1 = inlined_call_operand.vmem [shape: f32[32,32], index: 1, kind: input, shape index: {}]   ;;  %s732_s2 = inlined_call_operand.vmem [shape: f32[1,32], index: 2, kind: input, shape index: {}]   ;;  %s733_s3 = inlined_call_operand.vmem [shape: f32[16,32], index: 3, kind: input, shape index: {}]   ;;  %s734_s4 = inlined_call_operand.vmem [shape: f32[1,32], index: 4, kind: input, shape index: {}]   ;;  %s735_s5 = inlined_call_operand.vmem [shape: f32[1,32], index: 5, kind: input, shape index: {}]   ;;  %s736_s6 = inlined_call_operand.vmem [shape: f32[16,32], index: 6, kind: output, shape index: {}]  }
   0x1   :  { %s666_s23 = smov 0  }
   0x2 LB: > { %s28_s24 = sadd.s32 1, %s618_s22  ;;  %p539_p0 = scmp.ge.s32.totalorder %s622_s23, 1  ;;  %s622_s23 = sphi %s666_s23, %s16_s23   ;;  %s618_s22 = sphi %s664_s22, %s738_s22   ;;  %s614_s21 = sphi %s662_s21, %s737_s21  }
   0x3   : > { %p30_p1 = scmp.ge.s32.totalorder %s28_s24, 2  ;;  %p248_p2 = scmp.lt.s32.totalorder %s622_s23, 3 }
   0x5   : > { %s740_s24 = smov (%p30_p1, %s28_s24), 0  ;;  %p249_p3 = pnand %p539_p0, %p248_p2 }
   0x6   : > { %v317_v0 = vld [vmem:[%s731_s1] sm:$0xff] (!%p249_p3)  ;;  %v318_v1 = vld [vmem:[%s731_s1 + $0x8] sm:$0xff] (!%p249_p3)  ;;  %v319_v2 = vld [vmem:[%s731_s1 + $0x10] sm:$0xff] (!%p249_p3)  ;;  %vm313_vm0 = vcmask (!%p249_p3), 261120   ;;  %v624_v3 = vmov (!%p249_p3), 0.0|0.0   ;;  %v625_v6 = vmov (!%p249_p3), 0.0  }
   0x7   : > { %252 = sbr.rel (%p249_p3) target bundleno = 558 (0x22e), region = 44  ;;  %565 = vmatprep.subr.bf16.mxu0 (!%p249_p3), %v624_v3  ;;  %v566_v4 = vpack.c.bf16 (!%p249_p3), %v318_v1, %v317_v0  ;;  %v320_v5 = vld [vmem:[%s731_s1 + $0x18] sm:$0xff] (!%p249_p3)  ;;  %314 = vst.msk [vmem:[#allocation2] sm:$0xff] (!%p249_p3), %vm313_vm0, %v625_v6  ;;  %p288_p4 = scmp.lt.s32.totalorder (!%p249_p3), %s614_s21, 1  ;;  %vm626_vm1 = vmmov (!%p249_p3), 0  }
   0x8   : > { %562 = vmatprep.mubr.msk.f32.mxu0 (!%p249_p3), %vm626_vm1, %v625_v6  ;;  %v569_v7 = vpack.c.bf16 (!%p249_p3), %v320_v5, %v319_v2  ;;  %v544_v13 = vld [vmem:[%s732_s2] ss:$0 sm:$0xff] (!%p249_p3) }
   0x9   : > { %567 = vmatpush3.bf16.msra.mxu0 (!%p249_p3), %v566_v4  ;;  %v545_v28 = vld [vmem:[%s734_s4] ss:$0 sm:$0xff] (!%p249_p3) }
   0xa   : > { %568 = vmatprep.subr.bf16.mxu0 (!%p249_p3), %v624_v3  ;;  %v546_v30 = vld [vmem:[%s735_s5] ss:$0 sm:$0xff] (!%p249_p3) }
   0xd   : > { %570 = vmatpush3.bf16.msra.mxu0 (!%p249_p3), %v569_v7 }
   0xe   : > { %s742_s21 = smov (!%p288_p4, %s614_s21), 1  ;;  %v315_v9 = vld [vmem:[#allocation2] sm:$0xff] }
   0xf   : > { %s693_s9 = sshll.u32 %s742_s21, 3 }
  0x10   : > { %s294_s12 = scalar_lea.vmem %s730_s0, %s693_s9  ;;  %s304_s15 = scalar_lea.vmem %s733_s3, %s693_s9 }
  0x11   : > { %v316_v8 = vld [vmem:[%s294_s12] sm:$0xff]  ;;  %s308_s27 = scalar_lea.vmem %s736_s6, %s693_s9 }
  0x12   : > { %563 = vmatmul.mubr.msk.f32.vlgmr.msra.gmra.mrb[0].mxu0 %vm313_vm0, %v316_v8  ;;  %v409_v15 = vld [vmem:[%s304_s15] sm:$0xff] }
  0xe5   : > { %v391_v10 = vpop.f32.mrb[0].mxu0 }
  0xe6   : > { %v395_v11 = vadd.f32 %v391_v10, %v315_v9  ;;  %v564_v12 = vpop.f32.mrb[1].mxu0 }
  0xe8   : > { %396 = vst.msk [vmem:[#allocation2] sm:$0xff] %vm313_vm0, %v395_v11 }
  0xef   : > { %v400_v14 = vld [vmem:[#allocation2] sm:$0xff] }
  0xf0   : > { %v408_v16 = vadd.f32 %v544_v13, %v400_v14 }
  0xf2   : > { %v410_v17 = vadd.f32 %v409_v15, %v408_v16 }
  0xf4   : > { %v411_v18 = vsel %vm313_vm0, %v410_v17, 0.0 }
  0xf5   : > { %412 = vadd.xlane.f32.xlu0 %v411_v18 }
 0x182   : > { %v413_v19 = vpop.xlane.xlu0 %412 }
 0x183   : > { %v415_v20 = vmul.f32 0.03125, %v413_v19 }
 0x185   : > { %v416_v21 = vsub.f32 %v410_v17, %v415_v20 }
 0x187   : > { %v417_v22 = vmul.f32 %v416_v21, %v416_v21 }
 0x189   : > { %v418_v23 = vsel %vm313_vm0, %v417_v22, 0.0 }
 0x18a   : > { %419 = vadd.xlane.f32.xlu0 %v418_v23 }
 0x217   : > { %v420_v24 = vpop.xlane.xlu0 %419 }
 0x218   : > { %v421_v25 = vmul.f32 0.03125, %v420_v24 }
 0x21a   : > { %v422_v26 = vadd.f32 1e-05, %v421_v25 }
 0x21c   : > { %598 = vrsqrt.f32 %v422_v26 }
 0x226   : > { %v599_v27 = vpop.eup %598 }
 0x227   : > { %v424_v29 = vmul.f32 %v599_v27, %v416_v21 }
 0x229   : > { %v432_v31 = vmul.f32 %v545_v28, %v424_v29 }
 0x22b   : > { %v440_v32 = vadd.f32 %v546_v30, %v432_v31 }
 0x22d   : > { %441 = vst.msk [vmem:[%s308_s27] sm:$0xff] %vm313_vm0, %v440_v32 }
 0x22e PF: > { %s16_s23 = sadd.s32 1, %s622_s23   ;;  %s737_s21 = smov %s618_s22 }
 0x22f   : > { %p13_p5 = scmp.ge.s32.totalorder %s16_s23, 4   ;;  %s738_s22 = smov %s740_s24 }
 0x231   :  { %15 = sbr.rel (!%p13_p5) target bundleno = 2 (0x2), region = 88 }

// kernel: transformer_decoder_forward.20
= control target key start
LH: loop header
LB: loop body
LE: loop exit
PB: predicated region body
PF: predicated region fallthrough
CT: control target
= control target key end

     0   :  { %s569_s12 = smov 0   ;;  %s571_s13 = smov 0   ;;  %s621_s0 = inlined_call_operand.vmem [shape: f32[16,32], index: 0, kind: input, shape index: {}]   ;;  %s622_s1 = inlined_call_operand.vmem [shape: f32[32,32], index: 1, kind: input, shape index: {}]   ;;  %s623_s2 = inlined_call_operand.vmem [shape: f32[1,32], index: 2, kind: input, shape index: {}]   ;;  %s624_s3 = inlined_call_operand.vmem [shape: f32[16,32], index: 3, kind: output, shape index: {}]  }
   0x1   :  { %s573_s14 = smov 0  }
   0x2 LB: > { %s32_s15 = sadd.s32 1, %s540_s13  ;;  %p466_p0 = scmp.ge.s32.totalorder %s544_s14, 1  ;;  %s544_s14 = sphi %s573_s14, %s13_s14   ;;  %s540_s13 = sphi %s571_s13, %s626_s13   ;;  %s536_s12 = sphi %s569_s12, %s625_s12  }
   0x3   : > { %p34_p1 = scmp.ge.s32.totalorder %s32_s15, 2  ;;  %p186_p2 = scmp.lt.s32.totalorder %s544_s14, 3 }
   0x5   : > { %s628_s15 = smov (%p34_p1, %s32_s15), 0  ;;  %p187_p3 = pnand %p466_p0, %p186_p2 }
   0x6   : > { %v259_v0 = vld [vmem:[%s622_s1] sm:$0xff] (!%p187_p3)  ;;  %v260_v1 = vld [vmem:[%s622_s1 + $0x8] sm:$0xff] (!%p187_p3)  ;;  %v261_v2 = vld [vmem:[%s622_s1 + $0x10] sm:$0xff] (!%p187_p3)  ;;  %vm255_vm0 = vcmask (!%p187_p3), 261120   ;;  %v546_v3 = vmov (!%p187_p3), 0.0|0.0   ;;  %v547_v6 = vmov (!%p187_p3), 0.0  }
   0x7   : > { %190 = sbr.rel (%p187_p3) target bundleno = 243 (0xf3), region = 32  ;;  %489 = vmatprep.subr.bf16.mxu0 (!%p187_p3), %v546_v3  ;;  %v490_v4 = vpack.c.bf16 (!%p187_p3), %v260_v1, %v259_v0  ;;  %v262_v5 = vld [vmem:[%s622_s1 + $0x18] sm:$0xff] (!%p187_p3)  ;;  %256 = vst.msk [vmem:[#allocation2] sm:$0xff] (!%p187_p3), %vm255_vm0, %v547_v6  ;;  %p225_p4 = scmp.lt.s32.totalorder (!%p187_p3), %s536_s12, 1  ;;  %vm548_vm1 = vmmov (!%p187_p3), 0  }
   0x8   : > { %486 = vmatprep.mubr.msk.f32.mxu0 (!%p187_p3), %vm548_vm1, %v547_v6  ;;  %v493_v7 = vpack.c.bf16 (!%p187_p3), %v262_v5, %v261_v2  ;;  %v470_v13 = vld [vmem:[%s623_s2] ss:$0 sm:$0xff] (!%p187_p3) }
   0x9   : > { %491 = vmatpush3.bf16.msra.mxu0 (!%p187_p3), %v490_v4 }
   0xa   : > { %492 = vmatprep.subr.bf16.mxu0 (!%p187_p3), %v546_v3 }
   0xd   : > { %494 = vmatpush3.bf16.msra.mxu0 (!%p187_p3), %v493_v7 }
   0xe   : > { %s630_s12 = smov (!%p225_p4, %s536_s12), 1  ;;  %v257_v9 = vld [vmem:[#allocation2] sm:$0xff] }
   0xf   : > { %s467_s24 = sshll.u32 %s630_s12, 3 }
  0x10   : > { %s231_s27 = scalar_lea.vmem %s621_s0, %s467_s24  ;;  %s250_s5 = scalar_lea.vmem %s624_s3, %s467_s24 }
  0x11   : > { %v258_v8 = vld [vmem:[%s231_s27] sm:$0xff] }
  0x12   : > { %487 = vmatmul.mubr.msk.f32.vlgmr.msra.gmra.mrb[0].mxu0 %vm255_vm0, %v258_v8 }
  0xe5   : > { %v333_v10 = vpop.f32.mrb[0].mxu0 }
  0xe6   : > { %v337_v11 = vadd.f32 %v333_v10, %v257_v9  ;;  %v488_v12 = vpop.f32.mrb[1].mxu0 }
  0xe8   : > { %338 = vst.msk [vmem:[#allocation2] sm:$0xff] %vm255_vm0, %v337_v11 }
  0xef   : > { %v342_v14 = vld [vmem:[#allocation2] sm:$0xff] }
  0xf0   : > { %v350_v15 = vadd.f32 %v470_v13, %v342_v14 }
  0xf2   : > { %351 = vst.msk [vmem:[%s250_s5] sm:$0xff] %vm255_vm0, %v350_v15 }
  0xf3 PF: > { %s13_s14 = sadd.s32 1, %s544_s14   ;;  %s625_s12 = smov %s540_s13 }
  0xf4   : > { %p10_p5 = scmp.ge.s32.totalorder %s13_s14, 4   ;;  %s626_s13 = smov %s628_s15 }
  0xf6   :  { %12 = sbr.rel (!%p10_p5) target bundleno = 2 (0x2), region = 76 }

// kernel: transformer_decoder_forward.17
= control target key start
LH: loop header
LB: loop body
LE: loop exit
PB: predicated region body
PF: predicated region fallthrough
CT: control target
= control target key end

     0   :  { %s570_s12 = smov 0   ;;  %s572_s13 = smov 0   ;;  %s621_s0 = inlined_call_operand.vmem [shape: f32[16,32], index: 0, kind: input, shape index: {}]   ;;  %s622_s1 = inlined_call_operand.vmem [shape: f32[32,96], index: 1, kind: input, shape index: {}]   ;;  %s623_s2 = inlined_call_operand.vmem [shape: f32[1,96], index: 2, kind: input, shape index: {}]   ;;  %s624_s3 = inlined_call_operand.vmem [shape: f32[16,96], index: 3, kind: output, shape index: {}]  }
   0x1   :  { %s574_s14 = smov 0  }
   0x2 LB: > { %s32_s15 = sadd.s32 1, %s541_s13  ;;  %p467_p0 = scmp.ge.s32.totalorder %s545_s14, 1  ;;  %s545_s14 = sphi %s574_s14, %s13_s14   ;;  %s541_s13 = sphi %s572_s13, %s626_s13   ;;  %s537_s12 = sphi %s570_s12, %s625_s12  }
   0x3   : > { %p34_p1 = scmp.ge.s32.totalorder %s32_s15, 2  ;;  %p186_p2 = scmp.lt.s32.totalorder %s545_s14, 3 }
   0x5   : > { %s628_s15 = smov (%p34_p1, %s32_s15), 0  ;;  %p187_p3 = pnand %p467_p0, %p186_p2 }
   0x6   : > { %v259_v0 = vld [vmem:[%s622_s1] sm:$0xff] (!%p187_p3)  ;;  %v260_v1 = vld [vmem:[%s622_s1 + $0x8] sm:$0xff] (!%p187_p3)  ;;  %v261_v2 = vld [vmem:[%s622_s1 + $0x10] sm:$0xff] (!%p187_p3)  ;;  %vm255_vm0 = vcmask (!%p187_p3), 785408   ;;  %v547_v3 = vmov (!%p187_p3), 0.0|0.0   ;;  %v548_v6 = vmov (!%p187_p3), 0.0  }
   0x7   : > { %190 = sbr.rel (%p187_p3) target bundleno = 243 (0xf3), region = 32  ;;  %490 = vmatprep.subr.bf16.mxu0 (!%p187_p3), %v547_v3  ;;  %v491_v4 = vpack.c.bf16 (!%p187_p3), %v260_v1, %v259_v0  ;;  %v262_v5 = vld [vmem:[%s622_s1 + $0x18] sm:$0xff] (!%p187_p3)  ;;  %256 = vst.msk [vmem:[#allocation2] sm:$0xff] (!%p187_p3), %vm255_vm0, %v548_v6  ;;  %p225_p4 = scmp.lt.s32.totalorder (!%p187_p3), %s537_s12, 1  ;;  %vm549_vm1 = vmmov (!%p187_p3), 0   ;;  %vm263_vm2 = vcmask (!%p187_p3), 261120  }
   0x8   : > { %487 = vmatprep.mubr.msk.f32.mxu0 (!%p187_p3), %vm549_vm1, %v548_v6  ;;  %v494_v7 = vpack.c.bf16 (!%p187_p3), %v262_v5, %v261_v2  ;;  %v471_v13 = vld [vmem:[%s623_s2] ss:$0 sm:$0xff] (!%p187_p3) }
   0x9   : > { %492 = vmatpush3.bf16.msra.mxu0 (!%p187_p3), %v491_v4 }
   0xa   : > { %493 = vmatprep.subr.bf16.mxu0 (!%p187_p3), %v547_v3 }
   0xd   : > { %495 = vmatpush3.bf16.msra.mxu0 (!%p187_p3), %v494_v7 }
   0xe   : > { %s630_s12 = smov (!%p225_p4, %s537_s12), 1  ;;  %v257_v9 = vld [vmem:[#allocation2] sm:$0xff] }
   0xf   : > { %s468_s24 = sshll.u32 %s630_s12, 3 }
  0x10   : > { %s231_s27 = scalar_lea.vmem %s621_s0, %s468_s24  ;;  %s250_s5 = scalar_lea.vmem %s624_s3, %s468_s24 }
  0x11   : > { %v258_v8 = vld [vmem:[%s231_s27] sm:$0xff] }
  0x12   : > { %488 = vmatmul.mubr.msk.f32.vlgmr.msra.gmra.mrb[0].mxu0 %vm263_vm2, %v258_v8 }
  0xe5   : > { %v333_v10 = vpop.f32.mrb[0].mxu0 }
  0xe6   : > { %v337_v11 = vadd.f32 %v333_v10, %v257_v9  ;;  %v489_v12 = vpop.f32.mrb[1].mxu0 }
  0xe8   : > { %339 = vst.msk [vmem:[#allocation2] sm:$0xff] %vm255_vm0, %v337_v11 }
  0xef   : > { %v343_v14 = vld [vmem:[#allocation2] sm:$0xff] }
  0xf0   : > { %v351_v15 = vadd.f32 %v471_v13, %v343_v14 }
  0xf2   : > { %352 = vst.msk [vmem:[%s250_s5] sm:$0xff] %vm255_vm0, %v351_v15 }
  0xf3 PF: > { %s13_s14 = sadd.s32 1, %s545_s14   ;;  %s625_s12 = smov %s541_s13 }
  0xf4   : > { %p10_p5 = scmp.ge.s32.totalorder %s13_s14, 4   ;;  %s626_s13 = smov %s628_s15 }
  0xf6   :  { %12 = sbr.rel (!%p10_p5) target bundleno = 2 (0x2), region = 76 }

// kernel: transformer_decoder_forward.18
= control target key start
LH: loop header
LB: loop body
LE: loop exit
PB: predicated region body
PF: predicated region fallthrough
CT: control target
= control target key end

     0   :  { %s1038_s9 = smov 0   ;;  %s1127_s0 = inlined_call_operand.vmem [shape: f32[2,8,96], index: 0, kind: input, shape index: {}]   ;;  %s1128_s1 = inlined_call_operand.vmem [shape: f32[8,8], index: 1, kind: input, shape index: {}]   ;;  %s1129_s2 = inlined_call_operand.vmem [shape: f32[2,8,32], index: 2, kind: output, shape index: {}]  }
   0x1 LB: > { %s882_s10 = sadd.s32 4294967295, %s1005_s9   ;;  %p886_p0 = scmp.ge.s32.totalorder %s1005_s9, 1  ;;  %s1005_s9 = sphi %s1038_s9, %s12_s9  }
   0x2   : > { %p111_p1 = scmp.lt.s32.totalorder %s1005_s9, 3 }
   0x4   : > { %p112_p2 = pnand %p886_p0, %p111_p1 }
   0x5   : > { %p131_p3 = scmp.lt.s32.totalorder (!%p112_p2), %s882_s10, 1  ;;  %v1007_v0 = vmov (!%p112_p2), 0.0   ;;  %vm1008_vm0 = vmmov (!%p112_p2), 0   ;;  %s1009_s15 = smov (!%p112_p2), 96   ;;  %vm145_vm1 = vcmask (!%p112_p2), 64512   ;;  %v140_v3 = vld [vmem:[%s1128_s1] sm:$0xff] (!%p112_p2) }
   0x6   : > { %115 = sbr.rel (%p112_p2) target bundleno = 1536 (0x600), region = 28  ;;  %919 = vmatprep.subr.mxu0 (!%p112_p2), %v1007_v0  ;;  %921 = vmatprep.mubr.msk.f32.mxu0 (!%p112_p2), %vm1008_vm0, %v1007_v0  ;;  %s1010_s16 = smov (!%p112_p2), 64   ;;  %v141_v4 = vmax.f32 (!%p112_p2), %v140_v3, -1e+30  ;;  %vm823_vm2 = vcmask (!%p112_p2), 130048   ;;  %vm825_vm3 = vcmask (!%p112_p2), 195584  }
   0x7   : > { %924 = vmatprep.subr.mxu1 (!%p112_p2), %v1007_v0  ;;  %926 = vmatprep.mubr.msk.f32.mxu1 (!%p112_p2), %vm1008_vm0, %v1007_v0  ;;  %s1011_s17 = smov (!%p112_p2), 88   ;;  %s1012_s18 = smov (!%p112_p2), 120   ;;  %vm827_vm4 = vcmask (!%p112_p2), 261120  }
   0x8   : > { %s1013_s19 = smov (!%p112_p2), 80   ;;  %s1014_s22 = smov (!%p112_p2), 72  }
   0x9   : > { %s1015_s23 = smov (!%p112_p2), 112   ;;  %s1016_s24 = smov (!%p112_p2), 104  }
   0xa   : > { %s1017_s25 = smov (!%p112_p2), 56   ;;  %s1018_s26 = smov (!%p112_p2), 40  }
   0xb   : > { %s1019_s27 = smov (!%p112_p2), 48   ;;  %s1020_s28 = smov (!%p112_p2), 8  }
   0xc   : > { %s1021_s29 = smov (!%p112_p2), 16   ;;  %s1022_s30 = smov (!%p112_p2), 24  }
   0xd   : > { %s1131_s10 = smov (!%p131_p3, %s882_s10), 1 }
   0xe   : > { %s887_s11 = sshll.u32 %s1131_s10, 3 }
   0xf   : > { %s134_s14 = scalar_lea.vmem %s1127_s0, %s887_s11  ;;  %s138_s5 = scalar_lea.vmem %s1129_s2, %s887_s11 }
  0x10   : > { %v1060_v1 = vld [vmem:[%s134_s14] sm:$0xff] }
  0x11   : > { %143 = vrot.lane.b32.xlu0 %v1060_v1, %s1009_s15  ;;  %233 = vrot.lane.b32.xlu1 %v1060_v1, %s1010_s16 }
  0x15   : > { %311 = vrot.lane.b32.xlu1 %v1060_v1, %s1011_s17 }
  0x19   : > { %309 = vrot.lane.b32.xlu1 %v1060_v1, %s1012_s18 }
  0x1d   : > { %478 = vrot.lane.b32.xlu1 %v1060_v1, %s1013_s19 }
  0x83   : > { %v144_v2 = vpop.permute.xlu0 %143  ;;  %v234_v10 = vpop.permute.xlu1 %233 }
  0x84   : > { %920 = vmatpush3.xpose.msk.msra.mxu0 %vm145_vm1, %v144_v2  ;;  %925 = vmatpush3.msra.mxu1 %v234_v10 }
  0x85   : > { %934 = vmatprep.subr.mxu0 %v1007_v0  ;;  %929 = vmatprep.subr.mxu1 %v1007_v0 }
  0x87   : > { %922 = vmatmul.mubr.msk.f32.vlgmr.msra.gmra.mrb[0].mxu0 %vm145_vm1, %v1060_v1  ;;  %v312_v16 = vpop.permute.xlu1 %311 }
  0x88   : > { %936 = vmatprep.mubr.msk.f32.mxu0 %vm1008_vm0, %v1007_v0 }
  0x8b   : > { %v310_v17 = vpop.permute.xlu1 %309 }
  0x8f   : > { %v479_v18 = vpop.permute.xlu1 %478 }
 0x15a   : > { %v216_v5 = vpop.f32.mrb[0].mxu0 }
 0x15b   : > { %v220_v6 = vmul.f32 0.35355338, %v216_v5  ;;  %v923_v7 = vpop.f32.mrb[1].mxu0 }
 0x15d   : > { %v221_v8 = vadd.f32 %v220_v6, %v141_v4 }
 0x15f   : > { %v222_v9 = vsel %vm145_vm1, %v221_v8, -inf }
 0x160   : > { %223 = vmax.xlane.f32.xlu0 %v222_v9 }
 0x176   : > { %645 = vrot.lane.b32.xlu0 %v1060_v1, %s1014_s22 }
 0x1ed   : > { %v224_v11 = vpop.xlane.xlu0 %223 }
 0x1ee   : > { %v225_v12 = vsub.f32 %v221_v8, %v224_v11 }
 0x1f0   : > { %v226_v13 = vmul.f32 1.442695, %v225_v12 }
 0x1f1   : > { %v646_v23 = vpop.permute.xlu0 %645 }
 0x1f2   : > { %983 = vpow2.f32 %v226_v13 }
 0x1fc   : > { %v984_v14 = vpop.eup %983 }
 0x1fd   : > { %v228_v15 = vsel %vm145_vm1, %v984_v14, 0.0 }
 0x1fe   : > { %229 = vadd.xlane.f32.xlu1 %v228_v15 }
 0x20f   : > { %476 = vrot.lane.b32.xlu1 %v1060_v1, %s1015_s23 }
 0x213   : > { %643 = vrot.lane.b32.xlu1 %v1060_v1, %s1016_s24 }
 0x28b   : > { %v230_v19 = vpop.xlane.xlu1 %229 }
 0x28c   : > { %985 = vrcp.f32 %v230_v19 }
 0x28f   : > { %v477_v22 = vpop.permute.xlu1 %476 }
 0x293   : > { %v644_v24 = vpop.permute.xlu1 %643 }
 0x296   : > { %v986_v20 = vpop.eup %985 }
 0x297   : > { %v232_v21 = vmul.f32 %v986_v20, %v984_v14 }
 0x299   : > { %927 = vmatmul.mubr.msk.f32.vlgmr.msra.gmra.mrb[0].mxu1 %vm145_vm1, %v232_v21 }
 0x29a   : > { %930 = vmatpush3.xpose.msk.msra.mxu1 %vm145_vm1, %v312_v16  ;;  %931 = vmatprep.mubr.msk.f32.mxu1 %vm1008_vm0, %v1007_v0 }
 0x29b   : > { %939 = vmatprep.subr.mxu1 %v1007_v0 }
 0x29d   : > { %932 = vmatmul.mubr.msk.f32.vlgmr.msra.gmra.mrb[2].mxu1 %vm145_vm1, %v310_v17 }
 0x29e   : > { %940 = vmatpush3.xpose.msk.msra.mxu1 %vm145_vm1, %v479_v18  ;;  %941 = vmatprep.mubr.msk.f32.mxu1 %vm1008_vm0, %v1007_v0 }
 0x29f   : > { %949 = vmatprep.subr.mxu1 %v1007_v0 }
 0x2a1   : > { %942 = vmatmul.mubr.msk.f32.vlgmr.msra.gmra.mrb[4].mxu1 %vm145_vm1, %v477_v22 }
 0x2a2   : > { %950 = vmatpush3.xpose.msk.msra.mxu1 %vm145_vm1, %v646_v23  ;;  %951 = vmatprep.mubr.msk.f32.mxu1 %vm1008_vm0, %v1007_v0 }
 0x2a5   : > { %952 = vmatmul.mubr.msk.f32.vlgmr.msra.gmra.mrb[6].mxu1 %vm145_vm1, %v644_v24 }
 0x36c   : > { %v1097_v25 = vpop.f32.mrb[0].mxu1 }
 0x36d   : > { %v928_v26 = vpop.f32.mrb[1].mxu1 }
 0x370   : > { %v383_v27 = vpop.f32.mrb[2].mxu1 }
 0x371   : > { %v387_v28 = vmul.f32 0.35355338, %v383_v27  ;;  %v933_v29 = vpop.f32.mrb[3].mxu1 }
 0x373   : > { %v388_v30 = vadd.f32 %v387_v28, %v141_v4 }
 0x374   : > { %v550_v31 = vpop.f32.mrb[4].mxu1 }
 0x375   : > { %v554_v32 = vmul.f32 0.35355338, %v550_v31  ;;  %v943_v33 = vpop.f32.mrb[5].mxu1  ;;  %v389_v34 = vsel %vm145_vm1, %v388_v30, -inf }
 0x376   : > { %390 = vmax.xlane.f32.xlu1 %v389_v34 }
 0x377   : > { %v555_v35 = vadd.f32 %v554_v32, %v141_v4 }
 0x378   : > { %v717_v36 = vpop.f32.mrb[6].mxu1 }
 0x379   : > { %v721_v37 = vmul.f32 0.35355338, %v717_v36  ;;  %v953_v38 = vpop.f32.mrb[7].mxu1  ;;  %v556_v39 = vsel %vm145_vm1, %v555_v35, -inf }
 0x37a   : > { %557 = vmax.xlane.f32.xlu0 %v556_v39 }
 0x37b   : > { %v722_v40 = vadd.f32 %v721_v37, %v141_v4 }
 0x37d   : > { %v723_v41 = vsel %vm145_vm1, %v722_v40, -inf }
 0x37e   : > { %724 = vmax.xlane.f32.xlu1 %v723_v41 }
 0x38f   : > { %400 = vrot.lane.b32.xlu1 %v1060_v1, %s1017_s25 }
 0x403   : > { %v391_v42 = vpop.xlane.xlu1 %390 }
 0x404   : > { %v392_v43 = vsub.f32 %v388_v30, %v391_v42 }
 0x406   : > { %v393_v44 = vmul.f32 1.442695, %v392_v43 }
 0x407   : > { %v558_v45 = vpop.xlane.xlu0 %557 }
 0x408   : > { %987 = vpow2.f32 %v393_v44  ;;  %v559_v46 = vsub.f32 %v555_v35, %v558_v45 }
 0x40a   : > { %v560_v47 = vmul.f32 1.442695, %v559_v46 }
 0x40b   : > { %v725_v48 = vpop.xlane.xlu1 %724 }
 0x40c   : > { %989 = vpow2.f32 %v560_v47  ;;  %v726_v49 = vsub.f32 %v722_v40, %v725_v48 }
 0x40e   : > { %v727_v50 = vmul.f32 1.442695, %v726_v49 }
 0x40f   : > { %v401_v51 = vpop.permute.xlu1 %400 }
 0x410   : > { %991 = vpow2.f32 %v727_v50  ;;  %935 = vmatpush3.msra.mxu0 %v401_v51 }
 0x411   : > { %944 = vmatprep.subr.mxu0 %v1007_v0 }
 0x412   : > { %v988_v52 = vpop.eup %987 }
 0x413   : > { %v395_v53 = vsel %vm145_vm1, %v988_v52, 0.0 }
 0x414   : > { %396 = vadd.xlane.f32.xlu1 %v395_v53 }
 0x416   : > { %v990_v54 = vpop.eup %989 }
 0x417   : > { %v562_v55 = vsel %vm145_vm1, %v990_v54, 0.0 }
 0x418   : > { %563 = vadd.xlane.f32.xlu1 %v562_v55 }
 0x41a   : > { %v992_v56 = vpop.eup %991 }
 0x41b   : > { %v729_v57 = vsel %vm145_vm1, %v992_v56, 0.0 }
 0x41c   : > { %730 = vadd.xlane.f32.xlu0 %v729_v57 }
 0x429   : > { %734 = vrot.lane.b32.xlu1 %v1060_v1, %s1018_s26 }
 0x432   : > { %567 = vrot.lane.b32.xlu0 %v1060_v1, %s1019_s27 }
 0x4a1   : > { %v397_v58 = vpop.xlane.xlu1 %396 }
 0x4a2   : > { %993 = vrcp.f32 %v397_v58 }
 0x4a5   : > { %v564_v59 = vpop.xlane.xlu1 %563 }
 0x4a6   : > { %995 = vrcp.f32 %v564_v59 }
 0x4a9   : > { %v731_v60 = vpop.xlane.xlu0 %730  ;;  %v735_v4 = vpop.permute.xlu1 %734 }
 0x4aa   : > { %997 = vrcp.f32 %v731_v60 }
 0x4ac   : > { %v994_v61 = vpop.eup %993 }
 0x4ad   : > { %v399_v62 = vmul.f32 %v994_v61, %v988_v52  ;;  %v568_v63 = vpop.permute.xlu0 %567 }
 0x4af   : > { %937 = vmatmul.mubr.msk.f32.vlgmr.msra.gmra.mrb[2].mxu0 %vm145_vm1, %v399_v62 }
 0x4b0   : > { %v996_v2 = vpop.eup %995  ;;  %945 = vmatpush3.msra.mxu0 %v568_v63  ;;  %946 = vmatprep.mubr.msk.f32.mxu0 %vm1008_vm0, %v1007_v0 }
 0x4b1   : > { %v566_v3 = vmul.f32 %v996_v2, %v990_v54  ;;  %954 = vmatprep.subr.mxu0 %v1007_v0 }
 0x4b3   : > { %947 = vmatmul.mubr.msk.f32.vlgmr.msra.gmra.mrb[4].mxu0 %vm145_vm1, %v566_v3 }
 0x4b4   : > { %v998_v1 = vpop.eup %997  ;;  %955 = vmatpush3.msra.mxu0 %v735_v4  ;;  %956 = vmatprep.mubr.msk.f32.mxu0 %vm1008_vm0, %v1007_v0 }
 0x4b5   : > { %v733_v5 = vmul.f32 %v998_v1, %v992_v56 }
 0x4b7   : > { %957 = vmatmul.mubr.msk.f32.vlgmr.msra.gmra.mrb[6].mxu0 %vm145_vm1, %v733_v5 }
 0x582   : > { %v472_v6 = vpop.f32.mrb[2].mxu0 }
 0x583   : > { %811 = vrot.lane.b32.xlu1 %v472_v6, %s1020_s28  ;;  %v938_v7 = vpop.f32.mrb[3].mxu0 }
 0x586   : > { %v639_v8 = vpop.f32.mrb[4].mxu0 }
 0x587   : > { %815 = vrot.lane.b32.xlu0 %v639_v8, %s1021_s29  ;;  %v948_v9 = vpop.f32.mrb[5].mxu0 }
 0x58a   : > { %v806_v10 = vpop.f32.mrb[6].mxu0 }
 0x58b   : > { %819 = vrot.lane.b32.xlu1 %v806_v10, %s1022_s30  ;;  %v958_v11 = vpop.f32.mrb[7].mxu0 }
 0x5f5   : > { %v812_v12 = vpop.permute.xlu1 %811 }
 0x5f6   : > { %v822_v0 = vsel %vm145_vm1, %v1097_v25, %v812_v12 }
 0x5f9   : > { %v816_v13 = vpop.permute.xlu0 %815 }
 0x5fa   : > { %v824_v14 = vsel %vm823_vm2, %v822_v0, %v816_v13 }
 0x5fd   : > { %v820_v15 = vpop.permute.xlu1 %819 }
 0x5fe   : > { %v826_v16 = vsel %vm825_vm3, %v824_v14, %v820_v15 }
 0x5ff   : > { %828 = vst.msk [vmem:[%s138_s5] sm:$0xff] %vm827_vm4, %v826_v16 }
 0x600 PF: > { %s12_s9 = sadd.s32 1, %s1005_s9  }
 0x601   : > { %p9_p4 = scmp.ge.s32.totalorder %s12_s9, 4  }
 0x603   :  { %11 = sbr.rel (!%p9_p4) target bundleno = 1 (0x1), region = 58 }

// kernel: transformer_decoder_forward.21
= control target key start
LH: loop header
LB: loop body
LE: loop exit
PB: predicated region body
PF: predicated region fallthrough
CT: control target
= control target key end

     0   :  { %s570_s12 = smov 0   ;;  %s572_s13 = smov 0   ;;  %s621_s0 = inlined_call_operand.vmem [shape: f32[16,32], index: 0, kind: input, shape index: {}]   ;;  %s622_s1 = inlined_call_operand.vmem [shape: f32[32,64], index: 1, kind: input, shape index: {}]   ;;  %s623_s2 = inlined_call_operand.vmem [shape: f32[1,64], index: 2, kind: input, shape index: {}]   ;;  %s624_s3 = inlined_call_operand.vmem [shape: f32[16,64], index: 3, kind: output, shape index: {}]  }
   0x1   :  { %s574_s14 = smov 0  }
   0x2 LB: > { %s32_s15 = sadd.s32 1, %s541_s13  ;;  %p467_p0 = scmp.ge.s32.totalorder %s545_s14, 1  ;;  %s545_s14 = sphi %s574_s14, %s13_s14   ;;  %s541_s13 = sphi %s572_s13, %s626_s13   ;;  %s537_s12 = sphi %s570_s12, %s625_s12  }
   0x3   : > { %p34_p1 = scmp.ge.s32.totalorder %s32_s15, 2  ;;  %p186_p2 = scmp.lt.s32.totalorder %s545_s14, 3 }
   0x5   : > { %s628_s15 = smov (%p34_p1, %s32_s15), 0  ;;  %p187_p3 = pnand %p467_p0, %p186_p2 }
   0x6   : > { %v259_v0 = vld [vmem:[%s622_s1] sm:$0xff] (!%p187_p3)  ;;  %v260_v1 = vld [vmem:[%s622_s1 + $0x8] sm:$0xff] (!%p187_p3)  ;;  %v261_v2 = vld [vmem:[%s622_s1 + $0x10] sm:$0xff] (!%p187_p3)  ;;  %vm255_vm0 = vcmask (!%p187_p3), 523264   ;;  %v547_v3 = vmov (!%p187_p3), 0.0|0.0   ;;  %v548_v6 = vmov (!%p187_p3), 0.0  }
   0x7   : > { %190 = sbr.rel (%p187_p3) target bundleno = 243 (0xf3), region = 32  ;;  %490 = vmatprep.subr.bf16.mxu0 (!%p187_p3), %v547_v3  ;;  %v491_v4 = vpack.c.bf16 (!%p187_p3), %v260_v1, %v259_v0  ;;  %v262_v5 = vld [vmem:[%s622_s1 + $0x18] sm:$0xff] (!%p187_p3)  ;;  %256 = vst.msk [vmem:[#allocation2] sm:$0xff] (!%p187_p3), %vm255_vm0, %v548_v6  ;;  %p225_p4 = scmp.lt.s32.totalorder (!%p187_p3), %s537_s12, 1  ;;  %vm549_vm1 = vmmov (!%p187_p3), 0   ;;  %vm263_vm2 = vcmask (!%p187_p3), 261120  }
   0x8   : > { %487 = vmatprep.mubr.msk.f32.mxu0 (!%p187_p3), %vm549_vm1, %v548_v6  ;;  %v494_v7 = vpack.c.bf16 (!%p187_p3), %v262_v5, %v261_v2  ;;  %v471_v13 = vld [vmem:[%s623_s2] ss:$0 sm:$0xff] (!%p187_p3) }
   0x9   : > { %492 = vmatpush3.bf16.msra.mxu0 (!%p187_p3), %v491_v4 }
   0xa   : > { %493 = vmatprep.subr.bf16.mxu0 (!%p187_p3), %v547_v3 }
   0xd   : > { %495 = vmatpush3.bf16.msra.mxu0 (!%p187_p3), %v494_v7 }
   0xe   : > { %s630_s12 = smov (!%p225_p4, %s537_s12), 1  ;;  %v257_v9 = vld [vmem:[#allocation2] sm:$0xff] }
   0xf   : > { %s468_s24 = sshll.u32 %s630_s12, 3 }
  0x10   : > { %s231_s27 = scalar_lea.vmem %s621_s0, %s468_s24  ;;  %s250_s5 = scalar_lea.vmem %s624_s3, %s468_s24 }
  0x11   : > { %v258_v8 = vld [vmem:[%s231_s27] sm:$0xff] }
  0x12   : > { %488 = vmatmul.mubr.msk.f32.vlgmr.msra.gmra.mrb[0].mxu0 %vm263_vm2, %v258_v8 }
  0xe5   : > { %v333_v10 = vpop.f32.mrb[0].mxu0 }
  0xe6   : > { %v337_v11 = vadd.f32 %v333_v10, %v257_v9  ;;  %v489_v12 = vpop.f32.mrb[1].mxu0 }
  0xe8   : > { %339 = vst.msk [vmem:[#allocation2] sm:$0xff] %vm255_vm0, %v337_v11 }
  0xef   : > { %v343_v14 = vld [vmem:[#allocation2] sm:$0xff] }
  0xf0   : > { %v351_v15 = vadd.f32 %v471_v13, %v343_v14 }
  0xf2   : > { %352 = vst.msk [vmem:[%s250_s5] sm:$0xff] %vm255_vm0, %v351_v15 }
  0xf3 PF: > { %s13_s14 = sadd.s32 1, %s545_s14   ;;  %s625_s12 = smov %s541_s13 }
  0xf4   : > { %p10_p5 = scmp.ge.s32.totalorder %s13_s14, 4   ;;  %s626_s13 = smov %s628_s15 }
  0xf6   :  { %12 = sbr.rel (!%p10_p5) target bundleno = 2 (0x2), region = 76 }

// kernel: transformer_decoder_forward.22
= control target key start
LH: loop header
LB: loop body
LE: loop exit
PB: predicated region body
PF: predicated region fallthrough
CT: control target
= control target key end

     0   :  { %s1054_s9 = smov 0   ;;  %s1137_s0 = inlined_call_operand.vmem [shape: f32[2,8,32], index: 0, kind: input, shape index: {}]   ;;  %s1138_s1 = inlined_call_operand.vmem [shape: f32[2,8,64], index: 1, kind: input, shape index: {}]   ;;  %s1139_s2 = inlined_call_operand.vmem [shape: f32[2,8,32], index: 2, kind: output, shape index: {}]  }
   0x1 LB: > { %s905_s10 = sadd.s32 4294967295, %s1025_s9   ;;  %p909_p0 = scmp.ge.s32.totalorder %s1025_s9, 1  ;;  %s1025_s9 = sphi %s1054_s9, %s12_s9  }
   0x2   : > { %p120_p1 = scmp.lt.s32.totalorder %s1025_s9, 3 }
   0x4   : > { %p121_p2 = pnand %p909_p0, %p120_p1 }
   0x5   : > { %p144_p3 = scmp.lt.s32.totalorder (!%p121_p2), %s905_s10, 1  ;;  %v1027_v0 = vmov (!%p121_p2), 0.0   ;;  %vm1028_vm0 = vmmov (!%p121_p2), 0   ;;  %vm158_vm1 = vcmask (!%p121_p2), 64512   ;;  %s1029_s18 = smov (!%p121_p2), 96   ;;  %vm834_vm2 = vcmask (!%p121_p2), 130048  }
   0x6   : > { %124 = sbr.rel (%p121_p2) target bundleno = 1417 (0x589), region = 28  ;;  %943 = vmatprep.subr.mxu0 (!%p121_p2), %v1027_v0  ;;  %945 = vmatprep.mubr.msk.f32.mxu0 (!%p121_p2), %vm1028_vm0, %v1027_v0  ;;  %s1030_s19 = smov (!%p121_p2), 120   ;;  %vm836_vm3 = vcmask (!%p121_p2), 195584   ;;  %vm838_vm4 = vcmask (!%p121_p2), 261120  }
   0x7   : > { %948 = vmatprep.subr.mxu1 (!%p121_p2), %v1027_v0  ;;  %950 = vmatprep.mubr.msk.f32.mxu1 (!%p121_p2), %vm1028_vm0, %v1027_v0  ;;  %s1031_s20 = smov (!%p121_p2), 112   ;;  %s1032_s21 = smov (!%p121_p2), 104  }
   0x8   : > { %s1033_s22 = smov (!%p121_p2), 88   ;;  %s1034_s23 = smov (!%p121_p2), 72  }
   0x9   : > { %s1035_s24 = smov (!%p121_p2), 80   ;;  %s1036_s25 = smov (!%p121_p2), 8  }
   0xa   : > { %s1037_s26 = smov (!%p121_p2), 16   ;;  %s1038_s27 = smov (!%p121_p2), 24  }
   0xd   : > { %s1141_s10 = smov (!%p144_p3, %s905_s10), 1 }
   0xe   : > { %s1068_s11 = sshll.u32 %s1141_s10, 3 }
   0xf   : > { %s151_s14 = scalar_lea.vmem %s1138_s1, %s1068_s11  ;;  %s147_s17 = scalar_lea.vmem %s1137_s0, %s1068_s11 }
  0x10   : > { %v1078_v1 = vld [vmem:[%s151_s14] sm:$0xff]  ;;  %s155_s30 = scalar_lea.vmem %s1139_s2, %s1068_s11 }
  0x11   : > { %944 = vmatpush3.xpose.msk.msra.mxu0 %vm158_vm1, %v1078_v1  ;;  %v157_v2 = vld [vmem:[%s147_s17] sm:$0xff]  ;;  %247 = vrot.lane.b32.xlu1 %v1078_v1, %s1029_s18 }
  0x12   : > { %958 = vmatprep.subr.mxu0 %v1027_v0 }
  0x14   : > { %946 = vmatmul.mubr.msk.f32.vlgmr.msra.gmra.mrb[0].mxu0 %vm158_vm1, %v157_v2 }
  0x15   : > { %960 = vmatprep.mubr.msk.f32.mxu0 %vm1028_vm0, %v1027_v0  ;;  %325 = vrot.lane.b32.xlu1 %v1078_v1, %s1030_s19 }
  0x19   : > { %491 = vrot.lane.b32.xlu1 %v1078_v1, %s1031_s20 }
  0x1d   : > { %489 = vrot.lane.b32.xlu1 %v157_v2, %s1031_s20 }
  0x21   : > { %657 = vrot.lane.b32.xlu1 %v1078_v1, %s1032_s21 }
  0x25   : > { %655 = vrot.lane.b32.xlu1 %v157_v2, %s1032_s21 }
  0x83   : > { %v248_v12 = vpop.permute.xlu1 %247 }
  0x84   : > { %949 = vmatpush3.msra.mxu1 %v248_v12 }
  0x85   : > { %953 = vmatprep.subr.mxu1 %v1027_v0 }
  0x87   : > { %v326_v13 = vpop.permute.xlu1 %325 }
  0x8b   : > { %v492_v15 = vpop.permute.xlu1 %491 }
  0x8f   : > { %v490_v17 = vpop.permute.xlu1 %489 }
  0x93   : > { %v658_v20 = vpop.permute.xlu1 %657 }
  0x97   : > { %v656_v21 = vpop.permute.xlu1 %655 }
  0xe7   : > { %v231_v3 = vpop.f32.mrb[0].mxu0 }
  0xe8   : > { %v235_v4 = vmul.f32 0.35355338, %v231_v3  ;;  %v947_v5 = vpop.f32.mrb[1].mxu0 }
  0xea   : > { %v236_v6 = vsel %vm158_vm1, %v235_v4, -inf }
  0xeb   : > { %237 = vmax.xlane.f32.xlu0 %v236_v6 }
 0x178   : > { %v238_v7 = vpop.xlane.xlu0 %237 }
 0x179   : > { %v239_v8 = vsub.f32 %v235_v4, %v238_v7 }
 0x17b   : > { %v240_v9 = vmul.f32 1.442695, %v239_v8 }
 0x17d   : > { %1003 = vpow2.f32 %v240_v9 }
 0x187   : > { %v1004_v10 = vpop.eup %1003 }
 0x188   : > { %v242_v11 = vsel %vm158_vm1, %v1004_v10, 0.0 }
 0x189   : > { %243 = vadd.xlane.f32.xlu0 %v242_v11 }
 0x19f   : > { %323 = vrot.lane.b32.xlu0 %v157_v2, %s1030_s19 }
 0x216   : > { %v244_v14 = vpop.xlane.xlu0 %243 }
 0x217   : > { %1005 = vrcp.f32 %v244_v14 }
 0x21a   : > { %v324_v19 = vpop.permute.xlu0 %323 }
 0x221   : > { %v1006_v16 = vpop.eup %1005 }
 0x222   : > { %v246_v18 = vmul.f32 %v1006_v16, %v1004_v10 }
 0x224   : > { %951 = vmatmul.mubr.msk.f32.vlgmr.msra.gmra.mrb[0].mxu1 %vm158_vm1, %v246_v18 }
 0x225   : > { %954 = vmatpush3.xpose.msk.msra.mxu1 %vm158_vm1, %v326_v13  ;;  %955 = vmatprep.mubr.msk.f32.mxu1 %vm1028_vm0, %v1027_v0 }
 0x226   : > { %963 = vmatprep.subr.mxu1 %v1027_v0 }
 0x228   : > { %956 = vmatmul.mubr.msk.f32.vlgmr.msra.gmra.mrb[2].mxu1 %vm158_vm1, %v324_v19 }
 0x229   : > { %964 = vmatpush3.xpose.msk.msra.mxu1 %vm158_vm1, %v492_v15  ;;  %965 = vmatprep.mubr.msk.f32.mxu1 %vm1028_vm0, %v1027_v0 }
 0x22a   : > { %973 = vmatprep.subr.mxu1 %v1027_v0 }
 0x22c   : > { %966 = vmatmul.mubr.msk.f32.vlgmr.msra.gmra.mrb[4].mxu1 %vm158_vm1, %v490_v17 }
 0x22d   : > { %974 = vmatpush3.xpose.msk.msra.mxu1 %vm158_vm1, %v658_v20  ;;  %975 = vmatprep.mubr.msk.f32.mxu1 %vm1028_vm0, %v1027_v0 }
 0x230   : > { %976 = vmatmul.mubr.msk.f32.vlgmr.msra.gmra.mrb[6].mxu1 %vm158_vm1, %v656_v21 }
 0x2f7   : > { %v1108_v22 = vpop.f32.mrb[0].mxu1 }
 0x2f8   : > { %v952_v23 = vpop.f32.mrb[1].mxu1 }
 0x2fb   : > { %v397_v24 = vpop.f32.mrb[2].mxu1 }
 0x2fc   : > { %v401_v25 = vmul.f32 0.35355338, %v397_v24  ;;  %v957_v26 = vpop.f32.mrb[3].mxu1 }
 0x2fe   : > { %v402_v27 = vsel %vm158_vm1, %v401_v25, -inf }
 0x2ff   : > { %403 = vmax.xlane.f32.xlu1 %v402_v27  ;;  %v563_v28 = vpop.f32.mrb[4].mxu1 }
 0x300   : > { %v567_v29 = vmul.f32 0.35355338, %v563_v28  ;;  %v967_v30 = vpop.f32.mrb[5].mxu1 }
 0x302   : > { %v568_v31 = vsel %vm158_vm1, %v567_v29, -inf }
 0x303   : > { %569 = vmax.xlane.f32.xlu0 %v568_v31  ;;  %v729_v32 = vpop.f32.mrb[6].mxu1 }
 0x304   : > { %v733_v33 = vmul.f32 0.35355338, %v729_v32  ;;  %v977_v34 = vpop.f32.mrb[7].mxu1 }
 0x306   : > { %v734_v35 = vsel %vm158_vm1, %v733_v33, -inf }
 0x307   : > { %735 = vmax.xlane.f32.xlu1 %v734_v35 }
 0x318   : > { %413 = vrot.lane.b32.xlu1 %v1078_v1, %s1033_s22 }
 0x38c   : > { %v404_v36 = vpop.xlane.xlu1 %403 }
 0x38d   : > { %v405_v37 = vsub.f32 %v401_v25, %v404_v36 }
 0x38f   : > { %v406_v38 = vmul.f32 1.442695, %v405_v37 }
 0x390   : > { %v570_v39 = vpop.xlane.xlu0 %569 }
 0x391   : > { %1007 = vpow2.f32 %v406_v38  ;;  %v571_v40 = vsub.f32 %v567_v29, %v570_v39 }
 0x393   : > { %v572_v41 = vmul.f32 1.442695, %v571_v40 }
 0x394   : > { %v736_v42 = vpop.xlane.xlu1 %735 }
 0x395   : > { %1009 = vpow2.f32 %v572_v41  ;;  %v737_v43 = vsub.f32 %v733_v33, %v736_v42 }
 0x397   : > { %v738_v44 = vmul.f32 1.442695, %v737_v43 }
 0x398   : > { %v414_v45 = vpop.permute.xlu1 %413 }
 0x399   : > { %1011 = vpow2.f32 %v738_v44  ;;  %959 = vmatpush3.msra.mxu0 %v414_v45 }
 0x39a   : > { %968 = vmatprep.subr.mxu0 %v1027_v0 }
 0x39b   : > { %v1008_v46 = vpop.eup %1007 }
 0x39c   : > { %v408_v47 = vsel %vm158_vm1, %v1008_v46, 0.0 }
 0x39d   : > { %409 = vadd.xlane.f32.xlu0 %v408_v47 }
 0x39f   : > { %v1010_v48 = vpop.eup %1009 }
 0x3a0   : > { %v574_v49 = vsel %vm158_vm1, %v1010_v48, 0.0 }
 0x3a1   : > { %575 = vadd.xlane.f32.xlu1 %v574_v49 }
 0x3a3   : > { %v1012_v50 = vpop.eup %1011 }
 0x3a4   : > { %v740_v51 = vsel %vm158_vm1, %v1012_v50, 0.0 }
 0x3a5   : > { %741 = vadd.xlane.f32.xlu0 %v740_v51 }
 0x3b2   : > { %745 = vrot.lane.b32.xlu1 %v1078_v1, %s1034_s23 }
 0x3bb   : > { %579 = vrot.lane.b32.xlu0 %v1078_v1, %s1035_s24 }
 0x42a   : > { %v410_v52 = vpop.xlane.xlu0 %409 }
 0x42b   : > { %1013 = vrcp.f32 %v410_v52 }
 0x42e   : > { %v576_v53 = vpop.xlane.xlu1 %575 }
 0x42f   : > { %1015 = vrcp.f32 %v576_v53 }
 0x432   : > { %v742_v54 = vpop.xlane.xlu0 %741  ;;  %v746_v60 = vpop.permute.xlu1 %745 }
 0x433   : > { %1017 = vrcp.f32 %v742_v54 }
 0x435   : > { %v1014_v55 = vpop.eup %1013 }
 0x436   : > { %v412_v56 = vmul.f32 %v1014_v55, %v1008_v46  ;;  %v580_v57 = vpop.permute.xlu0 %579 }
 0x438   : > { %961 = vmatmul.mubr.msk.f32.vlgmr.msra.gmra.mrb[2].mxu0 %vm158_vm1, %v412_v56 }
 0x439   : > { %v1016_v58 = vpop.eup %1015  ;;  %969 = vmatpush3.msra.mxu0 %v580_v57  ;;  %970 = vmatprep.mubr.msk.f32.mxu0 %vm1028_vm0, %v1027_v0 }
 0x43a   : > { %v578_v59 = vmul.f32 %v1016_v58, %v1010_v48  ;;  %978 = vmatprep.subr.mxu0 %v1027_v0 }
 0x43c   : > { %971 = vmatmul.mubr.msk.f32.vlgmr.msra.gmra.mrb[4].mxu0 %vm158_vm1, %v578_v59 }
 0x43d   : > { %v1018_v61 = vpop.eup %1017  ;;  %979 = vmatpush3.msra.mxu0 %v746_v60  ;;  %980 = vmatprep.mubr.msk.f32.mxu0 %vm1028_vm0, %v1027_v0 }
 0x43e   : > { %v744_v62 = vmul.f32 %v1018_v61, %v1012_v50 }
 0x440   : > { %981 = vmatmul.mubr.msk.f32.vlgmr.msra.gmra.mrb[6].mxu0 %vm158_vm1, %v744_v62 }
 0x50b   : > { %v485_v63 = vpop.f32.mrb[2].mxu0 }
 0x50c   : > { %822 = vrot.lane.b32.xlu1 %v485_v63, %s1036_s25  ;;  %v962_v1 = vpop.f32.mrb[3].mxu0 }
 0x50f   : > { %v651_v2 = vpop.f32.mrb[4].mxu0 }
 0x510   : > { %826 = vrot.lane.b32.xlu0 %v651_v2, %s1037_s26  ;;  %v972_v3 = vpop.f32.mrb[5].mxu0 }
 0x513   : > { %v817_v4 = vpop.f32.mrb[6].mxu0 }
 0x514   : > { %830 = vrot.lane.b32.xlu1 %v817_v4, %s1038_s27  ;;  %v982_v5 = vpop.f32.mrb[7].mxu0 }
 0x57e   : > { %v823_v6 = vpop.permute.xlu1 %822 }
 0x57f   : > { %v833_v0 = vsel %vm158_vm1, %v1108_v22, %v823_v6 }
 0x582   : > { %v827_v7 = vpop.permute.xlu0 %826 }
 0x583   : > { %v835_v8 = vsel %vm834_vm2, %v833_v0, %v827_v7 }
 0x586   : > { %v831_v9 = vpop.permute.xlu1 %830 }
 0x587   : > { %v837_v10 = vsel %vm836_vm3, %v835_v8, %v831_v9 }
 0x588   : > { %839 = vst.msk [vmem:[%s155_s30] sm:$0xff] %vm838_vm4, %v837_v10 }
 0x589 PF: > { %s12_s9 = sadd.s32 1, %s1025_s9  }
 0x58a   : > { %p9_p4 = scmp.ge.s32.totalorder %s12_s9, 4  }
 0x58c   :  { %11 = sbr.rel (!%p9_p4) target bundleno = 1 (0x1), region = 61 }

// kernel: transformer_decoder_forward.24
= control target key start
LH: loop header
LB: loop body
LE: loop exit
PB: predicated region body
PF: predicated region fallthrough
CT: control target
= control target key end

     0   :  { %s2250_s0 = inlined_call_operand.vmem [shape: f32[16,32], index: 0, kind: input, shape index: {}]   ;;  %s2251_s1 = inlined_call_operand.vmem [shape: f32[32,2048], index: 1, kind: input, shape index: {}]   ;;  %s2252_s2 = inlined_call_operand.vmem [shape: f32[1,2048], index: 2, kind: input, shape index: {}]   ;;  %s2253_s3 = inlined_call_operand.vmem [shape: f32[2048,32], index: 3, kind: input, shape index: {}]   ;;  %s2254_s4 = inlined_call_operand.vmem [shape: f32[1,32], index: 4, kind: input, shape index: {}]   ;;  %s2255_s5 = inlined_call_operand.vmem [shape: f32[1,32], index: 5, kind: input, shape index: {}]   ;;  %s2256_s6 = inlined_call_operand.vmem [shape: f32[1,32], index: 6, kind: input, shape index: {}]   ;;  %s2257_s7 = inlined_call_operand.vmem [shape: f32[16,32], index: 7, kind: output, shape index: {}]  }
   0x1   :  { %2258 = sst [smem:[#allocation5_spill]] %s2251_s1 }
   0x2   :  { %s1851_s24 = smov 0   ;;  %s1853_s25 = smov 0  }
   0x3   :  { %s1855_s26 = smov 0   ;;  %s1857_s27 = smov 0  }
   0x4   :  { %s1859_s28 = smov 0   ;;  %s1861_s29 = smov 0  }
   0x5   :  { %s1863_s30 = smov 0  }
   0x6 LB: > { %s26_s8 = sadd.s32 1, %s1799_s28  ;;  %s29_s9 = sadd.s32 1, %s1803_s29  ;;  %s1807_s30 = sphi %s1863_s30, %s17_s30   ;;  %s1803_s29 = sphi %s1861_s29, %s2267_s29   ;;  %s1799_s28 = sphi %s1859_s28, %s2266_s28   ;;  %s1795_s27 = sphi %s1857_s27, %s2265_s27   ;;  %s1791_s26 = sphi %s1855_s26, %s2264_s26   ;;  %s1787_s25 = sphi %s1853_s25, %s2263_s25   ;;  %s1783_s24 = sphi %s1851_s24, %s2262_s24  }
   0x7   : > { %p27_p0 = scmp.ge.s32.totalorder %s26_s8, 2  ;;  %s62_s10 = sadd.s32 1, %s1787_s25 }
   0x8   : > { %p69_p1 = scmp.ne.s32.totalorder %s1787_s25, %s1783_s24  ;;  %p70_p2 = scmp.eq.s32.totalorder %s1807_s30, 0 }
   0x9   : > { %s2269_s8 = smov (%p27_p0, %s26_s8), 0  ;;  %s2271_s9 = smov (!%p27_p0, %s29_s9), %s1803_s29 }
   0xa   : > { %s59_s11 = ssub.s32 %s1799_s28, %s2269_s8  ;;  %p71_p3 = por %p70_p2, %p69_p1 }
   0xb   : > { %p31_p4 = scmp.ge.s32.totalorder %s2271_s9, 2  ;;  %p60_p5 = scmp.eq.s32.totalorder %s59_s11, 0 }
   0xc   : > { %p1370_p6 = scmp.ge.s32.totalorder %s1807_s30, 4 }
   0xd   : > { %s2273_s9 = smov (%p31_p4, %s2271_s9), 0 }
   0xe   : > { %2259 = sst [smem:[#allocation4_spill]] %s2273_s9  ;;  %245 = sbr.rel (%p1370_p6) target bundleno = 47 (0x2f), region = 28 }
   0xf   : > { %s1900_s12 = scalar_select %p60_p5, %s1787_s25, %s62_s10  }
  0x15   : > { %255 = sbr.rel (!%p71_p3) target bundleno = 47 (0x2f), region = 36  ;;  %s257_s13 = sand.u32 (%p71_p3), 1, %s1787_s25  }
  0x16   : > { %s1392_s14 = sshll.u32 (%p71_p3), %s1799_s28, 6  ;;  %s1371_s15 = sshll.u32 (%p71_p3), %s257_s13, 8 }
  0x17   : > { %s2260_s1 = sld [smem:[#allocation5_spill]] (%p71_p3)  ;;  %s1913_s19 = scalar_lea.vmem (%p71_p3), [#allocation3], %s1371_s15 }
  0x1d   : > { %s1908_s18 = scalar_lea.vmem %s2260_s1, %s1392_s14 }
  0x1e   : > { %v275_v0 = vld [vmem:[%s1908_s18] sm:$0xff]  ;;  %v277_v1 = vld [vmem:[%s1908_s18 + $0x8] sm:$0xff]  ;;  %v279_v2 = vld [vmem:[%s1908_s18 + $0x10] sm:$0xff] }
  0x1f   : > { %276 = vst [vmem:[%s1913_s19] sm:$0xff] %v275_v0  ;;  %278 = vst [vmem:[%s1913_s19 + $0x8] sm:$0xff] %v277_v1  ;;  %v281_v3 = vld [vmem:[%s1908_s18 + $0x18] sm:$0xff]  ;;  %v283_v4 = vld [vmem:[%s1908_s18 + $0x20] sm:$0xff] }
  0x20   : > { %280 = vst [vmem:[%s1913_s19 + $0x10] sm:$0xff] %v279_v2  ;;  %v285_v5 = vld [vmem:[%s1908_s18 + $0x28] sm:$0xff]  ;;  %282 = vst [vmem:[%s1913_s19 + $0x18] sm:$0xff] %v281_v3  ;;  %v287_v6 = vld [vmem:[%s1908_s18 + $0x30] sm:$0xff] }
  0x21   : > { %284 = vst [vmem:[%s1913_s19 + $0x20] sm:$0xff] %v283_v4  ;;  %286 = vst [vmem:[%s1913_s19 + $0x28] sm:$0xff] %v285_v5  ;;  %v289_v7 = vld [vmem:[%s1908_s18 + $0x38] sm:$0xff]  ;;  %v291_v8 = vld [vmem:[%s1908_s18 + $0x80] sm:$0xff] }
  0x22   : > { %288 = vst [vmem:[%s1913_s19 + $0x30] sm:$0xff] %v287_v6  ;;  %290 = vst [vmem:[%s1913_s19 + $0x38] sm:$0xff] %v289_v7  ;;  %v293_v9 = vld [vmem:[%s1908_s18 + $0x88] sm:$0xff]  ;;  %v295_v10 = vld [vmem:[%s1908_s18 + $0x90] sm:$0xff] }
  0x23   : > { %292 = vst [vmem:[%s1913_s19 + $0x40] sm:$0xff] %v291_v8  ;;  %v297_v11 = vld [vmem:[%s1908_s18 + $0x98] sm:$0xff]  ;;  %294 = vst [vmem:[%s1913_s19 + $0x48] sm:$0xff] %v293_v9  ;;  %v299_v12 = vld [vmem:[%s1908_s18 + $0xa0] sm:$0xff] }
  0x24   : > { %296 = vst [vmem:[%s1913_s19 + $0x50] sm:$0xff] %v295_v10  ;;  %298 = vst [vmem:[%s1913_s19 + $0x58] sm:$0xff] %v297_v11  ;;  %v301_v13 = vld [vmem:[%s1908_s18 + $0xa8] sm:$0xff]  ;;  %v303_v14 = vld [vmem:[%s1908_s18 + $0xb0] sm:$0xff] }
  0x25   : > { %300 = vst [vmem:[%s1913_s19 + $0x60] sm:$0xff] %v299_v12  ;;  %302 = vst [vmem:[%s1913_s19 + $0x68] sm:$0xff] %v301_v13  ;;  %v305_v15 = vld [vmem:[%s1908_s18 + $0xb8] sm:$0xff]  ;;  %v307_v16 = vld [vmem:[%s1908_s18 + $0x100] sm:$0xff] }
  0x26   : > { %304 = vst [vmem:[%s1913_s19 + $0x70] sm:$0xff] %v303_v14  ;;  %v309_v17 = vld [vmem:[%s1908_s18 + $0x108] sm:$0xff]  ;;  %306 = vst [vmem:[%s1913_s19 + $0x78] sm:$0xff] %v305_v15  ;;  %v311_v18 = vld [vmem:[%s1908_s18 + $0x110] sm:$0xff] }
  0x27   : > { %308 = vst [vmem:[%s1913_s19 + $0x80] sm:$0xff] %v307_v16  ;;  %310 = vst [vmem:[%s1913_s19 + $0x88] sm:$0xff] %v309_v17  ;;  %v313_v19 = vld [vmem:[%s1908_s18 + $0x118] sm:$0xff]  ;;  %v315_v20 = vld [vmem:[%s1908_s18 + $0x120] sm:$0xff] }
  0x28   : > { %312 = vst [vmem:[%s1913_s19 + $0x90] sm:$0xff] %v311_v18  ;;  %314 = vst [vmem:[%s1913_s19 + $0x98] sm:$0xff] %v313_v19  ;;  %v317_v21 = vld [vmem:[%s1908_s18 + $0x128] sm:$0xff]  ;;  %v319_v22 = vld [vmem:[%s1908_s18 + $0x130] sm:$0xff] }
  0x29   : > { %316 = vst [vmem:[%s1913_s19 + $0xa0] sm:$0xff] %v315_v20  ;;  %v321_v23 = vld [vmem:[%s1908_s18 + $0x138] sm:$0xff]  ;;  %318 = vst [vmem:[%s1913_s19 + $0xa8] sm:$0xff] %v317_v21  ;;  %v323_v24 = vld [vmem:[%s1908_s18 + $0x180] sm:$0xff] }
  0x2a   : > { %320 = vst [vmem:[%s1913_s19 + $0xb0] sm:$0xff] %v319_v22  ;;  %322 = vst [vmem:[%s1913_s19 + $0xb8] sm:$0xff] %v321_v23  ;;  %v325_v25 = vld [vmem:[%s1908_s18 + $0x188] sm:$0xff]  ;;  %v327_v26 = vld [vmem:[%s1908_s18 + $0x190] sm:$0xff] }
  0x2b   : > { %324 = vst [vmem:[%s1913_s19 + $0xc0] sm:$0xff] %v323_v24  ;;  %326 = vst [vmem:[%s1913_s19 + $0xc8] sm:$0xff] %v325_v25  ;;  %v329_v27 = vld [vmem:[%s1908_s18 + $0x198] sm:$0xff]  ;;  %v331_v28 = vld [vmem:[%s1908_s18 + $0x1a0] sm:$0xff] }
  0x2c   : > { %328 = vst [vmem:[%s1913_s19 + $0xd0] sm:$0xff] %v327_v26  ;;  %v333_v29 = vld [vmem:[%s1908_s18 + $0x1a8] sm:$0xff]  ;;  %330 = vst [vmem:[%s1913_s19 + $0xd8] sm:$0xff] %v329_v27  ;;  %v335_v30 = vld [vmem:[%s1908_s18 + $0x1b0] sm:$0xff] }
  0x2d   : > { %332 = vst [vmem:[%s1913_s19 + $0xe0] sm:$0xff] %v331_v28  ;;  %334 = vst [vmem:[%s1913_s19 + $0xe8] sm:$0xff] %v333_v29  ;;  %v337_v31 = vld [vmem:[%s1908_s18 + $0x1b8] sm:$0xff] }
  0x2e   : > { %336 = vst [vmem:[%s1913_s19 + $0xf0] sm:$0xff] %v335_v30  ;;  %338 = vst [vmem:[%s1913_s19 + $0xf8] sm:$0xff] %v337_v31 }
  0x2f PF: > { %p1374_p7 = scmp.ge.s32.totalorder %s1807_s30, 1  ;;  %p360_p8 = scmp.lt.s32.totalorder %s1807_s30, 5 }
  0x31   : > { %p361_p9 = pnand %p1374_p7, %p360_p8 }
  0x32   : > { %s367_s20 = sand.u32 (!%p361_p9), 1, %s1783_s24   ;;  %p410_p10 = scmp.lt.s32.totalorder (!%p361_p9), %s1795_s27, 1 }
  0x33   : > { %364 = sbr.rel (%p361_p9) target bundleno = 877 (0x36d), region = 67  ;;  %s1375_s21 = sshll.u32 (!%p361_p9), %s367_s20, 8 }
  0x34   : > { %s1377_s22 = sshll.u32 (!%p361_p9), %s1791_s26, 3  ;;  %s1378_s10 = sshll.u32 (!%p361_p9), %s1791_s26, 7 }
  0x35   : > { %p416_p11 = scmp.lt.s32.totalorder (!%p361_p9), %s1377_s22, 15  ;;  %p421_p12 = scmp.lt.s32.totalorder (!%p361_p9), %s1378_s10, 255 }
  0x36   : > { %s2004_s11 = scalar_lea.vmem (!%p361_p9), [#allocation3], %s1375_s21  ;;  %p1381_p13 = scmp.ne.s32.totalorder (!%p361_p9), %s1791_s26, 0 }
  0x3a   : > { %s2275_s27 = smov (!%p410_p10, %s1795_s27), 1  ;;  %s2277_s22 = smov (!%p416_p11, %s1377_s22), 15 }
  0x3b   : > { %s1376_s23 = sshll.u32 %s2275_s27, 3  ;;  %s418_s17 = scalar_lea.vmem %s2252_s2, %s2277_s22  ;;  %vm434_vm0 = vcmask (!%p1381_p13), 261120   ;;  %v1809_v32 = vmov (!%p1381_p13), 0.0  }
  0x3c   : > { %s1988_s14 = scalar_lea.vmem %s2250_s0, %s1376_s23  ;;  %s1997_s19 = scalar_lea.vmem %s2257_s7, %s1376_s23  ;;  %435 = vst.msk [vmem:[#allocation2] sm:$0xff] (!%p1381_p13), %vm434_vm0, %v1809_v32 }
  0x3d   : > { %s2279_s10 = smov (!%p421_p12, %s1378_s10), 255  ;;  %433 = sbr.rel (%p1381_p13) target bundleno = 68 (0x44), region = 75 }
  0x3e   : > { %s1379_s20 = sshll.u32 %s2279_s10, 3 }
  0x3f   : > { %s2002_s9 = scalar_lea.vmem %s2253_s3, %s1379_s20 }
  0x44 PF: > { %v438_v33 = vld [vmem:[%s2004_s11 + $0x8] sm:$0xff]  ;;  %v440_v35 = vld [vmem:[%s2004_s11 + $0x18] sm:$0xff]  ;;  %v437_v38 = vld [vmem:[%s2004_s11] sm:$0xff]  ;;  %v1810_v40 = vmov 0.0   ;;  %vm511_vm1 = vcmask 261120   ;;  %p1386_p0 = scmp.ne.s32.totalorder %s1791_s26, 1 }
  0x45   : > { %v446_v34 = vld [vmem:[%s2004_s11 + $0x48] sm:$0xff]  ;;  %v448_v37 = vld [vmem:[%s2004_s11 + $0x58] sm:$0xff]  ;;  %v445_v39 = vld [vmem:[%s2004_s11 + $0x40] sm:$0xff]  ;;  %579 = vmatprep.mubr.f32.mxu0 %v1810_v40  ;;  %650 = vmatprep.mubr.f32.mxu1 %v1810_v40 }
  0x46   : > { %v1533_v36 = vpack.c.bf16 %v446_v34, %v438_v33  ;;  %v1541_v41 = vpack.c.bf16 %v448_v37, %v440_v35  ;;  %v1535_v42 = vpack.c.bf16 %v445_v39, %v437_v38  ;;  %v439_v43 = vld [vmem:[%s2004_s11 + $0x10] sm:$0xff]  ;;  %v454_v45 = vld [vmem:[%s2004_s11 + $0x88] sm:$0xff]  ;;  %v456_v48 = vld [vmem:[%s2004_s11 + $0x98] sm:$0xff] }
  0x47   : > { %v447_v44 = vld [vmem:[%s2004_s11 + $0x50] sm:$0xff]  ;;  %v462_v47 = vld [vmem:[%s2004_s11 + $0xc8] sm:$0xff]  ;;  %v464_v49 = vld [vmem:[%s2004_s11 + $0xd8] sm:$0xff] }
  0x48   : > { %1534 = vmatprep.subr.bf16.mxu0 %v1533_v36  ;;  %v1543_v46 = vpack.c.bf16 %v447_v44, %v439_v43  ;;  %1542 = vmatprep.subr.bf16.mxu1 %v1541_v41  ;;  %v1537_v50 = vpack.c.bf16 %v462_v47, %v454_v45  ;;  %v1545_v51 = vpack.c.bf16 %v464_v49, %v456_v48  ;;  %v453_v52 = vld [vmem:[%s2004_s11 + $0x80] sm:$0xff]  ;;  %v455_v54 = vld [vmem:[%s2004_s11 + $0x90] sm:$0xff]  ;;  %v442_v57 = vld [vmem:[%s2004_s11 + $0x28] sm:$0xff] }
  0x49   : > { %1536 = vmatpush1.bf16.msra.mxu0 %v1535_v42  ;;  %v461_v53 = vld [vmem:[%s2004_s11 + $0xc0] sm:$0xff]  ;;  %v463_v56 = vld [vmem:[%s2004_s11 + $0xd0] sm:$0xff]  ;;  %v2027_v59 = vld [vmem:[%s1988_s14] sm:$0xff] }
  0x4a   : > { %1544 = vmatpush1.bf16.msra.mxu1 %v1543_v46  ;;  %v1539_v55 = vpack.c.bf16 %v461_v53, %v453_v52  ;;  %1538 = vmatprep.subr.bf16.mxu0 %v1537_v50  ;;  %v1547_v58 = vpack.c.bf16 %v463_v56, %v455_v54  ;;  %v450_v60 = vld [vmem:[%s2004_s11 + $0x68] sm:$0xff]  ;;  %v441_v61 = vld [vmem:[%s2004_s11 + $0x20] sm:$0xff]  ;;  %v444_v0 = vld [vmem:[%s2004_s11 + $0x38] sm:$0xff] }
  0x4b   : > { %1546 = vmatprep.subr.bf16.mxu1 %v1545_v51  ;;  %v449_v62 = vld [vmem:[%s2004_s11 + $0x60] sm:$0xff]  ;;  %v1549_v63 = vpack.c.bf16 %v450_v60, %v442_v57  ;;  %v452_v1 = vld [vmem:[%s2004_s11 + $0x78] sm:$0xff]  ;;  %v443_v2 = vld [vmem:[%s2004_s11 + $0x30] sm:$0xff] }
  0x4c   : > { %v1551_v3 = vpack.c.bf16 %v449_v62, %v441_v61  ;;  %v1557_v4 = vpack.c.bf16 %v452_v1, %v444_v0  ;;  %v451_v5 = vld [vmem:[%s2004_s11 + $0x70] sm:$0xff]  ;;  %v458_v6 = vld [vmem:[%s2004_s11 + $0xa8] sm:$0xff]  ;;  %v457_v10 = vld [vmem:[%s2004_s11 + $0xa0] sm:$0xff] }
  0x4d   : > { %1540 = vmatpush1.bf16.msra.mxu0 %v1539_v55  ;;  %v466_v7 = vld [vmem:[%s2004_s11 + $0xe8] sm:$0xff]  ;;  %v1559_v8 = vpack.c.bf16 %v451_v5, %v443_v2  ;;  %v465_v11 = vld [vmem:[%s2004_s11 + $0xe0] sm:$0xff]  ;;  %v460_v12 = vld [vmem:[%s2004_s11 + $0xb8] sm:$0xff] }
  0x4e   : > { %1548 = vmatpush1.bf16.msra.mxu1 %v1547_v58  ;;  %1550 = vmatprep.subr.bf16.mxu0 %v1549_v63  ;;  %v1553_v9 = vpack.c.bf16 %v466_v7, %v458_v6  ;;  %v468_v13 = vld [vmem:[%s2004_s11 + $0xf8] sm:$0xff]  ;;  %v459_v14 = vld [vmem:[%s2004_s11 + $0xb0] sm:$0xff]  ;;  %v825_v18 = vld [vmem:[%s2002_s9 + $0x88] sm:$0xff]  ;;  %v1555_v20 = vpack.c.bf16 %v465_v11, %v457_v10 }
  0x4f   : > { %1558 = vmatprep.subr.bf16.mxu1 %v1557_v4  ;;  %v467_v15 = vld [vmem:[%s2004_s11 + $0xf0] sm:$0xff]  ;;  %v1561_v16 = vpack.c.bf16 %v468_v13, %v460_v12  ;;  %v824_v17 = vld [vmem:[%s2002_s9 + $0x80] sm:$0xff]  ;;  %v857_v21 = vld [vmem:[%s2002_s9 + $0x188] sm:$0xff] }
  0x50   : > { %1382 = vmatmul.mubr.msk.f32.vlgmr.msra.gmra.mrb[0].mxu0 %vm511_vm1, %v2027_v59  ;;  %v856_v19 = vld [vmem:[%s2002_s9 + $0x180] sm:$0xff]  ;;  %v1563_v22 = vpack.c.bf16 %v467_v15, %v459_v14  ;;  %v1565_v23 = vpack.c.bf16 %v825_v18, %v824_v17  ;;  %v809_v25 = vld [vmem:[%s2002_s9 + $0x8] sm:$0xff]  ;;  %v826_v29 = vld [vmem:[%s2002_s9 + $0x90] sm:$0xff] }
  0x51   : > { %1383 = vmatmul.mubr.msk.f32.vlgmr.msra.gmra.mrb[0].mxu1 %vm511_vm1, %v2027_v59  ;;  %1552 = vmatpush1.bf16.msra.mxu0 %v1551_v3  ;;  %v808_v24 = vld [vmem:[%s2002_s9] sm:$0xff]  ;;  %v1597_v27 = vpack.c.bf16 %v857_v21, %v856_v19  ;;  %v841_v28 = vld [vmem:[%s2002_s9 + $0x108] sm:$0xff]  ;;  %v827_v30 = vld [vmem:[%s2002_s9 + $0x98] sm:$0xff] }
  0x52   : > { %1560 = vmatpush1.bf16.msra.mxu1 %v1559_v8  ;;  %1554 = vmatprep.subr.bf16.mxu0 %v1553_v9  ;;  %v840_v26 = vld [vmem:[%s2002_s9 + $0x100] sm:$0xff]  ;;  %v858_v31 = vld [vmem:[%s2002_s9 + $0x190] sm:$0xff]  ;;  %v859_v32 = vld [vmem:[%s2002_s9 + $0x198] sm:$0xff]  ;;  %v1567_v33 = vpack.c.bf16 %v809_v25, %v808_v24  ;;  %v1569_v35 = vpack.c.bf16 %v827_v30, %v826_v29 }
  0x53   : > { %1562 = vmatprep.subr.bf16.mxu1 %v1561_v16  ;;  %721 = vmatprep.mubr.f32.mxu0 %v1810_v40  ;;  %v1599_v34 = vpack.c.bf16 %v841_v28, %v840_v26  ;;  %v810_v36 = vld [vmem:[%s2002_s9 + $0x10] sm:$0xff]  ;;  %v811_v37 = vld [vmem:[%s2002_s9 + $0x18] sm:$0xff]  ;;  %v1601_v39 = vpack.c.bf16 %v859_v32, %v858_v31  ;;  %v828_v41 = vld [vmem:[%s2002_s9 + $0xa0] sm:$0xff] }
  0x54   : > { %792 = vmatprep.mubr.f32.mxu1 %v1810_v40  ;;  %v842_v38 = vld [vmem:[%s2002_s9 + $0x110] sm:$0xff]  ;;  %v843_v40 = vld [vmem:[%s2002_s9 + $0x118] sm:$0xff]  ;;  %v829_v42 = vld [vmem:[%s2002_s9 + $0xa8] sm:$0xff]  ;;  %v1571_v45 = vpack.c.bf16 %v811_v37, %v810_v36 }
  0x55   : > { %1556 = vmatpush1.bf16.msra.mxu0 %v1555_v20  ;;  %v860_v43 = vld [vmem:[%s2002_s9 + $0x1a0] sm:$0xff]  ;;  %v861_v44 = vld [vmem:[%s2002_s9 + $0x1a8] sm:$0xff]  ;;  %v1603_v46 = vpack.c.bf16 %v843_v40, %v842_v38  ;;  %v1573_v47 = vpack.c.bf16 %v829_v42, %v828_v41  ;;  %v830_v53 = vld [vmem:[%s2002_s9 + $0xb0] sm:$0xff] }
  0x56   : > { %1564 = vmatpush1.bf16.msra.mxu1 %v1563_v22  ;;  %1566 = vmatprep.subr.bf16.mxu0 %v1565_v23  ;;  %v812_v48 = vld [vmem:[%s2002_s9 + $0x20] sm:$0xff]  ;;  %v813_v49 = vld [vmem:[%s2002_s9 + $0x28] sm:$0xff]  ;;  %v1605_v51 = vpack.c.bf16 %v861_v44, %v860_v43  ;;  %v831_v54 = vld [vmem:[%s2002_s9 + $0xb8] sm:$0xff] }
  0x57   : > { %1598 = vmatprep.subr.bf16.mxu1 %v1597_v27  ;;  %v844_v50 = vld [vmem:[%s2002_s9 + $0x120] sm:$0xff]  ;;  %v845_v52 = vld [vmem:[%s2002_s9 + $0x128] sm:$0xff]  ;;  %v862_v55 = vld [vmem:[%s2002_s9 + $0x1b0] sm:$0xff]  ;;  %v1575_v57 = vpack.c.bf16 %v813_v49, %v812_v48 }
  0x58   : > { %1384 = vmatmul.mubr.msk.f32.vlgmr.msra.gmra.mrb[2].mxu0 %vm511_vm1, %v2027_v59  ;;  %v863_v56 = vld [vmem:[%s2002_s9 + $0x1b8] sm:$0xff]  ;;  %v1607_v58 = vpack.c.bf16 %v845_v52, %v844_v50  ;;  %v814_v60 = vld [vmem:[%s2002_s9 + $0x30] sm:$0xff]  ;;  %v832_v1 = vld [vmem:[%s2002_s9 + $0xc0] sm:$0xff] }
  0x59   : > { %1385 = vmatmul.mubr.msk.f32.vlgmr.msra.gmra.mrb[2].mxu1 %vm511_vm1, %v2027_v59  ;;  %1568 = vmatpush3.bf16.msra.mxu0 %v1567_v33  ;;  %v1577_v59 = vpack.c.bf16 %v831_v54, %v830_v53  ;;  %v815_v61 = vld [vmem:[%s2002_s9 + $0x38] sm:$0xff]  ;;  %v846_v62 = vld [vmem:[%s2002_s9 + $0x130] sm:$0xff]  ;;  %v1609_v63 = vpack.c.bf16 %v863_v56, %v862_v55  ;;  %v833_v2 = vld [vmem:[%s2002_s9 + $0xc8] sm:$0xff] }
  0x5a   : > { %1600 = vmatpush3.bf16.msra.mxu1 %v1599_v34  ;;  %1570 = vmatprep.subr.bf16.mxu0 %v1569_v35  ;;  %v847_v0 = vld [vmem:[%s2002_s9 + $0x138] sm:$0xff]  ;;  %v864_v3 = vld [vmem:[%s2002_s9 + $0x1c0] sm:$0xff]  ;;  %v865_v4 = vld [vmem:[%s2002_s9 + $0x1c8] sm:$0xff]  ;;  %v1579_v5 = vpack.c.bf16 %v815_v61, %v814_v60  ;;  %v1581_v7 = vpack.c.bf16 %v833_v2, %v832_v1 }
  0x5b   : > { %1602 = vmatprep.subr.bf16.mxu1 %v1601_v39  ;;  %v1611_v6 = vpack.c.bf16 %v847_v0, %v846_v62  ;;  %v816_v8 = vld [vmem:[%s2002_s9 + $0x40] sm:$0xff]  ;;  %v817_v9 = vld [vmem:[%s2002_s9 + $0x48] sm:$0xff]  ;;  %v1613_v11 = vpack.c.bf16 %v865_v4, %v864_v3  ;;  %v834_v13 = vld [vmem:[%s2002_s9 + $0xd0] sm:$0xff] }
  0x5c   : > { %v848_v10 = vld [vmem:[%s2002_s9 + $0x140] sm:$0xff]  ;;  %v849_v12 = vld [vmem:[%s2002_s9 + $0x148] sm:$0xff]  ;;  %v835_v14 = vld [vmem:[%s2002_s9 + $0xd8] sm:$0xff]  ;;  %v1583_v17 = vpack.c.bf16 %v817_v9, %v816_v8 }
  0x5d   : > { %1572 = vmatpush3.bf16.msra.mxu0 %v1571_v45  ;;  %v866_v15 = vld [vmem:[%s2002_s9 + $0x1d0] sm:$0xff]  ;;  %v867_v16 = vld [vmem:[%s2002_s9 + $0x1d8] sm:$0xff]  ;;  %v1615_v18 = vpack.c.bf16 %v849_v12, %v848_v10  ;;  %v1585_v19 = vpack.c.bf16 %v835_v14, %v834_v13  ;;  %v836_v25 = vld [vmem:[%s2002_s9 + $0xe0] sm:$0xff] }
  0x5e   : > { %1604 = vmatpush3.bf16.msra.mxu1 %v1603_v46  ;;  %1574 = vmatprep.subr.bf16.mxu0 %v1573_v47  ;;  %v818_v20 = vld [vmem:[%s2002_s9 + $0x50] sm:$0xff]  ;;  %v819_v21 = vld [vmem:[%s2002_s9 + $0x58] sm:$0xff]  ;;  %v1617_v23 = vpack.c.bf16 %v867_v16, %v866_v15  ;;  %v837_v26 = vld [vmem:[%s2002_s9 + $0xe8] sm:$0xff] }
  0x5f   : > { %1606 = vmatprep.subr.bf16.mxu1 %v1605_v51  ;;  %v850_v22 = vld [vmem:[%s2002_s9 + $0x150] sm:$0xff]  ;;  %v851_v24 = vld [vmem:[%s2002_s9 + $0x158] sm:$0xff]  ;;  %v868_v27 = vld [vmem:[%s2002_s9 + $0x1e0] sm:$0xff]  ;;  %v1587_v29 = vpack.c.bf16 %v819_v21, %v818_v20  ;;  %v1589_v31 = vpack.c.bf16 %v837_v26, %v836_v25 }
  0x60   : > { %v869_v28 = vld [vmem:[%s2002_s9 + $0x1e8] sm:$0xff]  ;;  %v1619_v30 = vpack.c.bf16 %v851_v24, %v850_v22  ;;  %v820_v32 = vld [vmem:[%s2002_s9 + $0x60] sm:$0xff]  ;;  %v838_v39 = vld [vmem:[%s2002_s9 + $0xf0] sm:$0xff] }
  0x61   : > { %1576 = vmatpush3.bf16.msra.mxu0 %v1575_v57  ;;  %v821_v33 = vld [vmem:[%s2002_s9 + $0x68] sm:$0xff]  ;;  %v1621_v34 = vpack.c.bf16 %v869_v28, %v868_v27  ;;  %v852_v35 = vld [vmem:[%s2002_s9 + $0x160] sm:$0xff]  ;;  %v839_v40 = vld [vmem:[%s2002_s9 + $0xf8] sm:$0xff]  ;;  %v471_v57 = vlaneseq }
  0x62   : > { %1608 = vmatpush3.bf16.msra.mxu1 %v1607_v58  ;;  %1578 = vmatprep.subr.bf16.mxu0 %v1577_v59  ;;  %v853_v36 = vld [vmem:[%s2002_s9 + $0x168] sm:$0xff]  ;;  %v1591_v37 = vpack.c.bf16 %v821_v33, %v820_v32  ;;  %v870_v41 = vld [vmem:[%s2002_s9 + $0x1f0] sm:$0xff]  ;;  %v1593_v42 = vpack.c.bf16 %v839_v40, %v838_v39  ;;  %v871_v43 = vld [vmem:[%s2002_s9 + $0x1f8] sm:$0xff] }
  0x63   : > { %1610 = vmatprep.subr.bf16.mxu1 %v1609_v63  ;;  %v1623_v38 = vpack.c.bf16 %v853_v36, %v852_v35  ;;  %v822_v44 = vld [vmem:[%s2002_s9 + $0x70] sm:$0xff]  ;;  %v823_v45 = vld [vmem:[%s2002_s9 + $0x78] sm:$0xff]  ;;  %v1625_v46 = vpack.c.bf16 %v871_v43, %v870_v41  ;;  %v888_v51 = vld [vmem:[%s2002_s9 + $0x280] sm:$0xff]  ;;  %v2122_v58 = vshrl.u32 %v471_v57, 7 }
  0x64   : > { %v1595_v47 = vpack.c.bf16 %v823_v45, %v822_v44  ;;  %v854_v48 = vld [vmem:[%s2002_s9 + $0x170] sm:$0xff]  ;;  %v855_v49 = vld [vmem:[%s2002_s9 + $0x178] sm:$0xff]  ;;  %v889_v52 = vld [vmem:[%s2002_s9 + $0x288] sm:$0xff] }
  0x65   : > { %1580 = vmatpush3.bf16.msra.mxu0 %v1579_v5  ;;  %v1627_v50 = vpack.c.bf16 %v855_v49, %v854_v48  ;;  %v920_v53 = vld [vmem:[%s2002_s9 + $0x380] sm:$0xff]  ;;  %v1629_v54 = vpack.c.bf16 %v889_v52, %v888_v51  ;;  %v921_v55 = vld [vmem:[%s2002_s9 + $0x388] sm:$0xff]  ;;  %v473_v59 = vsub.s32 0, %v2122_v58  ;;  %v481_v61 = vsub.s32 2, %v2122_v58  ;;  %v890_v15 = vld [vmem:[%s2002_s9 + $0x290] sm:$0xff] }
  0x66   : > { %1612 = vmatpush3.bf16.msra.mxu1 %v1611_v6  ;;  %1582 = vmatprep.subr.bf16.mxu0 %v1581_v7  ;;  %v1661_v56 = vpack.c.bf16 %v921_v55, %v920_v53  ;;  %v2130_v60 = vld [vmem:[%s418_s17] sm:$0xff]  ;;  %v477_v62 = vsub.s32 1, %v2122_v58  ;;  %v485_v63 = vsub.s32 3, %v2122_v58  ;;  %v873_v9 = vld [vmem:[%s2002_s9 + $0x208] sm:$0xff]  ;;  %v891_v16 = vld [vmem:[%s2002_s9 + $0x298] sm:$0xff]  ;;  %v501_v21 = vsub.s32 7, %v2122_v58 }
  0x67   : > { %1614 = vmatprep.subr.bf16.mxu1 %v1613_v11  ;;  %v474_v0 = vrot.slane %v2130_v60, %v473_v59  ;;  %v482_v1 = vrot.slane %v2130_v60, %v481_v61  ;;  %v872_v8 = vld [vmem:[%s2002_s9 + $0x200] sm:$0xff]  ;;  %v905_v14 = vld [vmem:[%s2002_s9 + $0x308] sm:$0xff]  ;;  %v923_v20 = vld [vmem:[%s2002_s9 + $0x398] sm:$0xff]  ;;  %v1633_v28 = vpack.c.bf16 %v891_v16, %v890_v15 }
  0x68   : > { %v478_v2 = vrot.slane %v2130_v60, %v477_v62  ;;  %v486_v3 = vrot.slane %v2130_v60, %v485_v63  ;;  %v904_v10 = vld [vmem:[%s2002_s9 + $0x300] sm:$0xff]  ;;  %v1631_v24 = vpack.c.bf16 %v873_v9, %v872_v8  ;;  %v907_v33 = vld [vmem:[%s2002_s9 + $0x318] sm:$0xff]  ;;  %v893_v35 = vld [vmem:[%s2002_s9 + $0x2a8] sm:$0xff]  ;;  %v502_v39 = vrot.slane %v2130_v60, %v501_v21 }
  0x69   : > { %1584 = vmatpush3.bf16.msra.mxu0 %v1583_v17  ;;  %v493_v17 = vsub.s32 5, %v2122_v58  ;;  %v1663_v27 = vpack.c.bf16 %v905_v14, %v904_v10  ;;  %v876_v44 = vld [vmem:[%s2002_s9 + $0x220] sm:$0xff]  ;;  %v877_v45 = vld [vmem:[%s2002_s9 + $0x228] sm:$0xff]  ;;  %v894_v51 = vld [vmem:[%s2002_s9 + $0x2b0] sm:$0xff] }
  0x6a   : > { %1616 = vmatpush3.bf16.msra.mxu1 %v1615_v18  ;;  %1586 = vmatprep.subr.bf16.mxu0 %v1585_v19  ;;  %v922_v19 = vld [vmem:[%s2002_s9 + $0x390] sm:$0xff]  ;;  %v895_v52 = vld [vmem:[%s2002_s9 + $0x2b8] sm:$0xff]  ;;  %v1639_v59 = vpack.c.bf16 %v877_v45, %v876_v44  ;;  %v928_v8 = vld [vmem:[%s2002_s9 + $0x3c0] sm:$0xff] }
  0x6b   : > { %1618 = vmatprep.subr.bf16.mxu1 %v1617_v23  ;;  %v1665_v32 = vpack.c.bf16 %v923_v20, %v922_v19  ;;  %v494_v36 = vrot.slane %v2130_v60, %v493_v17  ;;  %v926_v55 = vld [vmem:[%s2002_s9 + $0x3b0] sm:$0xff]  ;;  %v1641_v63 = vpack.c.bf16 %v895_v52, %v894_v51  ;;  %v929_v9 = vld [vmem:[%s2002_s9 + $0x3c8] sm:$0xff]  ;;  %v912_v15 = vld [vmem:[%s2002_s9 + $0x340] sm:$0xff] }
  0x6c   : > { %v881_v14 = vld [vmem:[%s2002_s9 + $0x248] sm:$0xff]  ;;  %v1677_v16 = vpack.c.bf16 %v929_v9, %v928_v8  ;;  %v899_v19 = vld [vmem:[%s2002_s9 + $0x2d8] sm:$0xff]  ;;  %v930_v20 = vld [vmem:[%s2002_s9 + $0x3d0] sm:$0xff] }
  0x6d   : > { %1588 = vmatpush3.bf16.msra.mxu0 %v1587_v29  ;;  %v874_v29 = vld [vmem:[%s2002_s9 + $0x210] sm:$0xff]  ;;  %v913_v17 = vld [vmem:[%s2002_s9 + $0x348] sm:$0xff]  ;;  %v931_v21 = vld [vmem:[%s2002_s9 + $0x3d8] sm:$0xff] }
  0x6e   : > { %1620 = vmatpush3.bf16.msra.mxu1 %v1619_v30  ;;  %1590 = vmatprep.subr.bf16.mxu0 %v1589_v31  ;;  %v875_v30 = vld [vmem:[%s2002_s9 + $0x218] sm:$0xff]  ;;  %v906_v31 = vld [vmem:[%s2002_s9 + $0x310] sm:$0xff]  ;;  %v917_v44 = vld [vmem:[%s2002_s9 + $0x368] sm:$0xff] }
  0x6f   : > { %1622 = vmatprep.subr.bf16.mxu1 %v1621_v34  ;;  %v892_v34 = vld [vmem:[%s2002_s9 + $0x2a0] sm:$0xff]  ;;  %v1635_v40 = vpack.c.bf16 %v875_v30, %v874_v29  ;;  %v915_v29 = vld [vmem:[%s2002_s9 + $0x358] sm:$0xff]  ;;  %v902_v45 = vld [vmem:[%s2002_s9 + $0x2f0] sm:$0xff] }
  0x70   : > { %v1637_v43 = vpack.c.bf16 %v893_v35, %v892_v34  ;;  %v900_v30 = vld [vmem:[%s2002_s9 + $0x2e0] sm:$0xff]  ;;  %v497_v35 = vsub.s32 6, %v2122_v58 }
  0x71   : > { %1592 = vmatpush3.bf16.msra.mxu0 %v1591_v37  ;;  %v924_v37 = vld [vmem:[%s2002_s9 + $0x3a0] sm:$0xff] }
  0x72   : > { %1624 = vmatpush3.bf16.msra.mxu1 %v1623_v38  ;;  %1594 = vmatprep.subr.bf16.mxu0 %v1593_v42  ;;  %v925_v38 = vld [vmem:[%s2002_s9 + $0x3a8] sm:$0xff]  ;;  %v1667_v42 = vpack.c.bf16 %v907_v33, %v906_v31 }
  0x73   : > { %1626 = vmatprep.subr.bf16.mxu1 %v1625_v46  ;;  %v908_v46 = vld [vmem:[%s2002_s9 + $0x320] sm:$0xff]  ;;  %v1669_v49 = vpack.c.bf16 %v925_v38, %v924_v37  ;;  %v901_v31 = vld [vmem:[%s2002_s9 + $0x2e8] sm:$0xff]  ;;  %v489_v37 = vsub.s32 4, %v2122_v58 }
  0x74   : > { %v933_v33 = vld [vmem:[%s2002_s9 + $0x3e8] sm:$0xff]  ;;  %v1653_v38 = vpack.c.bf16 %v901_v31, %v900_v30 }
  0x75   : > { %1596 = vmatpush3.bf16.msra.mxu0 %v1595_v47  ;;  %v490_v58 = vrot.slane %v2130_v60, %v489_v37 }
  0x76   : > { %1628 = vmatpush3.bf16.msra.mxu1 %v1627_v50  ;;  %1630 = vmatprep.subr.bf16.mxu0 %v1629_v54  ;;  %v909_v50 = vld [vmem:[%s2002_s9 + $0x328] sm:$0xff] }
  0x77   : > { %1662 = vmatprep.subr.bf16.mxu1 %v1661_v56  ;;  %v927_v56 = vld [vmem:[%s2002_s9 + $0x3b8] sm:$0xff]  ;;  %v1671_v62 = vpack.c.bf16 %v909_v50, %v908_v46  ;;  %v498_v50 = vrot.slane %v2130_v60, %v497_v35 }
  0x78   : > { %v903_v46 = vld [vmem:[%s2002_s9 + $0x2f8] sm:$0xff] }
 0x123   : > { %v581_v4 = vpop.f32.mrb[0].mxu0 }
 0x124   : > { %v582_v5 = vadd.f32 %v581_v4, %v474_v0  ;;  %v652_v6 = vpop.f32.mrb[0].mxu1  ;;  %v583_v7 = vpop.f32.mrb[1].mxu0  ;;  %v878_v0 = vld [vmem:[%s2002_s9 + $0x230] sm:$0xff]  ;;  %v1673_v4 = vpack.c.bf16 %v927_v56, %v926_v55  ;;  %v887_v55 = vld [vmem:[%s2002_s9 + $0x278] sm:$0xff] }
 0x125   : > { %v653_v11 = vadd.f32 %v652_v6, %v482_v1  ;;  %v584_v12 = vadd.f32 %v583_v7, %v478_v2  ;;  %v654_v13 = vpop.f32.mrb[1].mxu1  ;;  %v879_v1 = vld [vmem:[%s2002_s9 + $0x238] sm:$0xff]  ;;  %v910_v2 = vld [vmem:[%s2002_s9 + $0x330] sm:$0xff]  ;;  %v896_v6 = vld [vmem:[%s2002_s9 + $0x2c0] sm:$0xff] }
 0x126   : > { %v655_v18 = vadd.f32 %v654_v13, %v486_v3  ;;  %v799_v25 = vmax.f32 %v582_v5, 0.0  ;;  %v911_v5 = vld [vmem:[%s2002_s9 + $0x338] sm:$0xff]  ;;  %v897_v7 = vld [vmem:[%s2002_s9 + $0x2c8] sm:$0xff]  ;;  %v1643_v10 = vpack.c.bf16 %v879_v1, %v878_v0  ;;  %v880_v13 = vld [vmem:[%s2002_s9 + $0x240] sm:$0xff] }
 0x127   : > { %v801_v22 = vmax.f32 %v653_v11, 0.0  ;;  %v800_v23 = vmax.f32 %v584_v12, 0.0  ;;  %v1675_v11 = vpack.c.bf16 %v911_v5, %v910_v2  ;;  %v1645_v12 = vpack.c.bf16 %v897_v7, %v896_v6 }
 0x128   : > { %v802_v26 = vmax.f32 %v655_v18, 0.0  ;;  %v898_v18 = vld [vmem:[%s2002_s9 + $0x2d0] sm:$0xff] }
 0x129   : > { %1000 = vmatprep.mubr.f32.mxu0 %v800_v23  ;;  %v1679_v23 = vpack.c.bf16 %v913_v17, %v912_v15 }
 0x12a   : > { %1070 = vmatprep.mubr.f32.mxu1 %v802_v26  ;;  %1001 = vmatmul.mubr.f32.vlgmr.msra.gmra.mrb[4].mxu0 %v799_v25  ;;  %v882_v25 = vld [vmem:[%s2002_s9 + $0x250] sm:$0xff]  ;;  %v883_v26 = vld [vmem:[%s2002_s9 + $0x258] sm:$0xff] }
 0x12b   : > { %1071 = vmatmul.mubr.f32.vlgmr.msra.gmra.mrb[4].mxu1 %v801_v22  ;;  %1632 = vmatpush3.bf16.msra.mxu0 %v1631_v24  ;;  %v2159_v41 = vpop.f32.mrb[2].mxu0  ;;  %v1647_v22 = vpack.c.bf16 %v881_v14, %v880_v13  ;;  %v1649_v24 = vpack.c.bf16 %v899_v19, %v898_v18  ;;  %v1651_v34 = vpack.c.bf16 %v883_v26, %v882_v25  ;;  %v807_v14 = vld [vmem:[#allocation2] sm:$0xff] }
 0x12c   : > { %1664 = vmatpush3.bf16.msra.mxu1 %v1663_v27  ;;  %1634 = vmatprep.subr.bf16.mxu0 %v1633_v28  ;;  %v725_v47 = vpop.f32.mrb[3].mxu0  ;;  %v2164_v48 = vpop.f32.mrb[2].mxu1  ;;  %v914_v27 = vld [vmem:[%s2002_s9 + $0x350] sm:$0xff]  ;;  %v1681_v28 = vpack.c.bf16 %v931_v21, %v930_v20  ;;  %v1387_v18 = vld [vmem:[%s2254_s4] ss:$0 sm:$0xff] (!%p1386_p0) }
 0x12d   : > { %1666 = vmatprep.subr.bf16.mxu1 %v1665_v32  ;;  %v726_v53 = vadd.f32 %v725_v47, %v494_v36  ;;  %v796_v54 = vpop.f32.mrb[3].mxu1  ;;  %v932_v32 = vld [vmem:[%s2002_s9 + $0x3e0] sm:$0xff]  ;;  %v1683_v36 = vpack.c.bf16 %v915_v29, %v914_v27  ;;  %v934_v47 = vld [vmem:[%s2002_s9 + $0x3f0] sm:$0xff] }
 0x12e   : > { %v797_v57 = vadd.f32 %v796_v54, %v502_v39  ;;  %v884_v39 = vld [vmem:[%s2002_s9 + $0x260] sm:$0xff]  ;;  %v886_v54 = vld [vmem:[%s2002_s9 + $0x270] sm:$0xff] }
 0x12f   : > { %1636 = vmatpush3.bf16.msra.mxu0 %v1635_v40  ;;  %v804_v61 = vmax.f32 %v726_v53, 0.0  ;;  %v885_v40 = vld [vmem:[%s2002_s9 + $0x268] sm:$0xff]  ;;  %v1657_v53 = vpack.c.bf16 %v903_v46, %v902_v45  ;;  %v1231_v19 = vld [vmem:[%s1988_s14] sm:$0xff] (!%p1386_p0) }
 0x130   : > { %1668 = vmatpush3.bf16.msra.mxu1 %v1667_v42  ;;  %1638 = vmatprep.subr.bf16.mxu0 %v1637_v43  ;;  %v806_v3 = vmax.f32 %v797_v57, 0.0  ;;  %v916_v42 = vld [vmem:[%s2002_s9 + $0x360] sm:$0xff]  ;;  %v1685_v43 = vpack.c.bf16 %v933_v33, %v932_v32  ;;  %v1655_v51 = vpack.c.bf16 %v885_v40, %v884_v39  ;;  %v918_v57 = vld [vmem:[%s2002_s9 + $0x370] sm:$0xff] }
 0x131   : > { %1670 = vmatprep.subr.bf16.mxu1 %v1669_v49  ;;  %1140 = vmatprep.mubr.f32.mxu0 %v804_v61  ;;  %v935_v49 = vld [vmem:[%s2002_s9 + $0x3f8] sm:$0xff]  ;;  %v1687_v52 = vpack.c.bf16 %v917_v44, %v916_v42  ;;  %v795_v61 = vadd.f32 %v2164_v48, %v498_v50  ;;  %v1388_v32 = vld [vmem:[%s2255_s5] ss:$0 sm:$0xff] (!%p1386_p0) }
 0x132   : > { %1210 = vmatprep.mubr.f32.mxu1 %v806_v3  ;;  %v1689_v56 = vpack.c.bf16 %v935_v49, %v934_v47 }
 0x133   : > { %1640 = vmatpush3.bf16.msra.mxu0 %v1639_v59  ;;  %v919_v59 = vld [vmem:[%s2002_s9 + $0x378] sm:$0xff]  ;;  %v805_v60 = vmax.f32 %v795_v61, 0.0 }
 0x134   : > { %1672 = vmatpush3.bf16.msra.mxu1 %v1671_v62  ;;  %1642 = vmatprep.subr.bf16.mxu0 %v1641_v63  ;;  %v1659_v62 = vpack.c.bf16 %v887_v55, %v886_v54  ;;  %v724_v63 = vadd.f32 %v2159_v41, %v490_v58  ;;  %v1691_v0 = vpack.c.bf16 %v919_v59, %v918_v57 }
 0x135   : > { %1674 = vmatprep.subr.bf16.mxu1 %v1673_v4 }
 0x136   : > { %v803_v1 = vmax.f32 %v724_v63, 0.0 }
 0x137   : > { %1644 = vmatpush3.bf16.msra.mxu0 %v1643_v10 }
 0x138   : > { %1676 = vmatpush3.bf16.msra.mxu1 %v1675_v11  ;;  %1646 = vmatprep.subr.bf16.mxu0 %v1645_v12 }
 0x139   : > { %1678 = vmatprep.subr.bf16.mxu1 %v1677_v16 }
 0x13b   : > { %1648 = vmatpush3.bf16.msra.mxu0 %v1647_v22 }
 0x13c   : > { %1680 = vmatpush3.bf16.msra.mxu1 %v1679_v23  ;;  %1650 = vmatprep.subr.bf16.mxu0 %v1649_v24 }
 0x13d   : > { %1682 = vmatprep.subr.bf16.mxu1 %v1681_v28 }
 0x13f   : > { %1652 = vmatpush3.bf16.msra.mxu0 %v1651_v34  ;;  %v1389_v34 = vld [vmem:[%s2256_s6] ss:$0 sm:$0xff] (!%p1386_p0) }
 0x140   : > { %1684 = vmatpush3.bf16.msra.mxu1 %v1683_v36  ;;  %1654 = vmatprep.subr.bf16.mxu0 %v1653_v38 }
 0x141   : > { %1686 = vmatprep.subr.bf16.mxu1 %v1685_v43 }
 0x143   : > { %1656 = vmatpush3.bf16.msra.mxu0 %v1655_v51 }
 0x144   : > { %1688 = vmatpush3.bf16.msra.mxu1 %v1687_v52  ;;  %1658 = vmatprep.subr.bf16.mxu0 %v1657_v53 }
 0x145   : > { %1690 = vmatprep.subr.bf16.mxu1 %v1689_v56 }
 0x147   : > { %1660 = vmatpush3.bf16.msra.mxu0 %v1659_v62 }
 0x148   : > { %1692 = vmatpush3.bf16.msra.mxu1 %v1691_v0 }
 0x14a   : > { %1141 = vmatmul.mubr.f32.vlgmr.msra.gmra.mrb[6].mxu0 %v803_v1 }
 0x14b   : > { %1211 = vmatmul.mubr.f32.vlgmr.msra.gmra.mrb[6].mxu1 %v805_v60 }
 0x1fd   : > { %v1425_v2 = vpop.f32.mrb[4].mxu0 }
 0x1fe   : > { %v1460_v3 = vpop.f32.mrb[4].mxu1  ;;  %v1426_v4 = vpop.f32.mrb[5].mxu0 }
 0x1ff   : > { %v1427_v5 = vadd.f32 %v1426_v4, %v1425_v2  ;;  %v1461_v6 = vpop.f32.mrb[5].mxu1 }
 0x200   : > { %v1462_v48 = vadd.f32 %v1461_v6, %v1460_v3 }
 0x202   : > { %v1073_v7 = vadd.f32 %v1462_v48, %v1427_v5 }
 0x21d   : > { %v1495_v8 = vpop.f32.mrb[6].mxu0 }
 0x21e   : > { %v1530_v9 = vpop.f32.mrb[6].mxu1  ;;  %v1496_v41 = vpop.f32.mrb[7].mxu0 }
 0x21f   : > { %v1497_v10 = vadd.f32 %v1496_v41, %v1495_v8  ;;  %v1531_v11 = vpop.f32.mrb[7].mxu1 }
 0x220   : > { %v1532_v12 = vadd.f32 %v1531_v11, %v1530_v9 }
 0x221   : > { %v1143_v13 = vadd.f32 %v1497_v10, %v1073_v7  ;;  %1221 = sbr.rel (%p1386_p0) target bundleno = 877 (0x36d), region = 79 }
 0x223   : > { %v1213_v15 = vadd.f32 %v1532_v12, %v1143_v13 }
 0x225   : > { %v1216_v16 = vadd.f32 %v1213_v15, %v807_v14 }
 0x227   : > { %1217 = vst.msk [vmem:[#allocation2] sm:$0xff] %vm511_vm1, %v1216_v16 }
 0x22e   : > { %v1222_v17 = vld [vmem:[#allocation2] sm:$0xff] }
 0x22f   : > { %v1230_v20 = vadd.f32 %v1387_v18, %v1222_v17 }
 0x231   : > { %v1232_v21 = vadd.f32 %v1231_v19, %v1230_v20 }
 0x233   : > { %v1233_v22 = vsel %vm511_vm1, %v1232_v21, 0.0 }
 0x234   : > { %1234 = vadd.xlane.f32.xlu0 %v1233_v22 }
 0x2c1   : > { %v1235_v23 = vpop.xlane.xlu0 %1234 }
 0x2c2   : > { %v1237_v24 = vmul.f32 0.03125, %v1235_v23 }
 0x2c4   : > { %v1238_v25 = vsub.f32 %v1232_v21, %v1237_v24 }
 0x2c6   : > { %v1239_v26 = vmul.f32 %v1238_v25, %v1238_v25 }
 0x2c8   : > { %v1240_v27 = vsel %vm511_vm1, %v1239_v26, 0.0 }
 0x2c9   : > { %1241 = vadd.xlane.f32.xlu0 %v1240_v27 }
 0x356   : > { %v1242_v28 = vpop.xlane.xlu0 %1241 }
 0x357   : > { %v1243_v29 = vmul.f32 0.03125, %v1242_v28 }
 0x359   : > { %v1244_v30 = vadd.f32 1e-05, %v1243_v29 }
 0x35b   : > { %1751 = vrsqrt.f32 %v1244_v30 }
 0x365   : > { %v1752_v31 = vpop.eup %1751 }
 0x366   : > { %v1246_v33 = vmul.f32 %v1752_v31, %v1238_v25 }
 0x368   : > { %v1254_v35 = vmul.f32 %v1388_v32, %v1246_v33 }
 0x36a   : > { %v1262_v36 = vadd.f32 %v1389_v34, %v1254_v35 }
 0x36c   : > { %1263 = vst.msk [vmem:[%s1997_s19] sm:$0xff] %vm511_vm1, %v1262_v36 }
 0x36d PF: > { %s17_s30 = sadd.s32 1, %s1807_s30   ;;  %s2261_s14 = sld [smem:[#allocation4_spill]] }
 0x36e   : > { %p14_p1 = scmp.ge.s32.totalorder %s17_s30, 6   ;;  %s2262_s24 = smov %s1787_s25 }
 0x36f   : > { %s2263_s25 = smov %s1900_s12  ;;  %s2264_s26 = smov %s1799_s28 }
 0x370   : > { %s2265_s27 = smov %s1803_s29  ;;  %s2266_s28 = smov %s2269_s8 }
 0x371   :  { %16 = sbr.rel (!%p14_p1) target bundleno = 6 (0x6), region = 123 }
 0x373   : > { %s2267_s29 = smov %s2261_s14 }

// kernel: transformer_decoder_forward.33
= control target key start
LH: loop header
LB: loop body
LE: loop exit
PB: predicated region body
PF: predicated region fallthrough
CT: control target
= control target key end

     0   :  { %8 = vsyncpa [#allocation4], 0  ;;  %s795_s0 = inlined_call_operand.vmem [shape: f32[16,32], index: 0, kind: input, shape index: {}]   ;;  %s796_s1 = inlined_call_operand.vmem [shape: f32[32,50], index: 1, kind: input, shape index: {}]   ;;  %s797_s2 = inlined_call_operand.vmem [shape: f32[1,50], index: 2, kind: input, shape index: {}]   ;;  %s798_s3 = inlined_call_operand.hbm [shape: f32[16,50], index: 3, kind: output, shape index: {}]  }
   0x1   :  { %10 = vsyncpa [#allocation4 + $0x1], 0  ;;  %s665_s12 = smov 0   ;;  %s667_s13 = smov 0  }
   0x2   :  { %s669_s14 = smov 0   ;;  %s671_s15 = smov 0  }
   0x3   :  { %s673_s16 = smov 0   ;;  %s675_s17 = smov 0  }
   0x4 LB: > { %s466_s18 = sadd.s32 4294967295, %s639_s17   ;;  %s467_s19 = sadd.s32 4294967294, %s639_s17   ;;  %s639_s17 = sphi %s675_s17, %s16_s17   ;;  %s635_s16 = sphi %s673_s16, %s805_s16   ;;  %s631_s15 = sphi %s671_s15, %s804_s15   ;;  %s627_s14 = sphi %s669_s14, %s803_s14   ;;  %s623_s13 = sphi %s667_s13, %s802_s13   ;;  %s619_s12 = sphi %s665_s12, %s801_s12  }
   0x5   : > { %s35_s20 = sadd.s32 1, %s635_s16  ;;  %s126_s21 = sadd.s32 1, %s627_s14 }
   0x6   : > { %p37_p0 = scmp.ge.s32.totalorder %s35_s20, 2  ;;  %p136_p1 = scmp.ne.s32.totalorder %s627_s14, %s623_s13 }
   0x7   : > { %p137_p2 = scmp.eq.s32.totalorder %s466_s18, 1  ;;  %p142_p3 = scmp.ne.s32.totalorder %s623_s13, %s619_s12 }
   0x8   : > { %s807_s20 = smov (%p37_p0, %s35_s20), 0  ;;  %p143_p5 = scmp.eq.s32.totalorder %s467_s19, 1 }
   0x9   : > { %p705_p4 = por %p137_p2, %p136_p1  ;;  %s121_s23 = ssub.s32 %s635_s16, %s807_s20 }
   0xa   : > { %p472_p6 = scmp.ge.s32.totalorder %s639_s17, 1  ;;  %p124_p7 = scmp.eq.s32.totalorder %s121_s23, 0 }
   0xb   : > { %p712_p8 = por %p143_p5, %p142_p3  ;;  %p189_p9 = scmp.lt.s32.totalorder %s639_s17, 3 }
   0xc   : > { %s718_s25 = scalar_select %p124_p7, %s627_s14, %s126_s21  }
   0xd   : > { %p190_p10 = pnand %p472_p6, %p189_p9 }
   0xe   : > { %v253_v0 = vld [vmem:[%s796_s1] sm:$0xff] (!%p190_p10)  ;;  %v254_v1 = vld [vmem:[%s796_s1 + $0x8] sm:$0xff] (!%p190_p10)  ;;  %v255_v2 = vld [vmem:[%s796_s1 + $0x10] sm:$0xff] (!%p190_p10)  ;;  %vm249_vm0 = vcmask (!%p190_p10), 408576   ;;  %v641_v3 = vmov (!%p190_p10), 0.0|0.0   ;;  %v642_v6 = vmov (!%p190_p10), 0.0  }
   0xf   : > { %193 = sbr.rel (%p190_p10) target bundleno = 265 (0x109), region = 32  ;;  %497 = vmatprep.subr.bf16.mxu0 (!%p190_p10), %v641_v3  ;;  %v498_v4 = vpack.c.bf16 (!%p190_p10), %v254_v1, %v253_v0  ;;  %v256_v5 = vld [vmem:[%s796_s1 + $0x18] sm:$0xff] (!%p190_p10)  ;;  %250 = vst.msk [vmem:[#allocation2] sm:$0xff] (!%p190_p10), %vm249_vm0, %v642_v6  ;;  %p226_p11 = scmp.lt.s32.totalorder (!%p190_p10), %s631_s15, 1  ;;  %vm643_vm1 = vmmov (!%p190_p10), 0   ;;  %vm257_vm2 = vcmask (!%p190_p10), 261120  }
  0x10   : > { %494 = vmatprep.mubr.msk.f32.mxu0 (!%p190_p10), %vm643_vm1, %v642_v6  ;;  %v501_v7 = vpack.c.bf16 (!%p190_p10), %v256_v5, %v255_v2  ;;  %s223_s18 = sand.u32 (!%p190_p10), 1, %s623_s13   ;;  %v476_v13 = vld [vmem:[%s797_s2] ss:$0 sm:$0xff] (!%p190_p10)  ;;  %s478_s26 = sshll.u32 (!%p190_p10), %s631_s15, 7 }
  0x11   : > { %499 = vmatpush3.bf16.msra.mxu0 (!%p190_p10), %v498_v4  ;;  %s473_s19 = sshll.u32 (!%p190_p10), %s223_s18, 3  ;;  %s747_s4 = scalar_lea.hbm (!%p190_p10), %s798_s3, %s478_s26 }
  0x12   : > { %500 = vmatprep.subr.bf16.mxu0 (!%p190_p10), %v641_v3  ;;  %s225_s27 = scalar_lea.vmem (!%p190_p10), [#allocation3], %s473_s19  ;;  %s348_s5 = scalar_lea.sflag (!%p190_p10), [#allocation4], %s223_s18 }
  0x13   : > { %s362_s28 = sshll.u32 (!%p190_p10), %s225_s27, 4  ;;  %s749_s28 = int_to_ptr.vmem [resolvable:$true] %s362_s28 }
  0x14   : > { %s561_s6 = scalar_lea.vmem (!%p190_p10), %s749_s28, 128 }
  0x15   : > { %502 = vmatpush3.bf16.msra.mxu0 (!%p190_p10), %v501_v7  ;;  %p562_p12 = scmp.ne.s32.totalorder (!%p190_p10), %s749_s28, %s561_s6 }
  0x16   : > { %s227_s7 = scalar_select %p226_p11, %s631_s15, 1  ;;  %v251_v9 = vld [vmem:[#allocation2] sm:$0xff] }
  0x17   : > { %p563_p13 = pnand %p562_p12, %p705_p4  ;;  %s644_s15 = smov [#allocation3]  }
  0x18   : > { %s474_s8 = sshll.u32 %s227_s7, 3  ;;  %s565_s7 = sshll.u32 %s644_s15, 4  ;;  %s566_s7 = int_to_ptr.vmem [resolvable:$false] %s565_s7 }
  0x19   : > { %s232_s11 = scalar_lea.vmem %s795_s0, %s474_s8  ;;  %p564_p0 = pneg %p563_p13 }
  0x1a   : > { %v252_v8 = vld [vmem:[%s232_s11] sm:$0xff]  ;;  %s567_s8 = scalar_lea.vmem %s566_s7, 256  ;;  %p568_p1 = scmp.lt.s32.totalorder %s749_s28, %s566_s7 }
  0x1b   : > { %495 = vmatmul.mubr.msk.f32.vlgmr.msra.gmra.mrb[0].mxu0 %vm257_vm2, %v252_v8  ;;  %p569_p2 = scmp.lt.s32.totalorder %s567_s8, %s561_s6 }
  0x1d   : > { %p570_p3 = por %p569_p2, %p568_p1 }
  0x1f   : > { %p571_p5 = pnand %p570_p3, %p564_p0 }
  0xee   : > { %v327_v10 = vpop.f32.mrb[0].mxu0 }
  0xef   : > { %v331_v11 = vadd.f32 %v327_v10, %v251_v9  ;;  %v496_v12 = vpop.f32.mrb[1].mxu0 }
  0xf1   : > { %333 = vst.msk [vmem:[#allocation2] sm:$0xff] %vm249_vm0, %v331_v11 }
  0xf8   : > { %v337_v14 = vld [vmem:[#allocation2] sm:$0xff] }
  0xf9   : > { %v345_v15 = vadd.f32 %v476_v13, %v337_v14 }
  0xfb   : > { %346 = vst.msk [vmem:[%s225_s27] sm:$0xff] %vm249_vm0, %v345_v15 }
  0xfc   : > { %574 = shalt.err (!%p571_p5)
}
  0xfd   : > { %s575_s9 = scalar_lea.hbm %s747_s4, 128  ;;  %s579_s18 = scalar_lea.hbm %s798_s3, 256 }
  0xfe   : > { %p576_p6 = scmp.ne.s32.totalorder %s747_s4, %s575_s9  ;;  %p580_p10 = scmp.lt.u32.totalorder %s747_s4, %s798_s3 }
  0xff   : > { %p581_p11 = scmp.lt.u32.totalorder %s579_s18, %s575_s9  ;;  %p583_p13 = scmp.lt.u32.totalorder %s575_s9, %s747_s4 }
 0x100   : > { %p577_p7 = pnand %p576_p6, %p705_p4 }
 0x101   : > { %p582_p12 = por %p581_p11, %p580_p10 }
 0x102   : > { %p578_p9 = pneg %p577_p7 }
 0x103   : > { %p584_p0 = por %p583_p13, %p582_p12 }
 0x105   : > { %p585_p1 = pnand %p584_p0, %p578_p9 }
 0x107   : > { %588 = shalt.err (!%p585_p1)
}
 0x108   : > { %503 = dma.vmem_to_hbm [thread:$0]  (%p705_p4), %s749_s28, 128, %s747_s4, %s348_s5  }
 0x109 PF: > { %p509_p2 = scmp.ge.s32.totalorder %s639_s17, 2  ;;  %s374_s23 = sand.u32 1, %s619_s12  }
 0x10a   : > { %s375_s26 = scalar_lea.sflag [#allocation4], %s374_s23 }
 0x10b   : > { %p506_p3 = pnand %p509_p2, %p712_p8 }
 0x10d   : > { %614 = dma.done.wait (!%p506_p3), %s375_s26, 128  }
 0x10e   : > { %616 = vsyncadd (!%p506_p3), %s375_s26, 4294967168  ;;  %s16_s17 = sadd.s32 1, %s639_s17   ;;  %s801_s12 = smov %s623_s13 }
 0x10f   : > { %p13_p5 = scmp.ge.s32.totalorder %s16_s17, 4   ;;  %s802_s13 = smov %s627_s14 }
 0x110   : > { %s803_s14 = smov %s718_s25  ;;  %s804_s15 = smov %s635_s16 }
 0x111   : > { %s805_s16 = smov %s807_s20  ;;  %15 = sbr.rel (!%p13_p5) target bundleno = 4 (0x4), region = 81 }
 0x118   :  { %380 = vsyncpa [#allocation4], 1 }
 0x119   :  { %382 = vsyncpa [#allocation4 + $0x1], 1 }

</bundles_post_ra>
